<compile_context>
chip_gen: v7x
topology: tpu7x:2x2x1
jax: 0.10.0
libtpu: 0.0.40
codegen_flags: <defaults>
</compile_context>

<pallas_src>
import functools

import jax
import jax.numpy as jnp
import numpy as np
from jax import lax
from jax.experimental import pallas as pl
from jax.experimental.pallas import tpu as pltpu

EPS = 1e-5
SUB = 8   # sublane width: halo row stride padded to a multiple of this


def _round_up(x, m):
    return (x + m - 1) // m * m


# ----------------------------------------------------------------------------
# In-kernel helper: sublane-aligned zero halo + 9 tap-accumulated MXU matmuls.
# ----------------------------------------------------------------------------
def _conv3x3_acc(pad_ref, act, w_ref, H, W, C, Cout):
    """3x3 / pad=1 conv of `act` (H, W, C) with w_ref (9, C, Cout) -> (H*W, Cout) f32.

    pad_ref: (H+2, Wp, C) VMEM halo scratch, Wp = round_up(W+2, 8) so every
    image row starts on a sublane-aligned stride.  Only the 1-pixel border is
    zeroed; columns >= W+2 are never read by any tap and stay uninitialized.
    No im2col matrix is materialized: each tap slice feeds the MXU directly,
    so K per matmul is the true channel count (no 128-aligned slot padding)
    and the 9-way add lives in the f32 accumulator (MRB-friendly on v7x).
    """
    Wp = pad_ref.shape[1]
    zrow = jnp.zeros((1, Wp, C), pad_ref.dtype)
    pad_ref[0:1] = zrow                                     # top border row
    pad_ref[H + 1:H + 2] = zrow                             # bottom border row
    zcol = jnp.zeros((H, 1, C), pad_ref.dtype)
    pad_ref[1:H + 1, 0:1, :] = zcol                         # left border col
    pad_ref[1:H + 1, W + 1:W + 2, :] = zcol                 # right border col
    pad_ref[1:H + 1, 1:W + 1, :] = act                      # interior

    acc = None
    for dy in range(3):
        for dx in range(3):
            tap = pad_ref[dy:dy + H, dx:dx + W, :].reshape(H * W, C)
            d = jnp.dot(tap, w_ref[dy * 3 + dx], preferred_element_type=jnp.float32)
            acc = d if acc is None else acc + d
    return acc


def _bn_affine_from_stats(s, q, g, b, count):
    """(1, C) scale/bias from summed channel sum / sum-of-squares (biased var)."""
    mean = s / count
    var = jnp.maximum(q / count - mean * mean, 0.0)
    scale = g * lax.rsqrt(var + EPS)            # EUP rsqrt (free slot)
    bias = b - mean * scale
    return scale, bias


# ----------------------------------------------------------------------------
# Kernel 1: conv1 (tap-accumulated MXU matmuls) + fused per-image BN statistics.
# ----------------------------------------------------------------------------
def _conv_stats_kernel(x_ref, w_ref, y_ref, sum_ref, ssq_ref, pad_ref):
    H, W, Cin = x_ref.shape[1], x_ref.shape[2], x_ref.shape[3]
    Cout = w_ref.shape[2]
    acc = _conv3x3_acc(pad_ref, x_ref[0].astype(pad_ref.dtype), w_ref, H, W, Cin, Cout)
    sum_ref[0] = jnp.sum(acc, axis=0, keepdims=True)        # (1, Cout) f32
    ssq_ref[0] = jnp.sum(acc * acc, axis=0, keepdims=True)
    y_ref[0] = acc.reshape(H, W, Cout).astype(y_ref.dtype)


# ----------------------------------------------------------------------------
# Kernel 2: BN1 + ReLU prologue (affine computed in-kernel from summed stats,
#           f32 VPU) -> conv2 tap-accumulated matmuls -> BN2 statistics.
# ----------------------------------------------------------------------------
def _bn_relu_conv_stats_kernel(y1_ref, s1_ref, q1_ref, g1_ref, b1_ref, w_ref,
                               y2_ref, sum_ref, ssq_ref, pad_ref, *, count):
    H, W, C = y1_ref.shape[1], y1_ref.shape[2], y1_ref.shape[3]
    Cout = w_ref.shape[2]
    scale, bias = _bn_affine_from_stats(s1_ref[...], q1_ref[...],
                                        g1_ref[...], b1_ref[...], count)
    # Elementwise BN/ReLU in f32 (v5e has no bf16 VPU); cast only for the MXU.
    a = jnp.maximum(y1_ref[0].astype(jnp.float32) * scale + bias, 0.0)
    acc = _conv3x3_acc(pad_ref, a.astype(pad_ref.dtype), w_ref, H, W, C, Cout)
    sum_ref[0] = jnp.sum(acc, axis=0, keepdims=True)
    ssq_ref[0] = jnp.sum(acc * acc, axis=0, keepdims=True)
    y2_ref[0] = acc.reshape(H, W, Cout).astype(y2_ref.dtype)


# ----------------------------------------------------------------------------
# Kernel 3: final BN2 + ReLU (affine computed in-kernel), real channels only.
# ----------------------------------------------------------------------------
def _bn_relu_kernel(y_ref, s_ref, q_ref, g_ref, b_ref, o_ref, *, count):
    scale, bias = _bn_affine_from_stats(s_ref[...], q_ref[...],
                                        g_ref[...], b_ref[...], count)
    y = y_ref[0].astype(jnp.float32)
    o_ref[0] = jnp.maximum(y * scale + bias, 0.0).astype(o_ref.dtype)


# ----------------------------------------------------------------------------
# pallas_call wrappers
# ----------------------------------------------------------------------------
def _conv_stats(x, w, compute_dtype):
    N, H, W, Cin = x.shape
    Cout = w.shape[2]
    Wp = _round_up(W + 2, SUB)
    y, s, q = pl.pallas_call(
        _conv_stats_kernel,
        out_shape=(
            jax.ShapeDtypeStruct((N, H, W, Cout), compute_dtype),
            jax.ShapeDtypeStruct((N, 1, Cout), jnp.float32),
            jax.ShapeDtypeStruct((N, 1, Cout), jnp.float32),
        ),
        grid=(N,),
        in_specs=[
            pl.BlockSpec((1, H, W, Cin), lambda n: (n, 0, 0, 0)),
            pl.BlockSpec((9, Cin, Cout), lambda n: (0, 0, 0)),
        ],
        out_specs=(
            pl.BlockSpec((1, H, W, Cout), lambda n: (n, 0, 0, 0)),
            pl.BlockSpec((1, 1, Cout), lambda n: (n, 0, 0)),
            pl.BlockSpec((1, 1, Cout), lambda n: (n, 0, 0)),
        ),
        scratch_shapes=[pltpu.VMEM((H + 2, Wp, Cin), compute_dtype)],  # halo
        compiler_params=pltpu.CompilerParams(dimension_semantics=("parallel",)),
    )(x, w)
    # Tiny reduction over the batch axis of the per-image stats -> (1, Cout).
    return y, jnp.sum(s, axis=0), jnp.sum(q, axis=0)


def _bn_relu_conv_stats(y1, s1, q1, g1, b1, w, count, compute_dtype):
    N, H, W, C = y1.shape
    Cout = w.shape[2]
    Wp = _round_up(W + 2, SUB)
    kernel = functools.partial(_bn_relu_conv_stats_kernel, count=count)
    y, s, q = pl.pallas_call(
        kernel,
        out_shape=(
            jax.ShapeDtypeStruct((N, H, W, Cout), compute_dtype),
            jax.ShapeDtypeStruct((N, 1, Cout), jnp.float32),
            jax.ShapeDtypeStruct((N, 1, Cout), jnp.float32),
        ),
        grid=(N,),
        in_specs=[
            pl.BlockSpec((1, H, W, C), lambda n: (n, 0, 0, 0)),
            pl.BlockSpec((1, C), lambda n: (0, 0)),
            pl.BlockSpec((1, C), lambda n: (0, 0)),
            pl.BlockSpec((1, C), lambda n: (0, 0)),
            pl.BlockSpec((1, C), lambda n: (0, 0)),
            pl.BlockSpec((9, C, Cout), lambda n: (0, 0, 0)),
        ],
        out_specs=(
            pl.BlockSpec((1, H, W, Cout), lambda n: (n, 0, 0, 0)),
            pl.BlockSpec((1, 1, Cout), lambda n: (n, 0, 0)),
            pl.BlockSpec((1, 1, Cout), lambda n: (n, 0, 0)),
        ),
        scratch_shapes=[pltpu.VMEM((H + 2, Wp, C), compute_dtype)],
        compiler_params=pltpu.CompilerParams(dimension_semantics=("parallel",)),
    )(y1, s1, q1, g1, b1, w)
    return y, jnp.sum(s, axis=0), jnp.sum(q, axis=0)


def _bn_relu(y, s, q, g, b, count):
    N, H, W, C = y.shape
    kernel = functools.partial(_bn_relu_kernel, count=count)
    return pl.pallas_call(
        kernel,
        out_shape=jax.ShapeDtypeStruct((N, H, W, C), jnp.float32),
        grid=(N,),
        in_specs=[
            pl.BlockSpec((1, H, W, C), lambda n: (n, 0, 0, 0)),
            pl.BlockSpec((1, C), lambda n: (0, 0)),
            pl.BlockSpec((1, C), lambda n: (0, 0)),
            pl.BlockSpec((1, C), lambda n: (0, 0)),
            pl.BlockSpec((1, C), lambda n: (0, 0)),
        ],
        out_specs=pl.BlockSpec((1, H, W, C), lambda n: (n, 0, 0, 0)),
        compiler_params=pltpu.CompilerParams(dimension_semantics=("parallel",)),
    )(y, s, q, g, b)


# ----------------------------------------------------------------------------
# Parameter packing (once, outside the hot kernels).
# ----------------------------------------------------------------------------
def _pack_weight(w_oihw, compute_dtype):
    """OIHW conv weight -> (9, Cin, Cout), true channel counts (no padding)."""
    w = jnp.transpose(w_oihw, (2, 3, 1, 0))                 # (3, 3, Cin, Cout)
    return w.reshape(9, w.shape[2], w.shape[3]).astype(compute_dtype)


# ----------------------------------------------------------------------------
# DoubleConv forward: conv -> BN(batch stats) -> ReLU -> conv -> BN -> ReLU
# ----------------------------------------------------------------------------
def double_conv(x_nchw, w1_oihw, gamma1, beta1, w2_oihw, gamma2, beta2,
                compute_dtype=jnp.bfloat16):
    N, Cin, H, W = x_nchw.shape
    x = jnp.transpose(x_nchw, (0, 2, 3, 1)).astype(compute_dtype)   # NHWC
    w1 = _pack_weight(w1_oihw, compute_dtype)
    w2 = _pack_weight(w2_oihw, compute_dtype)
    g1 = gamma1.astype(jnp.float32).reshape(1, -1)
    b1 = beta1.astype(jnp.float32).reshape(1, -1)
    g2 = gamma2.astype(jnp.float32).reshape(1, -1)
    b2 = beta2.astype(jnp.float32).reshape(1, -1)
    count = float(N * H * W)

    # block 1: conv1 + fused per-image batch stats
    y1, s1, q1 = _conv_stats(x, w1, compute_dtype)
    # block 2: BN1 + ReLU (affine from summed stats, in-kernel) -> conv2 + stats
    y2, s2, q2 = _bn_relu_conv_stats(y1, s1, q1, g1, b1, w2, count, compute_dtype)
    # final BN2 + ReLU, real channels only; one XLA transpose back to NCHW.
    # (A real UNet would stay NHWC end-to-end and skip this transpose.)
    out = _bn_relu(y2, s2, q2, g2, b2, count)                # (N, H, W, Cout) f32
    return jnp.transpose(out, (0, 3, 1, 2))


# ----------------------------------------------------------------------------
# Pure-JAX reference (PyTorch training-mode semantics) for the sanity check.
# ----------------------------------------------------------------------------
def double_conv_ref(x_nchw, w1, gamma1, beta1, w2, gamma2, beta2):
    def block(x, w, g, b):
        y = lax.conv_general_dilated(
            x, w, window_strides=(1, 1), padding=((1, 1), (1, 1)),
            dimension_numbers=("NCHW", "OIHW", "NCHW"))
        m = jnp.mean(y, axis=(0, 2, 3), keepdims=True)
        v = jnp.mean((y - m) ** 2, axis=(0, 2, 3), keepdims=True)   # biased var
        yn = (y - m) / jnp.sqrt(v + EPS)
        return jnp.maximum(yn * g.reshape(1, -1, 1, 1) + b.reshape(1, -1, 1, 1), 0.0)

    x = block(x_nchw, w1, gamma1, beta1)
    return block(x, w2, gamma2, beta2)


if __name__ == "__main__":
    # Module config: DoubleConv(in_channels=4, out_channels=8) -> mid_channels=8
    N, Cin, H, W = 2, 4, 16, 16
    Cmid, Cout = 8, 8

    key = jax.random.PRNGKey(0)
    k1, k2, kx = jax.random.split(key, 3)

    w1 = jax.random.normal(k1, (Cmid, Cin, 3, 3), jnp.float32) * (1.0 / np.sqrt(Cin * 9))
    w2 = jax.random.normal(k2, (Cout, Cmid, 3, 3), jnp.float32) * (1.0 / np.sqrt(Cmid * 9))
    gamma1 = jnp.ones((Cmid,), jnp.float32)
    beta1 = jnp.zeros((Cmid,), jnp.float32)
    gamma2 = jnp.ones((Cout,), jnp.float32)
    beta2 = jnp.zeros((Cout,), jnp.float32)
    x = jax.random.normal(kx, (N, Cin, H, W), jnp.float32)

    ref = jax.block_until_ready(
        double_conv_ref(x, w1, gamma1, beta1, w2, gamma2, beta2))

    # 1) strict structural/numerical check with an f32 compute path
    fwd_f32 = jax.jit(functools.partial(double_conv, compute_dtype=jnp.float32))
    out_f32 = jax.block_until_ready(fwd_f32(x, w1, gamma1, beta1, w2, gamma2, beta2))
    assert out_f32.shape == (N, Cout, H, W)
    np.testing.assert_allclose(np.asarray(out_f32), np.asarray(ref),
                               rtol=1e-4, atol=2e-4)

    # 2) bf16 MXU fast path (f32 accumulation / stats / BN); looser tolerance is
    #    purely bf16 operand rounding, not a structural difference.
    fwd_bf16 = jax.jit(functools.partial(double_conv, compute_dtype=jnp.bfloat16))
    out_bf16 = jax.block_until_ready(fwd_bf16(x, w1, gamma1, beta1, w2, gamma2, beta2))
    assert out_bf16.shape == (N, Cout, H, W)
    np.testing.assert_allclose(np.asarray(out_bf16), np.asarray(ref),
                               rtol=1e-1, atol=1.5e-1)

    print("KERNEL_OK")
</pallas_src>

<mosaic_0001>
module attributes {stable_mosaic.version = 11 : i64} {
  func.func @_conv_stats_kernel(%arg0: i32, %arg1: memref<1x16x16x4xf32, #tpu.memory_space<vmem>>, %arg2: memref<9x4x8xf32, #tpu.memory_space<vmem>>, %arg3: memref<1x16x16x8xf32, #tpu.memory_space<vmem>>, %arg4: memref<1x1x8xf32, #tpu.memory_space<vmem>>, %arg5: memref<1x1x8xf32, #tpu.memory_space<vmem>>, %arg6: memref<18x24x4xf32, #tpu.memory_space<vmem>>) attributes {dimension_semantics = [#tpu.dimension_semantics<parallel>], iteration_bounds = array<i64: 2>, scalar_prefetch = 0 : i64, scratch_operands = 1 : i64, tpu.core_type = #tpu.core_type<tc>, window_params = [{transform_indices = @transform_0, window_bounds = array<i64: 1, 16, 16, 4>}, {pipeline_mode = #tpu.pipeline_mode<synchronous>, transform_indices = @transform_1, window_bounds = array<i64: 9, 4, 8>}, {transform_indices = @transform_2, window_bounds = array<i64: 1, 16, 16, 8>}, {transform_indices = @transform_3, window_bounds = array<i64: 1, 1, 8>}, {transform_indices = @transform_4, window_bounds = array<i64: 1, 1, 8>}]} {
    %c0 = arith.constant 0 : index
    %c0_0 = arith.constant 0 : index
    %c0_1 = arith.constant 0 : index
    %c0_2 = arith.constant 0 : index
    %0 = vector.load %arg1[%c0, %c0_0, %c0_1, %c0_2] : memref<1x16x16x4xf32, #tpu.memory_space<vmem>>, vector<1x16x16x4xf32>
    %1 = vector.shape_cast %0 : vector<1x16x16x4xf32> to vector<16x16x4xf32>
    %cst = arith.constant 0.000000e+00 : f32
    %2 = vector.broadcast %cst : f32 to vector<1x24x4xf32>
    %c0_3 = arith.constant 0 : index
    %c0_4 = arith.constant 0 : index
    %c0_5 = arith.constant 0 : index
    %3 = vector.load %arg6[%c0_3, %c0_4, %c0_5] : memref<18x24x4xf32, #tpu.memory_space<vmem>>, vector<1x24x4xf32>
    tpu.vector_store %arg6[%c0_3, %c0_4, %c0_5], %2 {strides = array<i32>} : memref<18x24x4xf32, #tpu.memory_space<vmem>>, vector<1x24x4xf32>,
    %c17 = arith.constant 17 : index
    %c0_6 = arith.constant 0 : index
    %c0_7 = arith.constant 0 : index
    %4 = vector.load %arg6[%c17, %c0_6, %c0_7] : memref<18x24x4xf32, #tpu.memory_space<vmem>>, vector<1x24x4xf32>
    tpu.vector_store %arg6[%c17, %c0_6, %c0_7], %2 {strides = array<i32>} : memref<18x24x4xf32, #tpu.memory_space<vmem>>, vector<1x24x4xf32>,
    %cst_8 = arith.constant 0.000000e+00 : f32
    %5 = vector.broadcast %cst_8 : f32 to vector<16x1x4xf32>
    %c1 = arith.constant 1 : index
    %c0_9 = arith.constant 0 : index
    %c0_10 = arith.constant 0 : index
    %6 = vector.load %arg6[%c1, %c0_9, %c0_10] : memref<18x24x4xf32, #tpu.memory_space<vmem>>, vector<16x1x4xf32>
    tpu.vector_store %arg6[%c1, %c0_9, %c0_10], %5 {strides = array<i32>} : memref<18x24x4xf32, #tpu.memory_space<vmem>>, vector<16x1x4xf32>,
    %c1_11 = arith.constant 1 : index
    %c17_12 = arith.constant 17 : index
    %c0_13 = arith.constant 0 : index
    %7 = vector.load %arg6[%c1_11, %c17_12, %c0_13] : memref<18x24x4xf32, #tpu.memory_space<vmem>>, vector<16x1x4xf32>
    tpu.vector_store %arg6[%c1_11, %c17_12, %c0_13], %5 {strides = array<i32>} : memref<18x24x4xf32, #tpu.memory_space<vmem>>, vector<16x1x4xf32>,
    %c1_14 = arith.constant 1 : index
    %c1_15 = arith.constant 1 : index
    %c0_16 = arith.constant 0 : index
    %8 = vector.load %arg6[%c1_14, %c1_15, %c0_16] : memref<18x24x4xf32, #tpu.memory_space<vmem>>, vector<16x16x4xf32>
    tpu.vector_store %arg6[%c1_14, %c1_15, %c0_16], %1 {strides = array<i32>} : memref<18x24x4xf32, #tpu.memory_space<vmem>>, vector<16x16x4xf32>,
    %c0_17 = arith.constant 0 : index
    %c0_18 = arith.constant 0 : index
    %c0_19 = arith.constant 0 : index
    %9 = vector.load %arg6[%c0_17, %c0_18, %c0_19] : memref<18x24x4xf32, #tpu.memory_space<vmem>>, vector<16x16x4xf32>
    %10 = vector.shape_cast %9 : vector<16x16x4xf32> to vector<256x4xf32>
    %c0_20 = arith.constant 0 : index
    %c0_21 = arith.constant 0 : index
    %c0_22 = arith.constant 0 : index
    %11 = vector.load %arg2[%c0_20, %c0_21, %c0_22] : memref<9x4x8xf32, #tpu.memory_space<vmem>>, vector<1x4x8xf32>
    %12 = vector.shape_cast %11 : vector<1x4x8xf32> to vector<4x8xf32>
    %cst_23 = arith.constant dense<0.000000e+00> : vector<256x8xf32>
    %13 = tpu.matmul %10, %12, %cst_23 {dimension_numbers = #tpu.dot_dimension_numbers<[1], [0], [0], [1], [0, 0, 1, 1], [], []>} : vector<256x4xf32>, vector<4x8xf32>, vector<256x8xf32> -> vector<256x8xf32>
    %c0_24 = arith.constant 0 : index
    %c1_25 = arith.constant 1 : index
    %c0_26 = arith.constant 0 : index
    %14 = vector.load %arg6[%c0_24, %c1_25, %c0_26] : memref<18x24x4xf32, #tpu.memory_space<vmem>>, vector<16x16x4xf32>
    %15 = vector.shape_cast %14 : vector<16x16x4xf32> to vector<256x4xf32>
    %c1_27 = arith.constant 1 : index
    %c0_28 = arith.constant 0 : index
    %c0_29 = arith.constant 0 : index
    %16 = vector.load %arg2[%c1_27, %c0_28, %c0_29] : memref<9x4x8xf32, #tpu.memory_space<vmem>>, vector<1x4x8xf32>
    %17 = vector.shape_cast %16 : vector<1x4x8xf32> to vector<4x8xf32>
    %cst_30 = arith.constant dense<0.000000e+00> : vector<256x8xf32>
    %18 = tpu.matmul %15, %17, %cst_30 {dimension_numbers = #tpu.dot_dimension_numbers<[1], [0], [0], [1], [0, 0, 1, 1], [], []>} : vector<256x4xf32>, vector<4x8xf32>, vector<256x8xf32> -> vector<256x8xf32>
    %19 = arith.addf %13, %18 : vector<256x8xf32>
    %c0_31 = arith.constant 0 : index
    %c2 = arith.constant 2 : index
    %c0_32 = arith.constant 0 : index
    %20 = vector.load %arg6[%c0_31, %c2, %c0_32] : memref<18x24x4xf32, #tpu.memory_space<vmem>>, vector<16x16x4xf32>
    %21 = vector.shape_cast %20 : vector<16x16x4xf32> to vector<256x4xf32>
    %c2_33 = arith.constant 2 : index
    %c0_34 = arith.constant 0 : index
    %c0_35 = arith.constant 0 : index
    %22 = vector.load %arg2[%c2_33, %c0_34, %c0_35] : memref<9x4x8xf32, #tpu.memory_space<vmem>>, vector<1x4x8xf32>
    %23 = vector.shape_cast %22 : vector<1x4x8xf32> to vector<4x8xf32>
    %cst_36 = arith.constant dense<0.000000e+00> : vector<256x8xf32>
    %24 = tpu.matmul %21, %23, %cst_36 {dimension_numbers = #tpu.dot_dimension_numbers<[1], [0], [0], [1], [0, 0, 1, 1], [], []>} : vector<256x4xf32>, vector<4x8xf32>, vector<256x8xf32> -> vector<256x8xf32>
    %25 = arith.addf %19, %24 : vector<256x8xf32>
    %c1_37 = arith.constant 1 : index
    %c0_38 = arith.constant 0 : index
    %c0_39 = arith.constant 0 : index
    %26 = vector.load %arg6[%c1_37, %c0_38, %c0_39] : memref<18x24x4xf32, #tpu.memory_space<vmem>>, vector<16x16x4xf32>
    %27 = vector.shape_cast %26 : vector<16x16x4xf32> to vector<256x4xf32>
    %c3 = arith.constant 3 : index
    %c0_40 = arith.constant 0 : index
    %c0_41 = arith.constant 0 : index
    %28 = vector.load %arg2[%c3, %c0_40, %c0_41] : memref<9x4x8xf32, #tpu.memory_space<vmem>>, vector<1x4x8xf32>
    %29 = vector.shape_cast %28 : vector<1x4x8xf32> to vector<4x8xf32>
    %cst_42 = arith.constant dense<0.000000e+00> : vector<256x8xf32>
    %30 = tpu.matmul %27, %29, %cst_42 {dimension_numbers = #tpu.dot_dimension_numbers<[1], [0], [0], [1], [0, 0, 1, 1], [], []>} : vector<256x4xf32>, vector<4x8xf32>, vector<256x8xf32> -> vector<256x8xf32>
    %31 = arith.addf %25, %30 : vector<256x8xf32>
    %c1_43 = arith.constant 1 : index
    %c1_44 = arith.constant 1 : index
    %c0_45 = arith.constant 0 : index
    %32 = vector.load %arg6[%c1_43, %c1_44, %c0_45] : memref<18x24x4xf32, #tpu.memory_space<vmem>>, vector<16x16x4xf32>
    %33 = vector.shape_cast %32 : vector<16x16x4xf32> to vector<256x4xf32>
    %c4 = arith.constant 4 : index
    %c0_46 = arith.constant 0 : index
    %c0_47 = arith.constant 0 : index
    %34 = vector.load %arg2[%c4, %c0_46, %c0_47] : memref<9x4x8xf32, #tpu.memory_space<vmem>>, vector<1x4x8xf32>
    %35 = vector.shape_cast %34 : vector<1x4x8xf32> to vector<4x8xf32>
    %cst_48 = arith.constant dense<0.000000e+00> : vector<256x8xf32>
    %36 = tpu.matmul %33, %35, %cst_48 {dimension_numbers = #tpu.dot_dimension_numbers<[1], [0], [0], [1], [0, 0, 1, 1], [], []>} : vector<256x4xf32>, vector<4x8xf32>, vector<256x8xf32> -> vector<256x8xf32>
    %37 = arith.addf %31, %36 : vector<256x8xf32>
    %c1_49 = arith.constant 1 : index
    %c2_50 = arith.constant 2 : index
    %c0_51 = arith.constant 0 : index
    %38 = vector.load %arg6[%c1_49, %c2_50, %c0_51] : memref<18x24x4xf32, #tpu.memory_space<vmem>>, vector<16x16x4xf32>
    %39 = vector.shape_cast %38 : vector<16x16x4xf32> to vector<256x4xf32>
    %c5 = arith.constant 5 : index
    %c0_52 = arith.constant 0 : index
    %c0_53 = arith.constant 0 : index
    %40 = vector.load %arg2[%c5, %c0_52, %c0_53] : memref<9x4x8xf32, #tpu.memory_space<vmem>>, vector<1x4x8xf32>
    %41 = vector.shape_cast %40 : vector<1x4x8xf32> to vector<4x8xf32>
    %cst_54 = arith.constant dense<0.000000e+00> : vector<256x8xf32>
    %42 = tpu.matmul %39, %41, %cst_54 {dimension_numbers = #tpu.dot_dimension_numbers<[1], [0], [0], [1], [0, 0, 1, 1], [], []>} : vector<256x4xf32>, vector<4x8xf32>, vector<256x8xf32> -> vector<256x8xf32>
    %43 = arith.addf %37, %42 : vector<256x8xf32>
    %c2_55 = arith.constant 2 : index
    %c0_56 = arith.constant 0 : index
    %c0_57 = arith.constant 0 : index
    %44 = vector.load %arg6[%c2_55, %c0_56, %c0_57] : memref<18x24x4xf32, #tpu.memory_space<vmem>>, vector<16x16x4xf32>
    %45 = vector.shape_cast %44 : vector<16x16x4xf32> to vector<256x4xf32>
    %c6 = arith.constant 6 : index
    %c0_58 = arith.constant 0 : index
    %c0_59 = arith.constant 0 : index
    %46 = vector.load %arg2[%c6, %c0_58, %c0_59] : memref<9x4x8xf32, #tpu.memory_space<vmem>>, vector<1x4x8xf32>
    %47 = vector.shape_cast %46 : vector<1x4x8xf32> to vector<4x8xf32>
    %cst_60 = arith.constant dense<0.000000e+00> : vector<256x8xf32>
    %48 = tpu.matmul %45, %47, %cst_60 {dimension_numbers = #tpu.dot_dimension_numbers<[1], [0], [0], [1], [0, 0, 1, 1], [], []>} : vector<256x4xf32>, vector<4x8xf32>, vector<256x8xf32> -> vector<256x8xf32>
    %49 = arith.addf %43, %48 : vector<256x8xf32>
    %c2_61 = arith.constant 2 : index
    %c1_62 = arith.constant 1 : index
    %c0_63 = arith.constant 0 : index
    %50 = vector.load %arg6[%c2_61, %c1_62, %c0_63] : memref<18x24x4xf32, #tpu.memory_space<vmem>>, vector<16x16x4xf32>
    %51 = vector.shape_cast %50 : vector<16x16x4xf32> to vector<256x4xf32>
    %c7 = arith.constant 7 : index
    %c0_64 = arith.constant 0 : index
    %c0_65 = arith.constant 0 : index
    %52 = vector.load %arg2[%c7, %c0_64, %c0_65] : memref<9x4x8xf32, #tpu.memory_space<vmem>>, vector<1x4x8xf32>
    %53 = vector.shape_cast %52 : vector<1x4x8xf32> to vector<4x8xf32>
    %cst_66 = arith.constant dense<0.000000e+00> : vector<256x8xf32>
    %54 = tpu.matmul %51, %53, %cst_66 {dimension_numbers = #tpu.dot_dimension_numbers<[1], [0], [0], [1], [0, 0, 1, 1], [], []>} : vector<256x4xf32>, vector<4x8xf32>, vector<256x8xf32> -> vector<256x8xf32>
    %55 = arith.addf %49, %54 : vector<256x8xf32>
    %c2_67 = arith.constant 2 : index
    %c2_68 = arith.constant 2 : index
    %c0_69 = arith.constant 0 : index
    %56 = vector.load %arg6[%c2_67, %c2_68, %c0_69] : memref<18x24x4xf32, #tpu.memory_space<vmem>>, vector<16x16x4xf32>
    %57 = vector.shape_cast %56 : vector<16x16x4xf32> to vector<256x4xf32>
    %c8 = arith.constant 8 : index
    %c0_70 = arith.constant 0 : index
    %c0_71 = arith.constant 0 : index
    %58 = vector.load %arg2[%c8, %c0_70, %c0_71] : memref<9x4x8xf32, #tpu.memory_space<vmem>>, vector<1x4x8xf32>
    %59 = vector.shape_cast %58 : vector<1x4x8xf32> to vector<4x8xf32>
    %cst_72 = arith.constant dense<0.000000e+00> : vector<256x8xf32>
    %60 = tpu.matmul %57, %59, %cst_72 {dimension_numbers = #tpu.dot_dimension_numbers<[1], [0], [0], [1], [0, 0, 1, 1], [], []>} : vector<256x4xf32>, vector<4x8xf32>, vector<256x8xf32> -> vector<256x8xf32>
    %61 = arith.addf %55, %60 : vector<256x8xf32>
    %cst_73 = arith.constant dense<0.000000e+00> : vector<8xf32>
    %62 = vector.multi_reduction <add>, %61, %cst_73 [0] : vector<256x8xf32> to vector<8xf32>
    %63 = vector.shape_cast %62 : vector<8xf32> to vector<1x8xf32>
    %c0_74 = arith.constant 0 : index
    %c0_75 = arith.constant 0 : index
    %c0_76 = arith.constant 0 : index
    %64 = vector.load %arg4[%c0_74, %c0_75, %c0_76] : memref<1x1x8xf32, #tpu.memory_space<vmem>>, vector<1x1x8xf32>
    %65 = vector.shape_cast %64 : vector<1x1x8xf32> to vector<1x8xf32>
    %66 = vector.shape_cast %63 : vector<1x8xf32> to vector<1x1x8xf32>
    tpu.vector_store %arg4[%c0_74, %c0_75, %c0_76], %66 {strides = array<i32>} : memref<1x1x8xf32, #tpu.memory_space<vmem>>, vector<1x1x8xf32>,
    %67 = arith.mulf %61, %61 : vector<256x8xf32>
    %cst_77 = arith.constant dense<0.000000e+00> : vector<8xf32>
    %68 = vector.multi_reduction <add>, %67, %cst_77 [0] : vector<256x8xf32> to vector<8xf32>
    %69 = vector.shape_cast %68 : vector<8xf32> to vector<1x8xf32>
    %c0_78 = arith.constant 0 : index
    %c0_79 = arith.constant 0 : index
    %c0_80 = arith.constant 0 : index
    %70 = vector.load %arg5[%c0_78, %c0_79, %c0_80] : memref<1x1x8xf32, #tpu.memory_space<vmem>>, vector<1x1x8xf32>
    %71 = vector.shape_cast %70 : vector<1x1x8xf32> to vector<1x8xf32>
    %72 = vector.shape_cast %69 : vector<1x8xf32> to vector<1x1x8xf32>
    tpu.vector_store %arg5[%c0_78, %c0_79, %c0_80], %72 {strides = array<i32>} : memref<1x1x8xf32, #tpu.memory_space<vmem>>, vector<1x1x8xf32>,
    %73 = vector.shape_cast %61 : vector<256x8xf32> to vector<16x16x8xf32>
    %c0_81 = arith.constant 0 : index
    %c0_82 = arith.constant 0 : index
    %c0_83 = arith.constant 0 : index
    %c0_84 = arith.constant 0 : index
    %74 = vector.load %arg3[%c0_81, %c0_82, %c0_83, %c0_84] : memref<1x16x16x8xf32, #tpu.memory_space<vmem>>, vector<1x16x16x8xf32>
    %75 = vector.shape_cast %74 : vector<1x16x16x8xf32> to vector<16x16x8xf32>
    %76 = vector.shape_cast %73 : vector<16x16x8xf32> to vector<1x16x16x8xf32>
    tpu.vector_store %arg3[%c0_81, %c0_82, %c0_83, %c0_84], %76 {strides = array<i32>} : memref<1x16x16x8xf32, #tpu.memory_space<vmem>>, vector<1x16x16x8xf32>,
    return
  }
  func.func @transform_0(%arg0: i32) -> (i32, i32, i32, i32) {
    %c0_i32 = arith.constant 0 : i32
    %c0_i32_0 = arith.constant 0 : i32
    %c0_i32_1 = arith.constant 0 : i32
    %c0_i32_2 = arith.constant 0 : i32
    return %arg0, %c0_i32, %c0_i32_0, %c0_i32_1 : i32, i32, i32, i32
  }
  func.func @transform_1(%arg0: i32) -> (i32, i32, i32) {
    %c0_i32 = arith.constant 0 : i32
    %c0_i32_0 = arith.constant 0 : i32
    %c0_i32_1 = arith.constant 0 : i32
    %c0_i32_2 = arith.constant 0 : i32
    return %c0_i32, %c0_i32_0, %c0_i32_1 : i32, i32, i32
  }
  func.func @transform_2(%arg0: i32) -> (i32, i32, i32, i32) {
    %c0_i32 = arith.constant 0 : i32
    %c0_i32_0 = arith.constant 0 : i32
    %c0_i32_1 = arith.constant 0 : i32
    %c0_i32_2 = arith.constant 0 : i32
    return %arg0, %c0_i32, %c0_i32_0, %c0_i32_1 : i32, i32, i32, i32
  }
  func.func @transform_3(%arg0: i32) -> (i32, i32, i32) {
    %c0_i32 = arith.constant 0 : i32
    %c0_i32_0 = arith.constant 0 : i32
    %c0_i32_1 = arith.constant 0 : i32
    return %arg0, %c0_i32, %c0_i32_0 : i32, i32, i32
  }
  func.func @transform_4(%arg0: i32) -> (i32, i32, i32) {
    %c0_i32 = arith.constant 0 : i32
    %c0_i32_0 = arith.constant 0 : i32
    %c0_i32_1 = arith.constant 0 : i32
    return %arg0, %c0_i32, %c0_i32_0 : i32, i32, i32
  }
}

module attributes {stable_mosaic.version = 11 : i64} {
  func.func @_bn_relu_kernel(%arg0: i32, %arg1: memref<1x16x16x8xf32, #tpu.memory_space<vmem>>, %arg2: memref<1x8xf32, #tpu.memory_space<vmem>>, %arg3: memref<1x8xf32, #tpu.memory_space<vmem>>, %arg4: memref<1x8xf32, #tpu.memory_space<vmem>>, %arg5: memref<1x8xf32, #tpu.memory_space<vmem>>, %arg6: memref<1x16x16x8xf32, #tpu.memory_space<vmem>>) attributes {dimension_semantics = [#tpu.dimension_semantics<parallel>], iteration_bounds = array<i64: 2>, scalar_prefetch = 0 : i64, scratch_operands = 0 : i64, tpu.core_type = #tpu.core_type<tc>, window_params = [{transform_indices = @transform_0, window_bounds = array<i64: 1, 16, 16, 8>}, {pipeline_mode = #tpu.pipeline_mode<synchronous>, transform_indices = @transform_1, window_bounds = array<i64: 1, 8>}, {pipeline_mode = #tpu.pipeline_mode<synchronous>, transform_indices = @transform_2, window_bounds = array<i64: 1, 8>}, {pipeline_mode = #tpu.pipeline_mode<synchronous>, transform_indices = @transform_3, window_bounds = array<i64: 1, 8>}, {pipeline_mode = #tpu.pipeline_mode<synchronous>, transform_indices = @transform_4, window_bounds = array<i64: 1, 8>}, {transform_indices = @transform_5, window_bounds = array<i64: 1, 16, 16, 8>}]} {
    %c0 = arith.constant 0 : index
    %c0_0 = arith.constant 0 : index
    %0 = vector.load %arg2[%c0, %c0_0] : memref<1x8xf32, #tpu.memory_space<vmem>>, vector<1x8xf32>
    %c0_1 = arith.constant 0 : index
    %c0_2 = arith.constant 0 : index
    %1 = vector.load %arg3[%c0_1, %c0_2] : memref<1x8xf32, #tpu.memory_space<vmem>>, vector<1x8xf32>
    %c0_3 = arith.constant 0 : index
    %c0_4 = arith.constant 0 : index
    %2 = vector.load %arg4[%c0_3, %c0_4] : memref<1x8xf32, #tpu.memory_space<vmem>>, vector<1x8xf32>
    %c0_5 = arith.constant 0 : index
    %c0_6 = arith.constant 0 : index
    %3 = vector.load %arg5[%c0_5, %c0_6] : memref<1x8xf32, #tpu.memory_space<vmem>>, vector<1x8xf32>
    %cst = arith.constant 5.120000e+02 : f32
    %4 = vector.broadcast %cst : f32 to vector<1x8xf32>
    %5 = arith.divf %0, %4 : vector<1x8xf32>
    %cst_7 = arith.constant 5.120000e+02 : f32
    %6 = vector.broadcast %cst_7 : f32 to vector<1x8xf32>
    %7 = arith.divf %1, %6 : vector<1x8xf32>
    %8 = arith.mulf %5, %5 : vector<1x8xf32>
    %9 = arith.subf %7, %8 : vector<1x8xf32>
    %cst_8 = arith.constant 0.000000e+00 : f32
    %10 = vector.broadcast %cst_8 : f32 to vector<1x8xf32>
    %11 = arith.maximumf %9, %10 : vector<1x8xf32>
    %cst_9 = arith.constant 9.99999974E-6 : f32
    %12 = vector.broadcast %cst_9 : f32 to vector<1x8xf32>
    %13 = arith.addf %11, %12 : vector<1x8xf32>
    %14 = math.rsqrt %13 : vector<1x8xf32>
    %15 = arith.mulf %2, %14 : vector<1x8xf32>
    %16 = arith.mulf %5, %15 : vector<1x8xf32>
    %17 = arith.subf %3, %16 : vector<1x8xf32>
    %c0_10 = arith.constant 0 : index
    %c0_11 = arith.constant 0 : index
    %c0_12 = arith.constant 0 : index
    %c0_13 = arith.constant 0 : index
    %18 = vector.load %arg1[%c0_10, %c0_11, %c0_12, %c0_13] : memref<1x16x16x8xf32, #tpu.memory_space<vmem>>, vector<1x16x16x8xf32>
    %19 = vector.shape_cast %18 : vector<1x16x16x8xf32> to vector<16x16x8xf32>
    %20 = vector.shape_cast %15 : vector<1x8xf32> to vector<1x1x8xf32>
    %21 = vector.broadcast %20 : vector<1x1x8xf32> to vector<16x16x8xf32>
    %22 = arith.mulf %19, %21 : vector<16x16x8xf32>
    %23 = vector.shape_cast %17 : vector<1x8xf32> to vector<1x1x8xf32>
    %24 = vector.broadcast %23 : vector<1x1x8xf32> to vector<16x16x8xf32>
    %25 = arith.addf %22, %24 : vector<16x16x8xf32>
    %cst_14 = arith.constant 0.000000e+00 : f32
    %26 = vector.broadcast %cst_14 : f32 to vector<16x16x8xf32>
    %27 = arith.maximumf %25, %26 : vector<16x16x8xf32>
    %c0_15 = arith.constant 0 : index
    %c0_16 = arith.constant 0 : index
    %c0_17 = arith.constant 0 : index
    %c0_18 = arith.constant 0 : index
    %28 = vector.load %arg6[%c0_15, %c0_16, %c0_17, %c0_18] : memref<1x16x16x8xf32, #tpu.memory_space<vmem>>, vector<1x16x16x8xf32>
    %29 = vector.shape_cast %28 : vector<1x16x16x8xf32> to vector<16x16x8xf32>
    %30 = vector.shape_cast %27 : vector<16x16x8xf32> to vector<1x16x16x8xf32>
    tpu.vector_store %arg6[%c0_15, %c0_16, %c0_17, %c0_18], %30 {strides = array<i32>} : memref<1x16x16x8xf32, #tpu.memory_space<vmem>>, vector<1x16x16x8xf32>,
    return
  }
  func.func @transform_0(%arg0: i32) -> (i32, i32, i32, i32) {
    %c0_i32 = arith.constant 0 : i32
    %c0_i32_0 = arith.constant 0 : i32
    %c0_i32_1 = arith.constant 0 : i32
    %c0_i32_2 = arith.constant 0 : i32
    return %arg0, %c0_i32, %c0_i32_0, %c0_i32_1 : i32, i32, i32, i32
  }
  func.func @transform_1(%arg0: i32) -> (i32, i32) {
    %c0_i32 = arith.constant 0 : i32
    %c0_i32_0 = arith.constant 0 : i32
    %c0_i32_1 = arith.constant 0 : i32
    return %c0_i32, %c0_i32_0 : i32, i32
  }
  func.func @transform_2(%arg0: i32) -> (i32, i32) {
    %c0_i32 = arith.constant 0 : i32
    %c0_i32_0 = arith.constant 0 : i32
    %c0_i32_1 = arith.constant 0 : i32
    return %c0_i32, %c0_i32_0 : i32, i32
  }
  func.func @transform_3(%arg0: i32) -> (i32, i32) {
    %c0_i32 = arith.constant 0 : i32
    %c0_i32_0 = arith.constant 0 : i32
    %c0_i32_1 = arith.constant 0 : i32
    return %c0_i32, %c0_i32_0 : i32, i32
  }
  func.func @transform_4(%arg0: i32) -> (i32, i32) {
    %c0_i32 = arith.constant 0 : i32
    %c0_i32_0 = arith.constant 0 : i32
    %c0_i32_1 = arith.constant 0 : i32
    return %c0_i32, %c0_i32_0 : i32, i32
  }
  func.func @transform_5(%arg0: i32) -> (i32, i32, i32, i32) {
    %c0_i32 = arith.constant 0 : i32
    %c0_i32_0 = arith.constant 0 : i32
    %c0_i32_1 = arith.constant 0 : i32
    %c0_i32_2 = arith.constant 0 : i32
    return %arg0, %c0_i32, %c0_i32_0, %c0_i32_1 : i32, i32, i32, i32
  }
}

module attributes {stable_mosaic.version = 11 : i64} {
  func.func @_bn_relu_conv_stats_kernel(%arg0: i32, %arg1: memref<1x16x16x8xf32, #tpu.memory_space<vmem>>, %arg2: memref<1x8xf32, #tpu.memory_space<vmem>>, %arg3: memref<1x8xf32, #tpu.memory_space<vmem>>, %arg4: memref<1x8xf32, #tpu.memory_space<vmem>>, %arg5: memref<1x8xf32, #tpu.memory_space<vmem>>, %arg6: memref<9x8x8xf32, #tpu.memory_space<vmem>>, %arg7: memref<1x16x16x8xf32, #tpu.memory_space<vmem>>, %arg8: memref<1x1x8xf32, #tpu.memory_space<vmem>>, %arg9: memref<1x1x8xf32, #tpu.memory_space<vmem>>, %arg10: memref<18x24x8xf32, #tpu.memory_space<vmem>>) attributes {dimension_semantics = [#tpu.dimension_semantics<parallel>], iteration_bounds = array<i64: 2>, scalar_prefetch = 0 : i64, scratch_operands = 1 : i64, tpu.core_type = #tpu.core_type<tc>, window_params = [{transform_indices = @transform_0, window_bounds = array<i64: 1, 16, 16, 8>}, {pipeline_mode = #tpu.pipeline_mode<synchronous>, transform_indices = @transform_1, window_bounds = array<i64: 1, 8>}, {pipeline_mode = #tpu.pipeline_mode<synchronous>, transform_indices = @transform_2, window_bounds = array<i64: 1, 8>}, {pipeline_mode = #tpu.pipeline_mode<synchronous>, transform_indices = @transform_3, window_bounds = array<i64: 1, 8>}, {pipeline_mode = #tpu.pipeline_mode<synchronous>, transform_indices = @transform_4, window_bounds = array<i64: 1, 8>}, {pipeline_mode = #tpu.pipeline_mode<synchronous>, transform_indices = @transform_5, window_bounds = array<i64: 9, 8, 8>}, {transform_indices = @transform_6, window_bounds = array<i64: 1, 16, 16, 8>}, {transform_indices = @transform_7, window_bounds = array<i64: 1, 1, 8>}, {transform_indices = @transform_8, window_bounds = array<i64: 1, 1, 8>}]} {
    %c0 = arith.constant 0 : index
    %c0_0 = arith.constant 0 : index
    %0 = vector.load %arg2[%c0, %c0_0] : memref<1x8xf32, #tpu.memory_space<vmem>>, vector<1x8xf32>
    %c0_1 = arith.constant 0 : index
    %c0_2 = arith.constant 0 : index
    %1 = vector.load %arg3[%c0_1, %c0_2] : memref<1x8xf32, #tpu.memory_space<vmem>>, vector<1x8xf32>
    %c0_3 = arith.constant 0 : index
    %c0_4 = arith.constant 0 : index
    %2 = vector.load %arg4[%c0_3, %c0_4] : memref<1x8xf32, #tpu.memory_space<vmem>>, vector<1x8xf32>
    %c0_5 = arith.constant 0 : index
    %c0_6 = arith.constant 0 : index
    %3 = vector.load %arg5[%c0_5, %c0_6] : memref<1x8xf32, #tpu.memory_space<vmem>>, vector<1x8xf32>
    %cst = arith.constant 5.120000e+02 : f32
    %4 = vector.broadcast %cst : f32 to vector<1x8xf32>
    %5 = arith.divf %0, %4 : vector<1x8xf32>
    %cst_7 = arith.constant 5.120000e+02 : f32
    %6 = vector.broadcast %cst_7 : f32 to vector<1x8xf32>
    %7 = arith.divf %1, %6 : vector<1x8xf32>
    %8 = arith.mulf %5, %5 : vector<1x8xf32>
    %9 = arith.subf %7, %8 : vector<1x8xf32>
    %cst_8 = arith.constant 0.000000e+00 : f32
    %10 = vector.broadcast %cst_8 : f32 to vector<1x8xf32>
    %11 = arith.maximumf %9, %10 : vector<1x8xf32>
    %cst_9 = arith.constant 9.99999974E-6 : f32
    %12 = vector.broadcast %cst_9 : f32 to vector<1x8xf32>
    %13 = arith.addf %11, %12 : vector<1x8xf32>
    %14 = math.rsqrt %13 : vector<1x8xf32>
    %15 = arith.mulf %2, %14 : vector<1x8xf32>
    %16 = arith.mulf %5, %15 : vector<1x8xf32>
    %17 = arith.subf %3, %16 : vector<1x8xf32>
    %c0_10 = arith.constant 0 : index
    %c0_11 = arith.constant 0 : index
    %c0_12 = arith.constant 0 : index
    %c0_13 = arith.constant 0 : index
    %18 = vector.load %arg1[%c0_10, %c0_11, %c0_12, %c0_13] : memref<1x16x16x8xf32, #tpu.memory_space<vmem>>, vector<1x16x16x8xf32>
    %19 = vector.shape_cast %18 : vector<1x16x16x8xf32> to vector<16x16x8xf32>
    %20 = vector.shape_cast %15 : vector<1x8xf32> to vector<1x1x8xf32>
    %21 = vector.broadcast %20 : vector<1x1x8xf32> to vector<16x16x8xf32>
    %22 = arith.mulf %19, %21 : vector<16x16x8xf32>
    %23 = vector.shape_cast %17 : vector<1x8xf32> to vector<1x1x8xf32>
    %24 = vector.broadcast %23 : vector<1x1x8xf32> to vector<16x16x8xf32>
    %25 = arith.addf %22, %24 : vector<16x16x8xf32>
    %cst_14 = arith.constant 0.000000e+00 : f32
    %26 = vector.broadcast %cst_14 : f32 to vector<16x16x8xf32>
    %27 = arith.maximumf %25, %26 : vector<16x16x8xf32>
    %cst_15 = arith.constant 0.000000e+00 : f32
    %28 = vector.broadcast %cst_15 : f32 to vector<1x24x8xf32>
    %c0_16 = arith.constant 0 : index
    %c0_17 = arith.constant 0 : index
    %c0_18 = arith.constant 0 : index
    %29 = vector.load %arg10[%c0_16, %c0_17, %c0_18] : memref<18x24x8xf32, #tpu.memory_space<vmem>>, vector<1x24x8xf32>
    tpu.vector_store %arg10[%c0_16, %c0_17, %c0_18], %28 {strides = array<i32>} : memref<18x24x8xf32, #tpu.memory_space<vmem>>, vector<1x24x8xf32>,
    %c17 = arith.constant 17 : index
    %c0_19 = arith.constant 0 : index
    %c0_20 = arith.constant 0 : index
    %30 = vector.load %arg10[%c17, %c0_19, %c0_20] : memref<18x24x8xf32, #tpu.memory_space<vmem>>, vector<1x24x8xf32>
    tpu.vector_store %arg10[%c17, %c0_19, %c0_20], %28 {strides = array<i32>} : memref<18x24x8xf32, #tpu.memory_space<vmem>>, vector<1x24x8xf32>,
    %cst_21 = arith.constant 0.000000e+00 : f32
    %31 = vector.broadcast %cst_21 : f32 to vector<16x1x8xf32>
    %c1 = arith.constant 1 : index
    %c0_22 = arith.constant 0 : index
    %c0_23 = arith.constant 0 : index
    %32 = vector.load %arg10[%c1, %c0_22, %c0_23] : memref<18x24x8xf32, #tpu.memory_space<vmem>>, vector<16x1x8xf32>
    tpu.vector_store %arg10[%c1, %c0_22, %c0_23], %31 {strides = array<i32>} : memref<18x24x8xf32, #tpu.memory_space<vmem>>, vector<16x1x8xf32>,
    %c1_24 = arith.constant 1 : index
    %c17_25 = arith.constant 17 : index
    %c0_26 = arith.constant 0 : index
    %33 = vector.load %arg10[%c1_24, %c17_25, %c0_26] : memref<18x24x8xf32, #tpu.memory_space<vmem>>, vector<16x1x8xf32>
    tpu.vector_store %arg10[%c1_24, %c17_25, %c0_26], %31 {strides = array<i32>} : memref<18x24x8xf32, #tpu.memory_space<vmem>>, vector<16x1x8xf32>,
    %c1_27 = arith.constant 1 : index
    %c1_28 = arith.constant 1 : index
    %c0_29 = arith.constant 0 : index
    %34 = vector.load %arg10[%c1_27, %c1_28, %c0_29] : memref<18x24x8xf32, #tpu.memory_space<vmem>>, vector<16x16x8xf32>
    tpu.vector_store %arg10[%c1_27, %c1_28, %c0_29], %27 {strides = array<i32>} : memref<18x24x8xf32, #tpu.memory_space<vmem>>, vector<16x16x8xf32>,
    %c0_30 = arith.constant 0 : index
    %c0_31 = arith.constant 0 : index
    %c0_32 = arith.constant 0 : index
    %35 = vector.load %arg10[%c0_30, %c0_31, %c0_32] : memref<18x24x8xf32, #tpu.memory_space<vmem>>, vector<16x16x8xf32>
    %36 = vector.shape_cast %35 : vector<16x16x8xf32> to vector<256x8xf32>
    %c0_33 = arith.constant 0 : index
    %c0_34 = arith.constant 0 : index
    %c0_35 = arith.constant 0 : index
    %37 = vector.load %arg6[%c0_33, %c0_34, %c0_35] : memref<9x8x8xf32, #tpu.memory_space<vmem>>, vector<1x8x8xf32>
    %38 = vector.shape_cast %37 : vector<1x8x8xf32> to vector<8x8xf32>
    %cst_36 = arith.constant dense<0.000000e+00> : vector<256x8xf32>
    %39 = tpu.matmul %36, %38, %cst_36 {dimension_numbers = #tpu.dot_dimension_numbers<[1], [0], [0], [1], [0, 0, 1, 1], [], []>} : vector<256x8xf32>, vector<8x8xf32>, vector<256x8xf32> -> vector<256x8xf32>
    %c0_37 = arith.constant 0 : index
    %c1_38 = arith.constant 1 : index
    %c0_39 = arith.constant 0 : index
    %40 = vector.load %arg10[%c0_37, %c1_38, %c0_39] : memref<18x24x8xf32, #tpu.memory_space<vmem>>, vector<16x16x8xf32>
    %41 = vector.shape_cast %40 : vector<16x16x8xf32> to vector<256x8xf32>
    %c1_40 = arith.constant 1 : index
    %c0_41 = arith.constant 0 : index
    %c0_42 = arith.constant 0 : index
    %42 = vector.load %arg6[%c1_40, %c0_41, %c0_42] : memref<9x8x8xf32, #tpu.memory_space<vmem>>, vector<1x8x8xf32>
    %43 = vector.shape_cast %42 : vector<1x8x8xf32> to vector<8x8xf32>
    %cst_43 = arith.constant dense<0.000000e+00> : vector<256x8xf32>
    %44 = tpu.matmul %41, %43, %cst_43 {dimension_numbers = #tpu.dot_dimension_numbers<[1], [0], [0], [1], [0, 0, 1, 1], [], []>} : vector<256x8xf32>, vector<8x8xf32>, vector<256x8xf32> -> vector<256x8xf32>
    %45 = arith.addf %39, %44 : vector<256x8xf32>
    %c0_44 = arith.constant 0 : index
    %c2 = arith.constant 2 : index
    %c0_45 = arith.constant 0 : index
    %46 = vector.load %arg10[%c0_44, %c2, %c0_45] : memref<18x24x8xf32, #tpu.memory_space<vmem>>, vector<16x16x8xf32>
    %47 = vector.shape_cast %46 : vector<16x16x8xf32> to vector<256x8xf32>
    %c2_46 = arith.constant 2 : index
    %c0_47 = arith.constant 0 : index
    %c0_48 = arith.constant 0 : index
    %48 = vector.load %arg6[%c2_46, %c0_47, %c0_48] : memref<9x8x8xf32, #tpu.memory_space<vmem>>, vector<1x8x8xf32>
    %49 = vector.shape_cast %48 : vector<1x8x8xf32> to vector<8x8xf32>
    %cst_49 = arith.constant dense<0.000000e+00> : vector<256x8xf32>
    %50 = tpu.matmul %47, %49, %cst_49 {dimension_numbers = #tpu.dot_dimension_numbers<[1], [0], [0], [1], [0, 0, 1, 1], [], []>} : vector<256x8xf32>, vector<8x8xf32>, vector<256x8xf32> -> vector<256x8xf32>
    %51 = arith.addf %45, %50 : vector<256x8xf32>
    %c1_50 = arith.constant 1 : index
    %c0_51 = arith.constant 0 : index
    %c0_52 = arith.constant 0 : index
    %52 = vector.load %arg10[%c1_50, %c0_51, %c0_52] : memref<18x24x8xf32, #tpu.memory_space<vmem>>, vector<16x16x8xf32>
    %53 = vector.shape_cast %52 : vector<16x16x8xf32> to vector<256x8xf32>
    %c3 = arith.constant 3 : index
    %c0_53 = arith.constant 0 : index
    %c0_54 = arith.constant 0 : index
    %54 = vector.load %arg6[%c3, %c0_53, %c0_54] : memref<9x8x8xf32, #tpu.memory_space<vmem>>, vector<1x8x8xf32>
    %55 = vector.shape_cast %54 : vector<1x8x8xf32> to vector<8x8xf32>
    %cst_55 = arith.constant dense<0.000000e+00> : vector<256x8xf32>
    %56 = tpu.matmul %53, %55, %cst_55 {dimension_numbers = #tpu.dot_dimension_numbers<[1], [0], [0], [1], [0, 0, 1, 1], [], []>} : vector<256x8xf32>, vector<8x8xf32>, vector<256x8xf32> -> vector<256x8xf32>
    %57 = arith.addf %51, %56 : vector<256x8xf32>
    %c1_56 = arith.constant 1 : index
    %c1_57 = arith.constant 1 : index
    %c0_58 = arith.constant 0 : index
    %58 = vector.load %arg10[%c1_56, %c1_57, %c0_58] : memref<18x24x8xf32, #tpu.memory_space<vmem>>, vector<16x16x8xf32>
    %59 = vector.shape_cast %58 : vector<16x16x8xf32> to vector<256x8xf32>
    %c4 = arith.constant 4 : index
    %c0_59 = arith.constant 0 : index
    %c0_60 = arith.constant 0 : index
    %60 = vector.load %arg6[%c4, %c0_59, %c0_60] : memref<9x8x8xf32, #tpu.memory_space<vmem>>, vector<1x8x8xf32>
    %61 = vector.shape_cast %60 : vector<1x8x8xf32> to vector<8x8xf32>
    %cst_61 = arith.constant dense<0.000000e+00> : vector<256x8xf32>
    %62 = tpu.matmul %59, %61, %cst_61 {dimension_numbers = #tpu.dot_dimension_numbers<[1], [0], [0], [1], [0, 0, 1, 1], [], []>} : vector<256x8xf32>, vector<8x8xf32>, vector<256x8xf32> -> vector<256x8xf32>
    %63 = arith.addf %57, %62 : vector<256x8xf32>
    %c1_62 = arith.constant 1 : index
    %c2_63 = arith.constant 2 : index
    %c0_64 = arith.constant 0 : index
    %64 = vector.load %arg10[%c1_62, %c2_63, %c0_64] : memref<18x24x8xf32, #tpu.memory_space<vmem>>, vector<16x16x8xf32>
    %65 = vector.shape_cast %64 : vector<16x16x8xf32> to vector<256x8xf32>
    %c5 = arith.constant 5 : index
    %c0_65 = arith.constant 0 : index
    %c0_66 = arith.constant 0 : index
    %66 = vector.load %arg6[%c5, %c0_65, %c0_66] : memref<9x8x8xf32, #tpu.memory_space<vmem>>, vector<1x8x8xf32>
    %67 = vector.shape_cast %66 : vector<1x8x8xf32> to vector<8x8xf32>
    %cst_67 = arith.constant dense<0.000000e+00> : vector<256x8xf32>
    %68 = tpu.matmul %65, %67, %cst_67 {dimension_numbers = #tpu.dot_dimension_numbers<[1], [0], [0], [1], [0, 0, 1, 1], [], []>} : vector<256x8xf32>, vector<8x8xf32>, vector<256x8xf32> -> vector<256x8xf32>
    %69 = arith.addf %63, %68 : vector<256x8xf32>
    %c2_68 = arith.constant 2 : index
    %c0_69 = arith.constant 0 : index
    %c0_70 = arith.constant 0 : index
    %70 = vector.load %arg10[%c2_68, %c0_69, %c0_70] : memref<18x24x8xf32, #tpu.memory_space<vmem>>, vector<16x16x8xf32>
    %71 = vector.shape_cast %70 : vector<16x16x8xf32> to vector<256x8xf32>
    %c6 = arith.constant 6 : index
    %c0_71 = arith.constant 0 : index
    %c0_72 = arith.constant 0 : index
    %72 = vector.load %arg6[%c6, %c0_71, %c0_72] : memref<9x8x8xf32, #tpu.memory_space<vmem>>, vector<1x8x8xf32>
    %73 = vector.shape_cast %72 : vector<1x8x8xf32> to vector<8x8xf32>
    %cst_73 = arith.constant dense<0.000000e+00> : vector<256x8xf32>
    %74 = tpu.matmul %71, %73, %cst_73 {dimension_numbers = #tpu.dot_dimension_numbers<[1], [0], [0], [1], [0, 0, 1, 1], [], []>} : vector<256x8xf32>, vector<8x8xf32>, vector<256x8xf32> -> vector<256x8xf32>
    %75 = arith.addf %69, %74 : vector<256x8xf32>
    %c2_74 = arith.constant 2 : index
    %c1_75 = arith.constant 1 : index
    %c0_76 = arith.constant 0 : index
    %76 = vector.load %arg10[%c2_74, %c1_75, %c0_76] : memref<18x24x8xf32, #tpu.memory_space<vmem>>, vector<16x16x8xf32>
    %77 = vector.shape_cast %76 : vector<16x16x8xf32> to vector<256x8xf32>
    %c7 = arith.constant 7 : index
    %c0_77 = arith.constant 0 : index
    %c0_78 = arith.constant 0 : index
    %78 = vector.load %arg6[%c7, %c0_77, %c0_78] : memref<9x8x8xf32, #tpu.memory_space<vmem>>, vector<1x8x8xf32>
    %79 = vector.shape_cast %78 : vector<1x8x8xf32> to vector<8x8xf32>
    %cst_79 = arith.constant dense<0.000000e+00> : vector<256x8xf32>
    %80 = tpu.matmul %77, %79, %cst_79 {dimension_numbers = #tpu.dot_dimension_numbers<[1], [0], [0], [1], [0, 0, 1, 1], [], []>} : vector<256x8xf32>, vector<8x8xf32>, vector<256x8xf32> -> vector<256x8xf32>
    %81 = arith.addf %75, %80 : vector<256x8xf32>
    %c2_80 = arith.constant 2 : index
    %c2_81 = arith.constant 2 : index
    %c0_82 = arith.constant 0 : index
    %82 = vector.load %arg10[%c2_80, %c2_81, %c0_82] : memref<18x24x8xf32, #tpu.memory_space<vmem>>, vector<16x16x8xf32>
    %83 = vector.shape_cast %82 : vector<16x16x8xf32> to vector<256x8xf32>
    %c8 = arith.constant 8 : index
    %c0_83 = arith.constant 0 : index
    %c0_84 = arith.constant 0 : index
    %84 = vector.load %arg6[%c8, %c0_83, %c0_84] : memref<9x8x8xf32, #tpu.memory_space<vmem>>, vector<1x8x8xf32>
    %85 = vector.shape_cast %84 : vector<1x8x8xf32> to vector<8x8xf32>
    %cst_85 = arith.constant dense<0.000000e+00> : vector<256x8xf32>
    %86 = tpu.matmul %83, %85, %cst_85 {dimension_numbers = #tpu.dot_dimension_numbers<[1], [0], [0], [1], [0, 0, 1, 1], [], []>} : vector<256x8xf32>, vector<8x8xf32>, vector<256x8xf32> -> vector<256x8xf32>
    %87 = arith.addf %81, %86 : vector<256x8xf32>
    %cst_86 = arith.constant dense<0.000000e+00> : vector<8xf32>
    %88 = vector.multi_reduction <add>, %87, %cst_86 [0] : vector<256x8xf32> to vector<8xf32>
    %89 = vector.shape_cast %88 : vector<8xf32> to vector<1x8xf32>
    %c0_87 = arith.constant 0 : index
    %c0_88 = arith.constant 0 : index
    %c0_89 = arith.constant 0 : index
    %90 = vector.load %arg8[%c0_87, %c0_88, %c0_89] : memref<1x1x8xf32, #tpu.memory_space<vmem>>, vector<1x1x8xf32>
    %91 = vector.shape_cast %90 : vector<1x1x8xf32> to vector<1x8xf32>
    %92 = vector.shape_cast %89 : vector<1x8xf32> to vector<1x1x8xf32>
    tpu.vector_store %arg8[%c0_87, %c0_88, %c0_89], %92 {strides = array<i32>} : memref<1x1x8xf32, #tpu.memory_space<vmem>>, vector<1x1x8xf32>,
    %93 = arith.mulf %87, %87 : vector<256x8xf32>
    %cst_90 = arith.constant dense<0.000000e+00> : vector<8xf32>
    %94 = vector.multi_reduction <add>, %93, %cst_90 [0] : vector<256x8xf32> to vector<8xf32>
    %95 = vector.shape_cast %94 : vector<8xf32> to vector<1x8xf32>
    %c0_91 = arith.constant 0 : index
    %c0_92 = arith.constant 0 : index
    %c0_93 = arith.constant 0 : index
    %96 = vector.load %arg9[%c0_91, %c0_92, %c0_93] : memref<1x1x8xf32, #tpu.memory_space<vmem>>, vector<1x1x8xf32>
    %97 = vector.shape_cast %96 : vector<1x1x8xf32> to vector<1x8xf32>
    %98 = vector.shape_cast %95 : vector<1x8xf32> to vector<1x1x8xf32>
    tpu.vector_store %arg9[%c0_91, %c0_92, %c0_93], %98 {strides = array<i32>} : memref<1x1x8xf32, #tpu.memory_space<vmem>>, vector<1x1x8xf32>,
    %99 = vector.shape_cast %87 : vector<256x8xf32> to vector<16x16x8xf32>
    %c0_94 = arith.constant 0 : index
    %c0_95 = arith.constant 0 : index
    %c0_96 = arith.constant 0 : index
    %c0_97 = arith.constant 0 : index
    %100 = vector.load %arg7[%c0_94, %c0_95, %c0_96, %c0_97] : memref<1x16x16x8xf32, #tpu.memory_space<vmem>>, vector<1x16x16x8xf32>
    %101 = vector.shape_cast %100 : vector<1x16x16x8xf32> to vector<16x16x8xf32>
    %102 = vector.shape_cast %99 : vector<16x16x8xf32> to vector<1x16x16x8xf32>
    tpu.vector_store %arg7[%c0_94, %c0_95, %c0_96, %c0_97], %102 {strides = array<i32>} : memref<1x16x16x8xf32, #tpu.memory_space<vmem>>, vector<1x16x16x8xf32>,
    return
  }
  func.func @transform_0(%arg0: i32) -> (i32, i32, i32, i32) {
    %c0_i32 = arith.constant 0 : i32
    %c0_i32_0 = arith.constant 0 : i32
    %c0_i32_1 = arith.constant 0 : i32
    %c0_i32_2 = arith.constant 0 : i32
    return %arg0, %c0_i32, %c0_i32_0, %c0_i32_1 : i32, i32, i32, i32
  }
  func.func @transform_1(%arg0: i32) -> (i32, i32) {
    %c0_i32 = arith.constant 0 : i32
    %c0_i32_0 = arith.constant 0 : i32
    %c0_i32_1 = arith.constant 0 : i32
    return %c0_i32, %c0_i32_0 : i32, i32
  }
  func.func @transform_2(%arg0: i32) -> (i32, i32) {
    %c0_i32 = arith.constant 0 : i32
    %c0_i32_0 = arith.constant 0 : i32
    %c0_i32_1 = arith.constant 0 : i32
    return %c0_i32, %c0_i32_0 : i32, i32
  }
  func.func @transform_3(%arg0: i32) -> (i32, i32) {
    %c0_i32 = arith.constant 0 : i32
    %c0_i32_0 = arith.constant 0 : i32
    %c0_i32_1 = arith.constant 0 : i32
    return %c0_i32, %c0_i32_0 : i32, i32
  }
  func.func @transform_4(%arg0: i32) -> (i32, i32) {
    %c0_i32 = arith.constant 0 : i32
    %c0_i32_0 = arith.constant 0 : i32
    %c0_i32_1 = arith.constant 0 : i32
    return %c0_i32, %c0_i32_0 : i32, i32
  }
  func.func @transform_5(%arg0: i32) -> (i32, i32, i32) {
    %c0_i32 = arith.constant 0 : i32
    %c0_i32_0 = arith.constant 0 : i32
    %c0_i32_1 = arith.constant 0 : i32
    %c0_i32_2 = arith.constant 0 : i32
    return %c0_i32, %c0_i32_0, %c0_i32_1 : i32, i32, i32
  }
  func.func @transform_6(%arg0: i32) -> (i32, i32, i32, i32) {
    %c0_i32 = arith.constant 0 : i32
    %c0_i32_0 = arith.constant 0 : i32
    %c0_i32_1 = arith.constant 0 : i32
    %c0_i32_2 = arith.constant 0 : i32
    return %arg0, %c0_i32, %c0_i32_0, %c0_i32_1 : i32, i32, i32, i32
  }
  func.func @transform_7(%arg0: i32) -> (i32, i32, i32) {
    %c0_i32 = arith.constant 0 : i32
    %c0_i32_0 = arith.constant 0 : i32
    %c0_i32_1 = arith.constant 0 : i32
    return %arg0, %c0_i32, %c0_i32_0 : i32, i32, i32
  }
  func.func @transform_8(%arg0: i32) -> (i32, i32, i32) {
    %c0_i32 = arith.constant 0 : i32
    %c0_i32_0 = arith.constant 0 : i32
    %c0_i32_1 = arith.constant 0 : i32
    return %arg0, %c0_i32, %c0_i32_0 : i32, i32, i32
  }
}

</mosaic_0001>

<bundles_post_ra>
// kernel: double_conv.5
= control target key start
LH: loop header
LB: loop body
LE: loop exit
PB: predicated region body
PF: predicated region fallthrough
CT: control target
= control target key end

     0   :  { %s529_s18 = smov 0   ;;  %s733_s0 = inlined_call_operand.vmem [shape: f32[2,16,16,8], index: 0, kind: input, shape index: {}]   ;;  %s734_s1 = inlined_call_operand.vmem [shape: f32[1,8], index: 1, kind: input, shape index: {}]   ;;  %s735_s2 = inlined_call_operand.vmem [shape: f32[1,8], index: 2, kind: input, shape index: {}]   ;;  %s736_s3 = inlined_call_operand.vmem [shape: f32[1,8], index: 3, kind: input, shape index: {}]   ;;  %s737_s4 = inlined_call_operand.vmem [shape: f32[1,8], index: 4, kind: input, shape index: {}]   ;;  %s738_s5 = inlined_call_operand.vmem [shape: f32[2,16,16,8], index: 5, kind: output, shape index: {}]  }
   0x1 LB: > { %s468_s19 = sadd.s32 4294967295, %s497_s18   ;;  %p472_p0 = scmp.ge.s32.totalorder %s497_s18, 1  ;;  %s497_s18 = sphi %s529_s18, %s15_s18  }
   0x2   : > { %p187_p1 = scmp.lt.s32.totalorder %s497_s18, 3 }
   0x4   : > { %p188_p2 = pnand %p472_p0, %p187_p1 }
   0x5   : > { %v225_v0 = vld [vmem:[%s734_s1] sm:$0x1] (!%p188_p2)  ;;  %p215_p3 = scmp.lt.s32.totalorder (!%p188_p2), %s468_s19, 1  ;;  %v273_v8 = vlaneseq (!%p188_p2)  ;;  %vm380_vm0 = vcmask (!%p188_p2), 64512  }
   0x6   : > { %191 = sbr.rel (%p188_p2) target bundleno = 61 (0x3d), region = 40  ;;  %v226_v1 = vld [vmem:[%s735_s2] sm:$0x1] (!%p188_p2)  ;;  %v230_v2 = vmul.f32 (!%p188_p2), 0.001953125, %v225_v0 }
   0x7   : > { %v231_v3 = vmul.f32 (!%p188_p2), 0.001953125, %v226_v1  ;;  %v274_v9 = vshrl.u32 (!%p188_p2), %v273_v8, 7  ;;  %v227_v10 = vld [vmem:[%s736_s3] sm:$0x1] (!%p188_p2) }
   0x8   : > { %v232_v4 = vmul.f32 (!%p188_p2), %v230_v2, %v230_v2  ;;  %v228_v13 = vld [vmem:[%s737_s4] sm:$0x1] (!%p188_p2) }
   0x9   : > { %v275_v11 = vsub.s32 (!%p188_p2), 0, %v274_v9 }
   0xa   : > { %v233_v5 = vsub.f32 (!%p188_p2), %v231_v3, %v232_v4 }
   0xc   : > { %v234_v6 = vmax.f32 (!%p188_p2), %v233_v5, 0.0 }
   0xd   : > { %s740_s19 = smov (!%p215_p3, %s468_s19), 1 }
   0xe   : > { %v235_v7 = vadd.f32 1e-05, %v234_v6  ;;  %s479_s24 = sshll.u32 %s740_s19, 8 }
   0xf   : > { %s551_s27 = scalar_lea.vmem %s733_s0, %s479_s24  ;;  %s600_s9 = scalar_lea.vmem %s738_s5, %s479_s24 }
  0x10   : > { %489 = vrsqrt.f32 %v235_v7  ;;  %v240_v15 = vld [vmem:[%s551_s27] sm:$0xff]  ;;  %v241_v16 = vld [vmem:[%s551_s27 + $0x8] sm:$0xff]  ;;  %v242_v17 = vld [vmem:[%s551_s27 + $0x10] sm:$0xff] }
  0x11   : > { %v243_v18 = vld [vmem:[%s551_s27 + $0x18] sm:$0xff]  ;;  %v244_v19 = vld [vmem:[%s551_s27 + $0x20] sm:$0xff]  ;;  %v245_v22 = vld [vmem:[%s551_s27 + $0x28] sm:$0xff] }
  0x12   : > { %v246_v23 = vld [vmem:[%s551_s27 + $0x30] sm:$0xff]  ;;  %v247_v24 = vld [vmem:[%s551_s27 + $0x38] sm:$0xff]  ;;  %v248_v25 = vld [vmem:[%s551_s27 + $0x40] sm:$0xff] }
  0x13   : > { %v249_v26 = vld [vmem:[%s551_s27 + $0x48] sm:$0xff]  ;;  %v250_v27 = vld [vmem:[%s551_s27 + $0x50] sm:$0xff]  ;;  %v251_v32 = vld [vmem:[%s551_s27 + $0x58] sm:$0xff] }
  0x14   : > { %v252_v33 = vld [vmem:[%s551_s27 + $0x60] sm:$0xff]  ;;  %v253_v34 = vld [vmem:[%s551_s27 + $0x68] sm:$0xff]  ;;  %v254_v59 = vld [vmem:[%s551_s27 + $0x70] sm:$0xff] }
  0x15   : > { %v255_v60 = vld [vmem:[%s551_s27 + $0x78] sm:$0xff]  ;;  %v256_v5 = vld [vmem:[%s551_s27 + $0x80] sm:$0xff] }
  0x1a   : > { %v490_v12 = vpop.eup %489 }
  0x1b   : > { %v237_v14 = vmul.f32 %v490_v12, %v227_v10  ;;  %v257_v10 = vld [vmem:[%s551_s27 + $0x88] sm:$0xff]  ;;  %v259_v12 = vld [vmem:[%s551_s27 + $0x98] sm:$0xff] }
  0x1d   : > { %v238_v20 = vmul.f32 %v237_v14, %v230_v2  ;;  %v564_v21 = vrot.slane %v237_v14, %v275_v11 }
  0x1f   : > { %v239_v28 = vsub.f32 %v228_v13, %v238_v20  ;;  %v278_v29 = vmul.f32 %v564_v21, %v240_v15  ;;  %v279_v30 = vmul.f32 %v564_v21, %v241_v16  ;;  %v280_v31 = vmul.f32 %v564_v21, %v242_v17  ;;  %v260_v17 = vld [vmem:[%s551_s27 + $0xa0] sm:$0xff] }
  0x20   : > { %v281_v35 = vmul.f32 %v564_v21, %v243_v18  ;;  %v282_v36 = vmul.f32 %v564_v21, %v244_v19  ;;  %v283_v37 = vmul.f32 %v564_v21, %v245_v22  ;;  %v284_v38 = vmul.f32 %v564_v21, %v246_v23  ;;  %v261_v18 = vld [vmem:[%s551_s27 + $0xa8] sm:$0xff] }
  0x21   : > { %v582_v39 = vrot.slane %v239_v28, %v275_v11  ;;  %v285_v40 = vmul.f32 %v564_v21, %v247_v24  ;;  %v286_v41 = vmul.f32 %v564_v21, %v248_v25  ;;  %v287_v42 = vmul.f32 %v564_v21, %v249_v26  ;;  %v258_v11 = vld [vmem:[%s551_s27 + $0x90] sm:$0xff] }
  0x22   : > { %v288_v43 = vmul.f32 %v564_v21, %v250_v27  ;;  %v289_v44 = vmul.f32 %v564_v21, %v251_v32  ;;  %v290_v45 = vmul.f32 %v564_v21, %v252_v33  ;;  %v291_v46 = vmul.f32 %v564_v21, %v253_v34  ;;  %v262_v28 = vld [vmem:[%s551_s27 + $0xb0] sm:$0xff] }
  0x23   : > { %v316_v47 = vadd.f32 %v582_v39, %v278_v29  ;;  %v317_v48 = vadd.f32 %v582_v39, %v279_v30  ;;  %v318_v49 = vadd.f32 %v582_v39, %v280_v31  ;;  %v319_v50 = vadd.f32 %v582_v39, %v281_v35  ;;  %v263_v29 = vld [vmem:[%s551_s27 + $0xb8] sm:$0xff] }
  0x24   : > { %v320_v51 = vadd.f32 %v582_v39, %v282_v36  ;;  %v321_v52 = vadd.f32 %v582_v39, %v283_v37  ;;  %v322_v53 = vadd.f32 %v582_v39, %v284_v38  ;;  %v323_v54 = vadd.f32 %v582_v39, %v285_v40  ;;  %v264_v38 = vld [vmem:[%s551_s27 + $0xc0] sm:$0xff] }
  0x25   : > { %v348_v55 = vmax.f32 %v316_v47, 0.0  ;;  %v349_v56 = vmax.f32 %v317_v48, 0.0  ;;  %v350_v57 = vmax.f32 %v318_v49, 0.0  ;;  %v351_v58 = vmax.f32 %v319_v50, 0.0 }
  0x26   : > { %v352_v61 = vmax.f32 %v320_v51, 0.0  ;;  %v353_v62 = vmax.f32 %v321_v52, 0.0  ;;  %v354_v63 = vmax.f32 %v322_v53, 0.0  ;;  %v355_v0 = vmax.f32 %v323_v54, 0.0  ;;  %v268_v51 = vld [vmem:[%s551_s27 + $0xe0] sm:$0xff]  ;;  %v269_v52 = vld [vmem:[%s551_s27 + $0xe8] sm:$0xff] }
  0x27   : > { %381 = vst.msk [vmem:[%s600_s9] sm:$0xff] %vm380_vm0, %v348_v55  ;;  %382 = vst.msk [vmem:[%s600_s9 + $0x8] sm:$0xff] %vm380_vm0, %v349_v56  ;;  %v324_v1 = vadd.f32 %v582_v39, %v286_v41  ;;  %v325_v2 = vadd.f32 %v582_v39, %v287_v42  ;;  %v326_v3 = vadd.f32 %v582_v39, %v288_v43 }
  0x28   : > { %383 = vst.msk [vmem:[%s600_s9 + $0x10] sm:$0xff] %vm380_vm0, %v350_v57  ;;  %384 = vst.msk [vmem:[%s600_s9 + $0x18] sm:$0xff] %vm380_vm0, %v351_v58  ;;  %v327_v4 = vadd.f32 %v582_v39, %v289_v44  ;;  %v328_v6 = vadd.f32 %v582_v39, %v290_v45  ;;  %v329_v7 = vadd.f32 %v582_v39, %v291_v46  ;;  %v265_v44 = vld [vmem:[%s551_s27 + $0xc8] sm:$0xff]  ;;  %v266_v45 = vld [vmem:[%s551_s27 + $0xd0] sm:$0xff] }
  0x29   : > { %385 = vst.msk [vmem:[%s600_s9 + $0x20] sm:$0xff] %vm380_vm0, %v352_v61  ;;  %386 = vst.msk [vmem:[%s600_s9 + $0x28] sm:$0xff] %vm380_vm0, %v353_v62  ;;  %v292_v8 = vmul.f32 %v564_v21, %v254_v59  ;;  %v293_v9 = vmul.f32 %v564_v21, %v255_v60  ;;  %v356_v13 = vmax.f32 %v324_v1, 0.0  ;;  %v357_v14 = vmax.f32 %v325_v2, 0.0  ;;  %v267_v46 = vld [vmem:[%s551_s27 + $0xd8] sm:$0xff]  ;;  %v270_v61 = vld [vmem:[%s551_s27 + $0xf0] sm:$0xff] }
  0x2a   : > { %387 = vst.msk [vmem:[%s600_s9 + $0x30] sm:$0xff] %vm380_vm0, %v354_v63  ;;  %388 = vst.msk [vmem:[%s600_s9 + $0x38] sm:$0xff] %vm380_vm0, %v355_v0  ;;  %v358_v15 = vmax.f32 %v326_v3, 0.0  ;;  %v359_v16 = vmax.f32 %v327_v4, 0.0  ;;  %v360_v19 = vmax.f32 %v328_v6, 0.0  ;;  %v361_v20 = vmax.f32 %v329_v7, 0.0 }
  0x2b   : > { %v330_v22 = vadd.f32 %v582_v39, %v292_v8  ;;  %v331_v23 = vadd.f32 %v582_v39, %v293_v9  ;;  %389 = vst.msk [vmem:[%s600_s9 + $0x40] sm:$0xff] %vm380_vm0, %v356_v13  ;;  %390 = vst.msk [vmem:[%s600_s9 + $0x48] sm:$0xff] %vm380_vm0, %v357_v14  ;;  %v294_v24 = vmul.f32 %v564_v21, %v256_v5  ;;  %v271_v62 = vld [vmem:[%s551_s27 + $0xf8] sm:$0xff] }
  0x2c   : > { %391 = vst.msk [vmem:[%s600_s9 + $0x50] sm:$0xff] %vm380_vm0, %v358_v15  ;;  %392 = vst.msk [vmem:[%s600_s9 + $0x58] sm:$0xff] %vm380_vm0, %v359_v16  ;;  %v295_v25 = vmul.f32 %v564_v21, %v257_v10  ;;  %v296_v26 = vmul.f32 %v564_v21, %v258_v11  ;;  %v297_v27 = vmul.f32 %v564_v21, %v259_v12 }
  0x2d   : > { %393 = vst.msk [vmem:[%s600_s9 + $0x60] sm:$0xff] %vm380_vm0, %v360_v19  ;;  %394 = vst.msk [vmem:[%s600_s9 + $0x68] sm:$0xff] %vm380_vm0, %v361_v20  ;;  %v362_v30 = vmax.f32 %v330_v22, 0.0  ;;  %v363_v31 = vmax.f32 %v331_v23, 0.0  ;;  %v298_v32 = vmul.f32 %v564_v21, %v260_v17  ;;  %v299_v33 = vmul.f32 %v564_v21, %v261_v18 }
  0x2e   : > { %v332_v34 = vadd.f32 %v582_v39, %v294_v24  ;;  %v333_v35 = vadd.f32 %v582_v39, %v295_v25  ;;  %v334_v36 = vadd.f32 %v582_v39, %v296_v26  ;;  %v335_v37 = vadd.f32 %v582_v39, %v297_v27 }
  0x2f   : > { %395 = vst.msk [vmem:[%s600_s9 + $0x70] sm:$0xff] %vm380_vm0, %v362_v30  ;;  %396 = vst.msk [vmem:[%s600_s9 + $0x78] sm:$0xff] %vm380_vm0, %v363_v31  ;;  %v336_v40 = vadd.f32 %v582_v39, %v298_v32  ;;  %v337_v41 = vadd.f32 %v582_v39, %v299_v33  ;;  %v300_v42 = vmul.f32 %v564_v21, %v262_v28 }
  0x30   : > { %v301_v43 = vmul.f32 %v564_v21, %v263_v29  ;;  %v364_v47 = vmax.f32 %v332_v34, 0.0  ;;  %v365_v48 = vmax.f32 %v333_v35, 0.0  ;;  %v366_v49 = vmax.f32 %v334_v36, 0.0 }
  0x31   : > { %v367_v50 = vmax.f32 %v335_v37, 0.0  ;;  %v368_v53 = vmax.f32 %v336_v40, 0.0  ;;  %v369_v54 = vmax.f32 %v337_v41, 0.0  ;;  %v338_v55 = vadd.f32 %v582_v39, %v300_v42 }
  0x32   : > { %v339_v56 = vadd.f32 %v582_v39, %v301_v43  ;;  %397 = vst.msk [vmem:[%s600_s9 + $0x80] sm:$0xff] %vm380_vm0, %v364_v47  ;;  %398 = vst.msk [vmem:[%s600_s9 + $0x88] sm:$0xff] %vm380_vm0, %v365_v48  ;;  %v302_v57 = vmul.f32 %v564_v21, %v264_v38  ;;  %v303_v58 = vmul.f32 %v564_v21, %v265_v44 }
  0x33   : > { %399 = vst.msk [vmem:[%s600_s9 + $0x90] sm:$0xff] %vm380_vm0, %v366_v49  ;;  %400 = vst.msk [vmem:[%s600_s9 + $0x98] sm:$0xff] %vm380_vm0, %v367_v50  ;;  %v304_v59 = vmul.f32 %v564_v21, %v266_v45  ;;  %v305_v60 = vmul.f32 %v564_v21, %v267_v46  ;;  %v370_v63 = vmax.f32 %v338_v55, 0.0  ;;  %v306_v1 = vmul.f32 %v564_v21, %v268_v51 }
  0x34   : > { %401 = vst.msk [vmem:[%s600_s9 + $0xa0] sm:$0xff] %vm380_vm0, %v368_v53  ;;  %402 = vst.msk [vmem:[%s600_s9 + $0xa8] sm:$0xff] %vm380_vm0, %v369_v54  ;;  %v371_v0 = vmax.f32 %v339_v56, 0.0  ;;  %v307_v2 = vmul.f32 %v564_v21, %v269_v52  ;;  %v340_v3 = vadd.f32 %v582_v39, %v302_v57  ;;  %v341_v4 = vadd.f32 %v582_v39, %v303_v58 }
  0x35   : > { %v342_v5 = vadd.f32 %v582_v39, %v304_v59  ;;  %v343_v6 = vadd.f32 %v582_v39, %v305_v60  ;;  %403 = vst.msk [vmem:[%s600_s9 + $0xb0] sm:$0xff] %vm380_vm0, %v370_v63  ;;  %v344_v7 = vadd.f32 %v582_v39, %v306_v1  ;;  %v308_v9 = vmul.f32 %v564_v21, %v270_v61 }
  0x36   : > { %404 = vst.msk [vmem:[%s600_s9 + $0xb8] sm:$0xff] %vm380_vm0, %v371_v0  ;;  %v345_v8 = vadd.f32 %v582_v39, %v307_v2  ;;  %v309_v10 = vmul.f32 %v564_v21, %v271_v62  ;;  %v372_v11 = vmax.f32 %v340_v3, 0.0  ;;  %v373_v12 = vmax.f32 %v341_v4, 0.0 }
  0x37   : > { %v374_v13 = vmax.f32 %v342_v5, 0.0  ;;  %v375_v14 = vmax.f32 %v343_v6, 0.0  ;;  %v376_v15 = vmax.f32 %v344_v7, 0.0  ;;  %v346_v17 = vadd.f32 %v582_v39, %v308_v9 }
  0x38   : > { %v377_v16 = vmax.f32 %v345_v8, 0.0  ;;  %v347_v18 = vadd.f32 %v582_v39, %v309_v10  ;;  %405 = vst.msk [vmem:[%s600_s9 + $0xc0] sm:$0xff] %vm380_vm0, %v372_v11  ;;  %406 = vst.msk [vmem:[%s600_s9 + $0xc8] sm:$0xff] %vm380_vm0, %v373_v12 }
  0x39   : > { %407 = vst.msk [vmem:[%s600_s9 + $0xd0] sm:$0xff] %vm380_vm0, %v374_v13  ;;  %408 = vst.msk [vmem:[%s600_s9 + $0xd8] sm:$0xff] %vm380_vm0, %v375_v14  ;;  %v378_v21 = vmax.f32 %v346_v17, 0.0 }
  0x3a   : > { %409 = vst.msk [vmem:[%s600_s9 + $0xe0] sm:$0xff] %vm380_vm0, %v376_v15  ;;  %410 = vst.msk [vmem:[%s600_s9 + $0xe8] sm:$0xff] %vm380_vm0, %v377_v16  ;;  %v379_v19 = vmax.f32 %v347_v18, 0.0 }
  0x3b   : > { %411 = vst.msk [vmem:[%s600_s9 + $0xf0] sm:$0xff] %vm380_vm0, %v378_v21 }
  0x3c   : > { %412 = vst.msk [vmem:[%s600_s9 + $0xf8] sm:$0xff] %vm380_vm0, %v379_v19 }
  0x3d PF: > { %s15_s18 = sadd.s32 1, %s497_s18  }
  0x3e   : > { %p12_p4 = scmp.ge.s32.totalorder %s15_s18, 4  }
  0x40   :  { %14 = sbr.rel (!%p12_p4) target bundleno = 1 (0x1), region = 70 }

// kernel: double_conv.3
= control target key start
LH: loop header
LB: loop body
LE: loop exit
PB: predicated region body
PF: predicated region fallthrough
CT: control target
= control target key end

     0   :  { %s5445_s15 = smov 0   ;;  %s6568_s0 = inlined_call_operand.vmem [shape: f32[2,16,16,4], index: 0, kind: input, shape index: {}]   ;;  %s6569_s1 = inlined_call_operand.vmem [shape: f32[9,4,8], index: 1, kind: input, shape index: {}]   ;;  %s6570_s2 = inlined_call_operand.vmem [shape: f32[2,16,16,8], index: 2, kind: output, shape index: {0}]   ;;  %s6571_s3 = inlined_call_operand.vmem [shape: f32[2,1,8], index: 3, kind: output, shape index: {1}]   ;;  %s6572_s4 = inlined_call_operand.vmem [shape: f32[2,1,8], index: 4, kind: output, shape index: {2}]  }
   0x1 LB: > { %s4079_s16 = sadd.s32 4294967295, %s5417_s15   ;;  %p4083_p0 = scmp.ge.s32.totalorder %s5417_s15, 1  ;;  %s5417_s15 = sphi %s5445_s15, %s15_s15  }
   0x2   : > { %p167_p1 = scmp.lt.s32.totalorder %s5417_s15, 3 }
   0x4   : > { %p168_p2 = pnand %p4083_p0, %p167_p1 }
   0x6   : > { %171 = sbr.rel (%p168_p2) target bundleno = 561 (0x231), region = 28 }
   0xd   : > { %v4088_v0 = vld [vmem:[%s6569_s1 + $0x4] sm:$0xf]  ;;  %vm484_vm0 = vcmask 1043456   ;;  %vm247_vm1 = vcmask 31744   ;;  %p5456_p3 = scmp.lt.s32.totalorder %s4079_s16, 1  ;;  %v5419_v1 = vmov 0.0  }
   0xe   : > { %4694 = vmatprep.subr.msk.mxu1 %vm484_vm0, %v4088_v0  ;;  %248 = vst.msk [vmem:[#allocation2] sm:$0xff] %vm247_vm1, %v5419_v1  ;;  %249 = vst.msk [vmem:[#allocation2 + $0x8] sm:$0xff] %vm247_vm1, %v5419_v1  ;;  %v5470_v2 = vld [vmem:[%s6569_s1 + $0x10] sm:$0xf]  ;;  %v5475_v3 = vld [vmem:[%s6569_s1] sm:$0xf] }
   0xf   : > { %250 = vst.msk [vmem:[#allocation2 + $0x10] sm:$0xff] %vm247_vm1, %v5419_v1  ;;  %252 = vst.msk [vmem:[#allocation2 + $0x198] sm:$0xff] %vm247_vm1, %v5419_v1  ;;  %v5480_v4 = vld [vmem:[%s6569_s1 + $0x14] sm:$0xf]  ;;  %4695 = vmatpush3.msk.msra.mxu1 %vm484_vm0, %v4088_v0  ;;  %4894 = vmatprep.subr.msk.mxu0 %vm484_vm0, %v5470_v2  ;;  %s6681_s16 = smov (!%p5456_p3, %s4079_s16), 1  ;;  %vm256_vm2 = vcmask 24576  }
  0x10   : > { %253 = vst.msk [vmem:[#allocation2 + $0x1a0] sm:$0xff] %vm247_vm1, %v5419_v1  ;;  %254 = vst.msk [vmem:[#allocation2 + $0x1a8] sm:$0xff] %vm247_vm1, %v5419_v1  ;;  %4895 = vmatpush3.msk.msra.mxu0 %vm484_vm0, %v5470_v2  ;;  %4744 = vmatprep.subr.msk.mxu1 %vm484_vm0, %v5475_v3  ;;  %s4395_s26 = sshll.u32 %s6681_s16, 8  ;;  %v5547_v11 = vld [vmem:[%s6569_s1 + $0x8] sm:$0xf]  ;;  %vm3768_vm3 = vcmask 64512   ;;  %s211_s21 = scalar_lea.vmem %s6571_s3, %s6681_s16 }
  0x11   : > { %273 = vst.msk [vmem:[#allocation2 + $0x29] sm:$0x1] %vm256_vm2, %v5419_v1  ;;  %257 = vst.msk [vmem:[#allocation2 + $0x18] sm:$0x1] %vm256_vm2, %v5419_v1  ;;  %4944 = vmatprep.subr.msk.mxu0 %vm484_vm0, %v5480_v4  ;;  %s5533_s29 = scalar_lea.vmem %s6568_s0, %s4395_s26  ;;  %v5597_v33 = vld [vmem:[%s6569_s1 + $0x18] sm:$0xf]  ;;  %s6419_s18 = scalar_lea.vmem %s6570_s2, %s4395_s26 }
  0x12   : > { %258 = vst.msk [vmem:[#allocation2 + $0x30] sm:$0x1] %vm256_vm2, %v5419_v1  ;;  %259 = vst.msk [vmem:[#allocation2 + $0x48] sm:$0x1] %vm256_vm2, %v5419_v1  ;;  %v215_v5 = vld [vmem:[%s5533_s29] sm:$0xff]  ;;  %v216_v6 = vld [vmem:[%s5533_s29 + $0x8] sm:$0xff]  ;;  %s214_s24 = scalar_lea.vmem %s6572_s4, %s6681_s16 }
  0x13   : > { %260 = vst.msk [vmem:[#allocation2 + $0x60] sm:$0x1] %vm256_vm2, %v5419_v1  ;;  %261 = vst.msk [vmem:[#allocation2 + $0x78] sm:$0x1] %vm256_vm2, %v5419_v1  ;;  %v217_v7 = vld [vmem:[%s5533_s29 + $0x10] sm:$0xff]  ;;  %v218_v8 = vld [vmem:[%s5533_s29 + $0x18] sm:$0xff] }
  0x14   : > { %262 = vst.msk [vmem:[#allocation2 + $0x90] sm:$0x1] %vm256_vm2, %v5419_v1  ;;  %263 = vst.msk [vmem:[#allocation2 + $0xa8] sm:$0x1] %vm256_vm2, %v5419_v1  ;;  %v219_v9 = vld [vmem:[%s5533_s29 + $0x20] sm:$0xff]  ;;  %v220_v10 = vld [vmem:[%s5533_s29 + $0x28] sm:$0xff] }
  0x15   : > { %264 = vst.msk [vmem:[#allocation2 + $0xc0] sm:$0x1] %vm256_vm2, %v5419_v1  ;;  %265 = vst.msk [vmem:[#allocation2 + $0xd8] sm:$0x1] %vm256_vm2, %v5419_v1  ;;  %v354_v12 = vld [vmem:[#allocation2 + $0x1] sm:$0xff]  ;;  %v221_v14 = vld [vmem:[%s5533_s29 + $0x30] sm:$0xff] }
  0x16   : > { %266 = vst.msk [vmem:[#allocation2 + $0xf0] sm:$0x1] %vm256_vm2, %v5419_v1  ;;  %267 = vst.msk [vmem:[#allocation2 + $0x108] sm:$0x1] %vm256_vm2, %v5419_v1  ;;  %v355_v13 = vld [vmem:[#allocation2 + $0x9] sm:$0xff]  ;;  %4696 = vmatprep.mubr.msk.f32.mxu1 %vm247_vm1, %v354_v12  ;;  %v222_v15 = vld [vmem:[%s5533_s29 + $0x38] sm:$0xff] }
  0x17   : > { %268 = vst.msk [vmem:[#allocation2 + $0x120] sm:$0x1] %vm256_vm2, %v5419_v1  ;;  %269 = vst.msk [vmem:[#allocation2 + $0x138] sm:$0x1] %vm256_vm2, %v5419_v1  ;;  %v223_v16 = vld [vmem:[%s5533_s29 + $0x40] sm:$0xff]  ;;  %v224_v17 = vld [vmem:[%s5533_s29 + $0x48] sm:$0xff]  ;;  %4697 = vmatmul.mubr.msk.f32.vlgmr.msra.gmra.mrb[0].mxu1 %vm247_vm1, %v355_v13 }
  0x18   : > { %270 = vst.msk [vmem:[#allocation2 + $0x150] sm:$0x1] %vm256_vm2, %v5419_v1  ;;  %271 = vst.msk [vmem:[#allocation2 + $0x168] sm:$0x1] %vm256_vm2, %v5419_v1  ;;  %v225_v18 = vld [vmem:[%s5533_s29 + $0x50] sm:$0xff]  ;;  %v226_v19 = vld [vmem:[%s5533_s29 + $0x58] sm:$0xff]  ;;  %4745 = vmatpush3.msk.msra.mxu1 %vm484_vm0, %v5475_v3 }
  0x19   : > { %272 = vst.msk [vmem:[#allocation2 + $0x180] sm:$0x1] %vm256_vm2, %v5419_v1  ;;  %274 = vst.msk [vmem:[#allocation2 + $0x41] sm:$0x1] %vm256_vm2, %v5419_v1  ;;  %v227_v20 = vld [vmem:[%s5533_s29 + $0x60] sm:$0xff]  ;;  %v228_v21 = vld [vmem:[%s5533_s29 + $0x68] sm:$0xff]  ;;  %4794 = vmatprep.subr.msk.mxu1 %vm484_vm0, %v5547_v11 }
  0x1a   : > { %275 = vst.msk [vmem:[#allocation2 + $0x59] sm:$0x1] %vm256_vm2, %v5419_v1  ;;  %276 = vst.msk [vmem:[#allocation2 + $0x71] sm:$0x1] %vm256_vm2, %v5419_v1  ;;  %v229_v22 = vld [vmem:[%s5533_s29 + $0x70] sm:$0xff]  ;;  %v230_v23 = vld [vmem:[%s5533_s29 + $0x78] sm:$0xff] }
  0x1b   : > { %277 = vst.msk [vmem:[#allocation2 + $0x89] sm:$0x1] %vm256_vm2, %v5419_v1  ;;  %278 = vst.msk [vmem:[#allocation2 + $0xa1] sm:$0x1] %vm256_vm2, %v5419_v1  ;;  %v231_v24 = vld [vmem:[%s5533_s29 + $0x80] sm:$0xff]  ;;  %v232_v25 = vld [vmem:[%s5533_s29 + $0x88] sm:$0xff] }
  0x1c   : > { %279 = vst.msk [vmem:[#allocation2 + $0xb9] sm:$0x1] %vm256_vm2, %v5419_v1  ;;  %280 = vst.msk [vmem:[#allocation2 + $0xd1] sm:$0x1] %vm256_vm2, %v5419_v1  ;;  %v233_v26 = vld [vmem:[%s5533_s29 + $0x90] sm:$0xff]  ;;  %v234_v27 = vld [vmem:[%s5533_s29 + $0x98] sm:$0xff] }
  0x1d   : > { %281 = vst.msk [vmem:[#allocation2 + $0xe9] sm:$0x1] %vm256_vm2, %v5419_v1  ;;  %282 = vst.msk [vmem:[#allocation2 + $0x101] sm:$0x1] %vm256_vm2, %v5419_v1  ;;  %v235_v28 = vld [vmem:[%s5533_s29 + $0xa0] sm:$0xff]  ;;  %v236_v29 = vld [vmem:[%s5533_s29 + $0xa8] sm:$0xff] }
  0x1e   : > { %283 = vst.msk [vmem:[#allocation2 + $0x119] sm:$0x1] %vm256_vm2, %v5419_v1  ;;  %284 = vst.msk [vmem:[#allocation2 + $0x131] sm:$0x1] %vm256_vm2, %v5419_v1  ;;  %v237_v38 = vld [vmem:[%s5533_s29 + $0xb0] sm:$0xff]  ;;  %v238_v39 = vld [vmem:[%s5533_s29 + $0xb8] sm:$0xff] }
  0x1f   : > { %285 = vst.msk [vmem:[#allocation2 + $0x149] sm:$0x1] %vm256_vm2, %v5419_v1  ;;  %286 = vst.msk [vmem:[#allocation2 + $0x161] sm:$0x1] %vm256_vm2, %v5419_v1  ;;  %v239_v40 = vld [vmem:[%s5533_s29 + $0xc0] sm:$0xff]  ;;  %v240_v42 = vld [vmem:[%s5533_s29 + $0xc8] sm:$0xff] }
  0x20   : > { %287 = vst.msk [vmem:[#allocation2 + $0x179] sm:$0x1] %vm256_vm2, %v5419_v1  ;;  %288 = vst.msk [vmem:[#allocation2 + $0x191] sm:$0x1] %vm256_vm2, %v5419_v1  ;;  %v241_v44 = vld [vmem:[%s5533_s29 + $0xd0] sm:$0xff]  ;;  %v242_v45 = vld [vmem:[%s5533_s29 + $0xd8] sm:$0xff] }
  0x21   : > { %289 = vst.msk [vmem:[#allocation2 + $0x19] sm:$0xff] %vm247_vm1, %v215_v5  ;;  %290 = vst.msk [vmem:[#allocation2 + $0x21] sm:$0xff] %vm247_vm1, %v216_v6  ;;  %v243_v46 = vld [vmem:[%s5533_s29 + $0xe0] sm:$0xff]  ;;  %v244_v47 = vld [vmem:[%s5533_s29 + $0xe8] sm:$0xff]  ;;  %vm3838_vm4 = vcmask 57344  }
  0x22   : > { %291 = vst.msk [vmem:[#allocation2 + $0x31] sm:$0xff] %vm247_vm1, %v217_v7  ;;  %292 = vst.msk [vmem:[#allocation2 + $0x39] sm:$0xff] %vm247_vm1, %v218_v8  ;;  %v245_v57 = vld [vmem:[%s5533_s29 + $0xf0] sm:$0xff]  ;;  %v246_v58 = vld [vmem:[%s5533_s29 + $0xf8] sm:$0xff] }
  0x23   : > { %293 = vst.msk [vmem:[#allocation2 + $0x49] sm:$0xff] %vm247_vm1, %v219_v9  ;;  %294 = vst.msk [vmem:[#allocation2 + $0x51] sm:$0xff] %vm247_vm1, %v220_v10  ;;  %v5726_v63 = vld [vmem:[%s6569_s1 + $0x1c] sm:$0xf] }
  0x24   : > { %295 = vst.msk [vmem:[#allocation2 + $0x61] sm:$0xff] %vm247_vm1, %v221_v14  ;;  %296 = vst.msk [vmem:[#allocation2 + $0x69] sm:$0xff] %vm247_vm1, %v222_v15 }
  0x25   : > { %297 = vst.msk [vmem:[#allocation2 + $0x79] sm:$0xff] %vm247_vm1, %v223_v16  ;;  %298 = vst.msk [vmem:[#allocation2 + $0x81] sm:$0xff] %vm247_vm1, %v224_v17 }
  0x26   : > { %299 = vst.msk [vmem:[#allocation2 + $0x91] sm:$0xff] %vm247_vm1, %v225_v18  ;;  %300 = vst.msk [vmem:[#allocation2 + $0x99] sm:$0xff] %vm247_vm1, %v226_v19 }
  0x27   : > { %301 = vst.msk [vmem:[#allocation2 + $0xa9] sm:$0xff] %vm247_vm1, %v227_v20  ;;  %302 = vst.msk [vmem:[#allocation2 + $0xb1] sm:$0xff] %vm247_vm1, %v228_v21 }
  0x28   : > { %303 = vst.msk [vmem:[#allocation2 + $0xc1] sm:$0xff] %vm247_vm1, %v229_v22  ;;  %304 = vst.msk [vmem:[#allocation2 + $0xc9] sm:$0xff] %vm247_vm1, %v230_v23  ;;  %v356_v30 = vld [vmem:[#allocation2 + $0x19] sm:$0xff]  ;;  %v357_v31 = vld [vmem:[#allocation2 + $0x21] sm:$0xff] }
  0x29   : > { %305 = vst.msk [vmem:[#allocation2 + $0xd9] sm:$0xff] %vm247_vm1, %v231_v24  ;;  %306 = vst.msk [vmem:[#allocation2 + $0xe1] sm:$0xff] %vm247_vm1, %v232_v25  ;;  %v5587_v32 = vld [vmem:[#allocation2 + $0x31] sm:$0xff]  ;;  %4699 = vmatprep.mubr.msk.f32.mxu1 %vm247_vm1, %v356_v30  ;;  %4896 = vmatprep.mubr.msk.f32.mxu0 %vm247_vm1, %v356_v30  ;;  %v5605_v34 = vld [vmem:[#allocation2 + $0x39] sm:$0xff] }
  0x2a   : > { %307 = vst.msk [vmem:[#allocation2 + $0xf1] sm:$0xff] %vm247_vm1, %v233_v26  ;;  %308 = vst.msk [vmem:[#allocation2 + $0xf9] sm:$0xff] %vm247_vm1, %v234_v27  ;;  %4700 = vmatmul.mubr.msk.f32.gmra.mrb[2].mxu1 %vm247_vm1, %v357_v31  ;;  %4897 = vmatmul.mubr.msk.f32.vlgmr.msra.gmra.mrb[0].mxu0 %vm247_vm1, %v357_v31  ;;  %v5609_v35 = vld [vmem:[#allocation2 + $0x49] sm:$0xff]  ;;  %v5621_v36 = vld [vmem:[#allocation2 + $0x51] sm:$0xff] }
  0x2b   : > { %309 = vst.msk [vmem:[#allocation2 + $0x109] sm:$0xff] %vm247_vm1, %v235_v28  ;;  %310 = vst.msk [vmem:[#allocation2 + $0x111] sm:$0xff] %vm247_vm1, %v236_v29  ;;  %4945 = vmatpush3.msk.msra.mxu0 %vm484_vm0, %v5480_v4  ;;  %4702 = vmatprep.mubr.msk.f32.mxu1 %vm247_vm1, %v5587_v32  ;;  %v5623_v37 = vld [vmem:[#allocation2 + $0x61] sm:$0xff]  ;;  %v5637_v41 = vld [vmem:[#allocation2 + $0x69] sm:$0xff] }
  0x2c   : > { %4899 = vmatprep.mubr.msk.f32.mxu0 %vm247_vm1, %v5587_v32  ;;  %4994 = vmatprep.subr.msk.mxu0 %vm484_vm0, %v5597_v33  ;;  %311 = vst.msk [vmem:[#allocation2 + $0x121] sm:$0xff] %vm247_vm1, %v237_v38  ;;  %312 = vst.msk [vmem:[#allocation2 + $0x129] sm:$0xff] %vm247_vm1, %v238_v39  ;;  %v5642_v43 = vld [vmem:[#allocation2 + $0x79] sm:$0xff]  ;;  %v5660_v48 = vld [vmem:[#allocation2 + $0x81] sm:$0xff] }
  0x2d   : > { %313 = vst.msk [vmem:[#allocation2 + $0x139] sm:$0xff] %vm247_vm1, %v239_v40  ;;  %314 = vst.msk [vmem:[#allocation2 + $0x141] sm:$0xff] %vm247_vm1, %v240_v42  ;;  %v5663_v49 = vld [vmem:[#allocation2 + $0x91] sm:$0xff]  ;;  %v5673_v50 = vld [vmem:[#allocation2 + $0x99] sm:$0xff] }
  0x2e   : > { %4703 = vmatmul.mubr.msk.f32.gmra.mrb[4].mxu1 %vm247_vm1, %v5605_v34  ;;  %4900 = vmatmul.mubr.msk.f32.gmra.mrb[2].mxu0 %vm247_vm1, %v5605_v34  ;;  %315 = vst.msk [vmem:[#allocation2 + $0x151] sm:$0xff] %vm247_vm1, %v241_v44  ;;  %316 = vst.msk [vmem:[#allocation2 + $0x159] sm:$0xff] %vm247_vm1, %v242_v45  ;;  %v5675_v51 = vld [vmem:[#allocation2 + $0xa9] sm:$0xff]  ;;  %v5685_v52 = vld [vmem:[#allocation2 + $0xb1] sm:$0xff] }
  0x2f   : > { %4705 = vmatprep.mubr.msk.f32.mxu1 %vm247_vm1, %v5609_v35  ;;  %4902 = vmatprep.mubr.msk.f32.mxu0 %vm247_vm1, %v5609_v35  ;;  %317 = vst.msk [vmem:[#allocation2 + $0x169] sm:$0xff] %vm247_vm1, %v243_v46  ;;  %318 = vst.msk [vmem:[#allocation2 + $0x171] sm:$0xff] %vm247_vm1, %v244_v47  ;;  %v5687_v53 = vld [vmem:[#allocation2 + $0xc1] sm:$0xff]  ;;  %v5697_v54 = vld [vmem:[#allocation2 + $0xc9] sm:$0xff] }
  0x30   : > { %6618 = vst [vmem:[#allocation3_spill] sm:$0xff] %v5697_v54  ;;  %v5699_v55 = vld [vmem:[#allocation2 + $0x1a] sm:$0xff]  ;;  %319 = vst.msk [vmem:[#allocation2 + $0x181] sm:$0xff] %vm247_vm1, %v245_v57  ;;  %v5717_v60 = vld [vmem:[#allocation2 + $0x22] sm:$0xff] }
  0x31   : > { %v5701_v56 = vld [vmem:[#allocation2 + $0xd9] sm:$0xff]  ;;  %320 = vst.msk [vmem:[#allocation2 + $0x189] sm:$0xff] %vm247_vm1, %v246_v58  ;;  %v5715_v59 = vld [vmem:[#allocation2 + $0xe1] sm:$0xff]  ;;  %v5719_v61 = vld [vmem:[#allocation2 + $0xf1] sm:$0xff] }
  0x32   : > { %4706 = vmatmul.mubr.msk.f32.gmra.mrb[6].mxu1 %vm247_vm1, %v5621_v36  ;;  %4903 = vmatmul.mubr.msk.f32.gmra.mrb[4].mxu0 %vm247_vm1, %v5621_v36  ;;  %6619 = vst [vmem:[#allocation4_spill] sm:$0xff] %v5701_v56  ;;  %6620 = vst [vmem:[#allocation5_spill] sm:$0xff] %v5715_v59  ;;  %v5721_v62 = vld [vmem:[#allocation2 + $0x32] sm:$0xff]  ;;  %v5738_v1 = vld [vmem:[#allocation2 + $0x3a] sm:$0xff] }
  0x33   : > { %4708 = vmatprep.mubr.msk.f32.mxu1 %vm247_vm1, %v5623_v37  ;;  %4905 = vmatprep.mubr.msk.f32.mxu0 %vm247_vm1, %v5623_v37  ;;  %6621 = vst [vmem:[#allocation6_spill] sm:$0xff] %v5719_v61  ;;  %v5736_v0 = vld [vmem:[#allocation2 + $0xf9] sm:$0xff]  ;;  %v5742_v3 = vld [vmem:[#allocation2 + $0x109] sm:$0xff]  ;;  %v5756_v5 = vld [vmem:[#allocation2 + $0x111] sm:$0xff] }
  0x34   : > { %6622 = vst [vmem:[#allocation7_spill] sm:$0xff] %v5736_v0  ;;  %6623 = vst [vmem:[#allocation8_spill] sm:$0xff] %v5742_v3  ;;  %v5744_v4 = vld [vmem:[#allocation2 + $0x4a] sm:$0xff]  ;;  %v5758_v6 = vld [vmem:[#allocation2 + $0x52] sm:$0xff] }
  0x35   : > { %6624 = vst [vmem:[#allocation9_spill] sm:$0xff] %v5756_v5  ;;  %v5760_v7 = vld [vmem:[#allocation2 + $0x121] sm:$0xff]  ;;  %v5772_v9 = vld [vmem:[#allocation2 + $0x129] sm:$0xff]  ;;  %v5776_v12 = vld [vmem:[#allocation2 + $0x139] sm:$0xff] }
  0x36   : > { %4709 = vmatmul.mubr.msk.f32.gmra.mrb[8].mxu1 %vm247_vm1, %v5637_v41  ;;  %4906 = vmatmul.mubr.msk.f32.gmra.mrb[6].mxu0 %vm247_vm1, %v5637_v41  ;;  %6625 = vst [vmem:[#allocation10_spill] sm:$0xff] %v5760_v7  ;;  %v5762_v8 = vld [vmem:[#allocation2 + $0x62] sm:$0xff]  ;;  %6626 = vst [vmem:[#allocation11_spill] sm:$0xff] %v5772_v9  ;;  %v5774_v10 = vld [vmem:[#allocation2 + $0x6a] sm:$0xff] }
  0x37   : > { %4711 = vmatprep.mubr.msk.f32.mxu1 %vm247_vm1, %v5642_v43  ;;  %4908 = vmatprep.mubr.msk.f32.mxu0 %vm247_vm1, %v5642_v43  ;;  %6627 = vst [vmem:[#allocation12_spill] sm:$0xff] %v5776_v12  ;;  %v5778_v13 = vld [vmem:[#allocation2 + $0x7a] sm:$0xff]  ;;  %v5790_v15 = vld [vmem:[#allocation2 + $0x82] sm:$0xff]  ;;  %v5792_v16 = vld [vmem:[#allocation2 + $0x151] sm:$0xff] }
  0x38   : > { %v5788_v14 = vld [vmem:[#allocation2 + $0x141] sm:$0xff]  ;;  %6629 = vst [vmem:[#allocation14_spill] sm:$0xff] %v5792_v16  ;;  %v5794_v17 = vld [vmem:[#allocation2 + $0x92] sm:$0xff]  ;;  %v5808_v20 = vld [vmem:[#allocation2 + $0x169] sm:$0xff] }
  0x39   : > { %6628 = vst [vmem:[#allocation13_spill] sm:$0xff] %v5788_v14  ;;  %v5804_v18 = vld [vmem:[#allocation2 + $0x159] sm:$0xff]  ;;  %6631 = vst [vmem:[#allocation16_spill] sm:$0xff] %v5808_v20  ;;  %v5810_v21 = vld [vmem:[#allocation2 + $0xaa] sm:$0xff] }
  0x3a   : > { %4712 = vmatmul.mubr.msk.f32.gmra.mrb[10].mxu1 %vm247_vm1, %v5660_v48  ;;  %4909 = vmatmul.mubr.msk.f32.gmra.mrb[8].mxu0 %vm247_vm1, %v5660_v48  ;;  %6630 = vst [vmem:[#allocation15_spill] sm:$0xff] %v5804_v18  ;;  %v5806_v19 = vld [vmem:[#allocation2 + $0x9a] sm:$0xff]  ;;  %v5820_v22 = vld [vmem:[#allocation2 + $0x171] sm:$0xff]  ;;  %v5824_v25 = vld [vmem:[#allocation2 + $0xc2] sm:$0xff] }
  0x3b   : > { %4714 = vmatprep.mubr.msk.f32.mxu1 %vm247_vm1, %v5663_v49  ;;  %4911 = vmatprep.mubr.msk.f32.mxu0 %vm247_vm1, %v5663_v49  ;;  %6632 = vst [vmem:[#allocation17_spill] sm:$0xff] %v5820_v22  ;;  %v5822_v23 = vld [vmem:[#allocation2 + $0xb2] sm:$0xff]  ;;  %v321_v24 = vld [vmem:[#allocation2] sm:$0xff]  ;;  %v322_v26 = vld [vmem:[#allocation2 + $0x8] sm:$0xff] }
  0x3c   : > { %v5833_v27 = vld [vmem:[#allocation2 + $0xca] sm:$0xff]  ;;  %v5835_v28 = vld [vmem:[#allocation2 + $0x18] sm:$0xff]  ;;  %v5851_v31 = vld [vmem:[#allocation2 + $0x20] sm:$0xff] }
  0x3d   : > { %6633 = vst [vmem:[#allocation18_spill] sm:$0xff] %v5835_v28  ;;  %v5837_v29 = vld [vmem:[#allocation2 + $0xda] sm:$0xff]  ;;  %v5845_v30 = vld [vmem:[%s6569_s1 + $0xc] sm:$0xf]  ;;  %6634 = vst [vmem:[#allocation19_spill] sm:$0xff] %v5851_v31 }
  0x3e   : > { %4715 = vmatmul.mubr.msk.f32.gmra.mrb[12].mxu1 %vm247_vm1, %v5673_v50  ;;  %4912 = vmatmul.mubr.msk.f32.gmra.mrb[10].mxu0 %vm247_vm1, %v5673_v50  ;;  %v5857_v38 = vld [vmem:[#allocation2 + $0x30] sm:$0xff]  ;;  %v5873_v40 = vld [vmem:[#allocation2 + $0xfa] sm:$0xff]  ;;  %v5875_v42 = vld [vmem:[#allocation2 + $0x48] sm:$0xff] }
  0x3f   : > { %4717 = vmatprep.mubr.msk.f32.mxu1 %vm247_vm1, %v5675_v51  ;;  %4914 = vmatprep.mubr.msk.f32.mxu0 %vm247_vm1, %v5675_v51  ;;  %6635 = vst [vmem:[#allocation20_spill] sm:$0xff] %v5857_v38  ;;  %v5859_v39 = vld [vmem:[#allocation2 + $0xf2] sm:$0xff]  ;;  %6637 = vst [vmem:[#allocation22_spill] sm:$0xff] %v5875_v42  ;;  %v5877_v44 = vld [vmem:[#allocation2 + $0x10a] sm:$0xff] }
  0x40   : > { %v5887_v45 = vld [vmem:[#allocation2 + $0x50] sm:$0xff]  ;;  %v5891_v47 = vld [vmem:[#allocation2 + $0x60] sm:$0xff]  ;;  %v5903_v58 = vld [vmem:[#allocation2 + $0x68] sm:$0xff] }
  0x41   : > { %6638 = vst [vmem:[#allocation23_spill] sm:$0xff] %v5887_v45  ;;  %v5889_v46 = vld [vmem:[#allocation2 + $0x112] sm:$0xff]  ;;  %6639 = vst [vmem:[#allocation24_spill] sm:$0xff] %v5891_v47  ;;  %v5893_v57 = vld [vmem:[#allocation2 + $0x122] sm:$0xff] }
  0x42   : > { %4718 = vmatmul.mubr.msk.f32.gmra.mrb[14].mxu1 %vm247_vm1, %v5685_v52  ;;  %4915 = vmatmul.mubr.msk.f32.gmra.mrb[12].mxu0 %vm247_vm1, %v5685_v52  ;;  %6640 = vst [vmem:[#allocation25_spill] sm:$0xff] %v5903_v58 }
  0x43   : > { %4720 = vmatprep.mubr.msk.f32.mxu1 %vm247_vm1, %v5687_v53  ;;  %4917 = vmatprep.mubr.msk.f32.mxu0 %vm247_vm1, %v5687_v53 }
  0x46   : > { %4721 = vmatmul.mubr.msk.f32.gmra.mrb[16].mxu1 %vm247_vm1, %v5697_v54  ;;  %4918 = vmatmul.mubr.msk.f32.gmra.mrb[14].mxu0 %vm247_vm1, %v5697_v54  ;;  %v5981_v54 = vld [vmem:[#allocation2 + $0xe0] sm:$0xff] }
  0x47   : > { %4723 = vmatprep.mubr.msk.f32.mxu1 %vm247_vm1, %v5701_v56  ;;  %4946 = vmatprep.mubr.msk.f32.mxu0 %vm247_vm1, %v5699_v55  ;;  %v5969_v56 = vld [vmem:[#allocation2 + $0x18a] sm:$0xff] }
  0x48   : > { %6648 = vst [vmem:[#allocation33_spill] sm:$0xff] %v5969_v56 }
  0x4a   : > { %4724 = vmatmul.mubr.msk.f32.gmra.mrb[18].mxu1 %vm247_vm1, %v5715_v59  ;;  %4947 = vmatmul.mubr.msk.f32.vlgmr.msra.gmra.mrb[0].mxu0 %vm247_vm1, %v5717_v60  ;;  %v5957_v59 = vld [vmem:[#allocation2 + $0x182] sm:$0xff] }
  0x4b   : > { %4995 = vmatpush3.msk.msra.mxu0 %vm484_vm0, %v5597_v33  ;;  %4726 = vmatprep.mubr.msk.f32.mxu1 %vm247_vm1, %v5719_v61  ;;  %v5853_v33 = vld [vmem:[#allocation2 + $0xe2] sm:$0xff]  ;;  %6647 = vst [vmem:[#allocation32_spill] sm:$0xff] %v5957_v59 }
  0x4c   : > { %4949 = vmatprep.mubr.msk.f32.mxu0 %vm247_vm1, %v5721_v62  ;;  %5044 = vmatprep.subr.msk.mxu0 %vm484_vm0, %v5726_v63  ;;  %v5955_v61 = vld [vmem:[#allocation2 + $0xc0] sm:$0xff] }
  0x4e   : > { %4727 = vmatmul.mubr.msk.f32.gmra.mrb[20].mxu1 %vm247_vm1, %v5736_v0  ;;  %4950 = vmatmul.mubr.msk.f32.gmra.mrb[2].mxu0 %vm247_vm1, %v5738_v1  ;;  %v5953_v0 = vld [vmem:[#allocation2 + $0x172] sm:$0xff] }
  0x4f   : > { %4729 = vmatprep.mubr.msk.f32.mxu1 %vm247_vm1, %v5742_v3  ;;  %4952 = vmatprep.mubr.msk.f32.mxu0 %vm247_vm1, %v5744_v4  ;;  %v5951_v3 = vld [vmem:[#allocation2 + $0xb0] sm:$0xff]  ;;  %6646 = vst [vmem:[#allocation31_spill] sm:$0xff] %v5953_v0 }
  0x50   : > { %6645 = vst [vmem:[#allocation30_spill] sm:$0xff] %v5951_v3 }
  0x52   : > { %4730 = vmatmul.mubr.msk.f32.gmra.mrb[22].mxu1 %vm247_vm1, %v5756_v5  ;;  %4953 = vmatmul.mubr.msk.f32.gmra.mrb[4].mxu0 %vm247_vm1, %v5758_v6  ;;  %v5941_v5 = vld [vmem:[#allocation2 + $0x16a] sm:$0xff] }
  0x53   : > { %4732 = vmatprep.mubr.msk.f32.mxu1 %vm247_vm1, %v5760_v7  ;;  %4955 = vmatprep.mubr.msk.f32.mxu0 %vm247_vm1, %v5762_v8  ;;  %v5939_v7 = vld [vmem:[#allocation2 + $0xa8] sm:$0xff] }
  0x56   : > { %4733 = vmatmul.mubr.msk.f32.gmra.mrb[24].mxu1 %vm247_vm1, %v5772_v9  ;;  %4956 = vmatmul.mubr.msk.f32.gmra.mrb[6].mxu0 %vm247_vm1, %v5774_v10  ;;  %v5937_v9 = vld [vmem:[#allocation2 + $0x15a] sm:$0xff] }
  0x57   : > { %4735 = vmatprep.mubr.msk.f32.mxu1 %vm247_vm1, %v5776_v12  ;;  %4958 = vmatprep.mubr.msk.f32.mxu0 %vm247_vm1, %v5778_v13  ;;  %v5935_v12 = vld [vmem:[#allocation2 + $0x98] sm:$0xff] }
  0x58   : > { %6644 = vst [vmem:[#allocation29_spill] sm:$0xff] %v5935_v12 }
  0x5a   : > { %4736 = vmatmul.mubr.msk.f32.gmra.mrb[26].mxu1 %vm247_vm1, %v5788_v14  ;;  %4959 = vmatmul.mubr.msk.f32.gmra.mrb[8].mxu0 %vm247_vm1, %v5790_v15  ;;  %v5925_v14 = vld [vmem:[#allocation2 + $0x152] sm:$0xff] }
  0x5b   : > { %4738 = vmatprep.mubr.msk.f32.mxu1 %vm247_vm1, %v5792_v16  ;;  %4961 = vmatprep.mubr.msk.f32.mxu0 %vm247_vm1, %v5794_v17  ;;  %v5923_v16 = vld [vmem:[#allocation2 + $0x90] sm:$0xff] }
  0x5c   : > { %6643 = vst [vmem:[#allocation28_spill] sm:$0xff] %v5923_v16 }
  0x5e   : > { %4739 = vmatmul.mubr.msk.f32.gmra.mrb[28].mxu1 %vm247_vm1, %v5804_v18  ;;  %4962 = vmatmul.mubr.msk.f32.gmra.mrb[10].mxu0 %vm247_vm1, %v5806_v19  ;;  %v5921_v18 = vld [vmem:[#allocation2 + $0x142] sm:$0xff] }
  0x5f   : > { %4741 = vmatprep.mubr.msk.f32.mxu1 %vm247_vm1, %v5808_v20  ;;  %4964 = vmatprep.mubr.msk.f32.mxu0 %vm247_vm1, %v5810_v21  ;;  %v5919_v20 = vld [vmem:[#allocation2 + $0x80] sm:$0xff] }
  0x60   : > { %6642 = vst [vmem:[#allocation27_spill] sm:$0xff] %v5919_v20 }
  0x62   : > { %4742 = vmatmul.mubr.msk.f32.gmra.mrb[30].mxu1 %vm247_vm1, %v5820_v22  ;;  %4965 = vmatmul.mubr.msk.f32.gmra.mrb[12].mxu0 %vm247_vm1, %v5822_v23  ;;  %v5909_v22 = vld [vmem:[#allocation2 + $0x13a] sm:$0xff] }
  0x63   : > { %4746 = vmatprep.mubr.msk.f32.mxu1 %vm247_vm1, %v321_v24  ;;  %4967 = vmatprep.mubr.msk.f32.mxu0 %vm247_vm1, %v5824_v25  ;;  %v5905_v24 = vld [vmem:[#allocation2 + $0x12a] sm:$0xff] }
  0x66   : > { %4747 = vmatmul.mubr.msk.f32.vlgmr.msra.gmra.mrb[0].mxu1 %vm247_vm1, %v322_v26  ;;  %4968 = vmatmul.mubr.msk.f32.gmra.mrb[14].mxu0 %vm247_vm1, %v5833_v27  ;;  %v5907_v26 = vld [vmem:[#allocation2 + $0x78] sm:$0xff] }
  0x67   : > { %4749 = vmatprep.mubr.msk.f32.mxu1 %vm247_vm1, %v5835_v28  ;;  %4970 = vmatprep.mubr.msk.f32.mxu0 %vm247_vm1, %v5837_v29  ;;  %6641 = vst [vmem:[#allocation26_spill] sm:$0xff] %v5907_v26  ;;  %v5971_v28 = vld [vmem:[#allocation2 + $0xd8] sm:$0xff] }
  0x68   : > { %4795 = vmatpush3.msk.msra.mxu1 %vm484_vm0, %v5547_v11  ;;  %v5871_v11 = vld [vmem:[#allocation2 + $0x38] sm:$0xff] }
  0x69   : > { %4844 = vmatprep.subr.msk.mxu1 %vm484_vm0, %v5845_v30  ;;  %6636 = vst [vmem:[#allocation21_spill] sm:$0xff] %v5871_v11 }
  0x6a   : > { %4750 = vmatmul.mubr.msk.f32.gmra.mrb[2].mxu1 %vm247_vm1, %v5851_v31  ;;  %4971 = vmatmul.mubr.msk.f32.gmra.mrb[16].mxu0 %vm247_vm1, %v5853_v33  ;;  %v5967_v31 = vld [vmem:[#allocation2 + $0xc8] sm:$0xff] }
  0x6b   : > { %4752 = vmatprep.mubr.msk.f32.mxu1 %vm247_vm1, %v5857_v38  ;;  %4973 = vmatprep.mubr.msk.f32.mxu0 %vm247_vm1, %v5859_v39 }
  0x6e   : > { %4753 = vmatmul.mubr.msk.f32.gmra.mrb[4].mxu1 %vm247_vm1, %v5871_v11  ;;  %4974 = vmatmul.mubr.msk.f32.gmra.mrb[18].mxu0 %vm247_vm1, %v5873_v40 }
  0x6f   : > { %4755 = vmatprep.mubr.msk.f32.mxu1 %vm247_vm1, %v5875_v42  ;;  %4976 = vmatprep.mubr.msk.f32.mxu0 %vm247_vm1, %v5877_v44 }
  0x72   : > { %4756 = vmatmul.mubr.msk.f32.gmra.mrb[6].mxu1 %vm247_vm1, %v5887_v45  ;;  %4977 = vmatmul.mubr.msk.f32.gmra.mrb[20].mxu0 %vm247_vm1, %v5889_v46 }
  0x73   : > { %4758 = vmatprep.mubr.msk.f32.mxu1 %vm247_vm1, %v5891_v47  ;;  %4979 = vmatprep.mubr.msk.f32.mxu0 %vm247_vm1, %v5893_v57 }
  0x76   : > { %4759 = vmatmul.mubr.msk.f32.gmra.mrb[8].mxu1 %vm247_vm1, %v5903_v58  ;;  %4980 = vmatmul.mubr.msk.f32.gmra.mrb[22].mxu0 %vm247_vm1, %v5905_v24 }
  0x77   : > { %4761 = vmatprep.mubr.msk.f32.mxu1 %vm247_vm1, %v5907_v26  ;;  %4982 = vmatprep.mubr.msk.f32.mxu0 %vm247_vm1, %v5909_v22 }
  0x7a   : > { %4762 = vmatmul.mubr.msk.f32.gmra.mrb[10].mxu1 %vm247_vm1, %v5919_v20  ;;  %4983 = vmatmul.mubr.msk.f32.gmra.mrb[24].mxu0 %vm247_vm1, %v5921_v18 }
  0x7b   : > { %4764 = vmatprep.mubr.msk.f32.mxu1 %vm247_vm1, %v5923_v16  ;;  %4985 = vmatprep.mubr.msk.f32.mxu0 %vm247_vm1, %v5925_v14 }
  0x7e   : > { %4765 = vmatmul.mubr.msk.f32.gmra.mrb[12].mxu1 %vm247_vm1, %v5935_v12  ;;  %4986 = vmatmul.mubr.msk.f32.gmra.mrb[26].mxu0 %vm247_vm1, %v5937_v9 }
  0x7f   : > { %4767 = vmatprep.mubr.msk.f32.mxu1 %vm247_vm1, %v5939_v7  ;;  %4988 = vmatprep.mubr.msk.f32.mxu0 %vm247_vm1, %v5941_v5 }
  0x82   : > { %4768 = vmatmul.mubr.msk.f32.gmra.mrb[14].mxu1 %vm247_vm1, %v5951_v3  ;;  %4989 = vmatmul.mubr.msk.f32.gmra.mrb[28].mxu0 %vm247_vm1, %v5953_v0  ;;  %v5988_v0 = vld [vmem:[%s6569_s1 + $0x20] sm:$0xf] }
  0x83   : > { %4770 = vmatprep.mubr.msk.f32.mxu1 %vm247_vm1, %v5955_v61  ;;  %4991 = vmatprep.mubr.msk.f32.mxu0 %vm247_vm1, %v5957_v59  ;;  %v5983_v59 = vld [vmem:[#allocation2 + $0xf0] sm:$0xff] }
  0x86   : > { %4771 = vmatmul.mubr.msk.f32.gmra.mrb[16].mxu1 %vm247_vm1, %v5967_v31  ;;  %4992 = vmatmul.mubr.msk.f32.gmra.mrb[30].mxu0 %vm247_vm1, %v5969_v56  ;;  %v5998_v56 = vld [vmem:[#allocation2 + $0xf8] sm:$0xff] }
  0x87   : > { %4773 = vmatprep.mubr.msk.f32.mxu1 %vm247_vm1, %v5971_v28  ;;  %4996 = vmatprep.mubr.msk.f32.mxu0 %vm247_vm1, %v5857_v38  ;;  %v6002_v38 = vld [vmem:[#allocation2 + $0x108] sm:$0xff] }
  0x8a   : > { %4774 = vmatmul.mubr.msk.f32.gmra.mrb[18].mxu1 %vm247_vm1, %v5981_v54  ;;  %4997 = vmatmul.mubr.msk.f32.vlgmr.msra.gmra.mrb[0].mxu0 %vm247_vm1, %v5871_v11  ;;  %v6028_v11 = vld [vmem:[#allocation2 + $0x138] sm:$0xff] }
  0x8b   : > { %5045 = vmatpush3.msk.msra.mxu0 %vm484_vm0, %v5726_v63  ;;  %4776 = vmatprep.mubr.msk.f32.mxu1 %vm247_vm1, %v5983_v59  ;;  %v6014_v63 = vld [vmem:[#allocation2 + $0x110] sm:$0xff] }
  0x8c   : > { %4999 = vmatprep.mubr.msk.f32.mxu0 %vm247_vm1, %v5875_v42  ;;  %5094 = vmatprep.subr.msk.mxu0 %vm484_vm0, %v5988_v0  ;;  %v6016_v42 = vld [vmem:[#allocation2 + $0x120] sm:$0xff] }
  0x8e   : > { %4777 = vmatmul.mubr.msk.f32.gmra.mrb[20].mxu1 %vm247_vm1, %v5998_v56  ;;  %5000 = vmatmul.mubr.msk.f32.gmra.mrb[2].mxu0 %vm247_vm1, %v5887_v45  ;;  %v6026_v45 = vld [vmem:[#allocation2 + $0x128] sm:$0xff] }
  0x8f   : > { %4779 = vmatprep.mubr.msk.f32.mxu1 %vm247_vm1, %v6002_v38  ;;  %5002 = vmatprep.mubr.msk.f32.mxu0 %vm247_vm1, %v5891_v47  ;;  %v6040_v47 = vld [vmem:[#allocation2 + $0x150] sm:$0xff] }
  0x92   : > { %4780 = vmatmul.mubr.msk.f32.gmra.mrb[22].mxu1 %vm247_vm1, %v6014_v63  ;;  %5003 = vmatmul.mubr.msk.f32.gmra.mrb[4].mxu0 %vm247_vm1, %v5903_v58  ;;  %v6038_v58 = vld [vmem:[#allocation2 + $0x140] sm:$0xff] }
  0x93   : > { %4782 = vmatprep.mubr.msk.f32.mxu1 %vm247_vm1, %v6016_v42  ;;  %5005 = vmatprep.mubr.msk.f32.mxu0 %vm247_vm1, %v5907_v26  ;;  %v6052_v26 = vld [vmem:[#allocation2 + $0x168] sm:$0xff] }
  0x96   : > { %4783 = vmatmul.mubr.msk.f32.gmra.mrb[24].mxu1 %vm247_vm1, %v6026_v45  ;;  %5006 = vmatmul.mubr.msk.f32.gmra.mrb[6].mxu0 %vm247_vm1, %v5919_v20  ;;  %v6050_v20 = vld [vmem:[#allocation2 + $0x158] sm:$0xff] }
  0x97   : > { %4785 = vmatprep.mubr.msk.f32.mxu1 %vm247_vm1, %v6028_v11  ;;  %5008 = vmatprep.mubr.msk.f32.mxu0 %vm247_vm1, %v5923_v16  ;;  %v1037_v16 = vld [vmem:[#allocation2 + $0x2] sm:$0xff] }
  0x9a   : > { %4786 = vmatmul.mubr.msk.f32.gmra.mrb[26].mxu1 %vm247_vm1, %v6038_v58  ;;  %5009 = vmatmul.mubr.msk.f32.gmra.mrb[8].mxu0 %vm247_vm1, %v5935_v12  ;;  %v6062_v12 = vld [vmem:[#allocation2 + $0x170] sm:$0xff] }
  0x9b   : > { %4788 = vmatprep.mubr.msk.f32.mxu1 %vm247_vm1, %v6040_v47  ;;  %5011 = vmatprep.mubr.msk.f32.mxu0 %vm247_vm1, %v5939_v7 }
  0x9e   : > { %4789 = vmatmul.mubr.msk.f32.gmra.mrb[28].mxu1 %vm247_vm1, %v6050_v20  ;;  %5012 = vmatmul.mubr.msk.f32.gmra.mrb[10].mxu0 %vm247_vm1, %v5951_v3  ;;  %v1038_v3 = vld [vmem:[#allocation2 + $0xa] sm:$0xff] }
  0x9f   : > { %4791 = vmatprep.mubr.msk.f32.mxu1 %vm247_vm1, %v6052_v26  ;;  %5014 = vmatprep.mubr.msk.f32.mxu0 %vm247_vm1, %v5955_v61 }
  0xa2   : > { %4792 = vmatmul.mubr.msk.f32.gmra.mrb[30].mxu1 %vm247_vm1, %v6062_v12  ;;  %5015 = vmatmul.mubr.msk.f32.gmra.mrb[12].mxu0 %vm247_vm1, %v5967_v31 }
  0xa3   : > { %4796 = vmatprep.mubr.msk.f32.mxu1 %vm247_vm1, %v1037_v16  ;;  %5017 = vmatprep.mubr.msk.f32.mxu0 %vm247_vm1, %v5971_v28  ;;  %v2629_v16 = vld [vmem:[#allocation2 + $0x1a0] sm:$0xff] }
  0xa6   : > { %4797 = vmatmul.mubr.msk.f32.vlgmr.msra.gmra.mrb[0].mxu1 %vm247_vm1, %v1038_v3  ;;  %5018 = vmatmul.mubr.msk.f32.gmra.mrb[14].mxu0 %vm247_vm1, %v5981_v54  ;;  %v2628_v3 = vld [vmem:[#allocation2 + $0x198] sm:$0xff] }
  0xa7   : > { %4799 = vmatprep.mubr.msk.f32.mxu1 %vm247_vm1, %v5699_v55  ;;  %5020 = vmatprep.mubr.msk.f32.mxu0 %vm247_vm1, %v5983_v59  ;;  %v6122_v55 = vld [vmem:[#allocation2 + $0x180] sm:$0xff] }
  0xa8   : > { %4845 = vmatpush3.msk.msra.mxu1 %vm484_vm0, %v5845_v30  ;;  %v6663_v30 = vld [vmem:[#allocation24_spill] sm:$0xff] }
  0xa9   : > { %5144 = vmatprep.subr.msk.mxu1 %vm484_vm0, %v5470_v2 }
  0xaa   : > { %4800 = vmatmul.mubr.msk.f32.gmra.mrb[2].mxu1 %vm247_vm1, %v5717_v60  ;;  %5021 = vmatmul.mubr.msk.f32.gmra.mrb[16].mxu0 %vm247_vm1, %v5998_v56  ;;  %v6132_v60 = vld [vmem:[#allocation2 + $0x188] sm:$0xff] }
  0xab   : > { %4802 = vmatprep.mubr.msk.f32.mxu1 %vm247_vm1, %v5721_v62  ;;  %5023 = vmatprep.mubr.msk.f32.mxu0 %vm247_vm1, %v6002_v38 }
  0xae   : > { %4803 = vmatmul.mubr.msk.f32.gmra.mrb[4].mxu1 %vm247_vm1, %v5738_v1  ;;  %5024 = vmatmul.mubr.msk.f32.gmra.mrb[18].mxu0 %vm247_vm1, %v6014_v63 }
  0xaf   : > { %4805 = vmatprep.mubr.msk.f32.mxu1 %vm247_vm1, %v5744_v4  ;;  %5026 = vmatprep.mubr.msk.f32.mxu0 %vm247_vm1, %v6016_v42 }
  0xb2   : > { %4806 = vmatmul.mubr.msk.f32.gmra.mrb[6].mxu1 %vm247_vm1, %v5758_v6  ;;  %5027 = vmatmul.mubr.msk.f32.gmra.mrb[20].mxu0 %vm247_vm1, %v6026_v45 }
  0xb3   : > { %4808 = vmatprep.mubr.msk.f32.mxu1 %vm247_vm1, %v5762_v8  ;;  %5029 = vmatprep.mubr.msk.f32.mxu0 %vm247_vm1, %v6028_v11 }
  0xb6   : > { %4809 = vmatmul.mubr.msk.f32.gmra.mrb[8].mxu1 %vm247_vm1, %v5774_v10  ;;  %5030 = vmatmul.mubr.msk.f32.gmra.mrb[22].mxu0 %vm247_vm1, %v6038_v58 }
  0xb7   : > { %4811 = vmatprep.mubr.msk.f32.mxu1 %vm247_vm1, %v5778_v13  ;;  %5032 = vmatprep.mubr.msk.f32.mxu0 %vm247_vm1, %v6040_v47 }
  0xba   : > { %4812 = vmatmul.mubr.msk.f32.gmra.mrb[10].mxu1 %vm247_vm1, %v5790_v15  ;;  %5033 = vmatmul.mubr.msk.f32.gmra.mrb[24].mxu0 %vm247_vm1, %v6050_v20 }
  0xbb   : > { %4814 = vmatprep.mubr.msk.f32.mxu1 %vm247_vm1, %v5794_v17  ;;  %5035 = vmatprep.mubr.msk.f32.mxu0 %vm247_vm1, %v6052_v26 }
  0xbe   : > { %4815 = vmatmul.mubr.msk.f32.gmra.mrb[12].mxu1 %vm247_vm1, %v5806_v19  ;;  %5036 = vmatmul.mubr.msk.f32.gmra.mrb[26].mxu0 %vm247_vm1, %v6062_v12 }
  0xbf   : > { %4817 = vmatprep.mubr.msk.f32.mxu1 %vm247_vm1, %v5810_v21  ;;  %5038 = vmatprep.mubr.msk.f32.mxu0 %vm247_vm1, %v6122_v55 }
  0xc2   : > { %4818 = vmatmul.mubr.msk.f32.gmra.mrb[14].mxu1 %vm247_vm1, %v5822_v23  ;;  %5039 = vmatmul.mubr.msk.f32.gmra.mrb[28].mxu0 %vm247_vm1, %v6132_v60 }
  0xc3   : > { %4820 = vmatprep.mubr.msk.f32.mxu1 %vm247_vm1, %v5824_v25  ;;  %5041 = vmatprep.mubr.msk.f32.mxu0 %vm247_vm1, %v2628_v3  ;;  %v6665_v3 = vld [vmem:[#allocation25_spill] sm:$0xff] }
  0xc6   : > { %4821 = vmatmul.mubr.msk.f32.gmra.mrb[16].mxu1 %vm247_vm1, %v5833_v27  ;;  %5042 = vmatmul.mubr.msk.f32.gmra.mrb[30].mxu0 %vm247_vm1, %v2629_v16  ;;  %v6666_v16 = vld [vmem:[#allocation11_spill] sm:$0xff] }
  0xc7   : > { %4823 = vmatprep.mubr.msk.f32.mxu1 %vm247_vm1, %v5837_v29  ;;  %5046 = vmatprep.mubr.msk.f32.mxu0 %vm247_vm1, %v5587_v32  ;;  %v6649_v32 = vld [vmem:[#allocation31_spill] sm:$0xff] }
  0xca   : > { %4824 = vmatmul.mubr.msk.f32.gmra.mrb[18].mxu1 %vm247_vm1, %v5853_v33  ;;  %5047 = vmatmul.mubr.msk.f32.vlgmr.msra.gmra.mrb[0].mxu0 %vm247_vm1, %v5605_v34  ;;  %v6650_v34 = vld [vmem:[#allocation3_spill] sm:$0xff] }
  0xcb   : > { %5095 = vmatpush3.msk.msra.mxu0 %vm484_vm0, %v5988_v0  ;;  %4826 = vmatprep.mubr.msk.f32.mxu1 %vm247_vm1, %v5859_v39  ;;  %v6662_v0 = vld [vmem:[#allocation9_spill] sm:$0xff] }
  0xcc   : > { %5049 = vmatprep.mubr.msk.f32.mxu0 %vm247_vm1, %v5609_v35  ;;  %v6651_v35 = vld [vmem:[#allocation18_spill] sm:$0xff] }
  0xce   : > { %4827 = vmatmul.mubr.msk.f32.gmra.mrb[20].mxu1 %vm247_vm1, %v5873_v40  ;;  %5050 = vmatmul.mubr.msk.f32.gmra.mrb[2].mxu0 %vm247_vm1, %v5621_v36  ;;  %v6652_v36 = vld [vmem:[#allocation4_spill] sm:$0xff] }
  0xcf   : > { %4829 = vmatprep.mubr.msk.f32.mxu1 %vm247_vm1, %v5877_v44  ;;  %5052 = vmatprep.mubr.msk.f32.mxu0 %vm247_vm1, %v5623_v37  ;;  %v6653_v37 = vld [vmem:[#allocation19_spill] sm:$0xff] }
  0xd2   : > { %4830 = vmatmul.mubr.msk.f32.gmra.mrb[22].mxu1 %vm247_vm1, %v5889_v46  ;;  %5053 = vmatmul.mubr.msk.f32.gmra.mrb[4].mxu0 %vm247_vm1, %v5637_v41  ;;  %v6654_v41 = vld [vmem:[#allocation5_spill] sm:$0xff] }
  0xd3   : > { %4832 = vmatprep.mubr.msk.f32.mxu1 %vm247_vm1, %v5893_v57  ;;  %5055 = vmatprep.mubr.msk.f32.mxu0 %vm247_vm1, %v5642_v43  ;;  %v6655_v43 = vld [vmem:[#allocation20_spill] sm:$0xff] }
  0xd6   : > { %4833 = vmatmul.mubr.msk.f32.gmra.mrb[24].mxu1 %vm247_vm1, %v5905_v24  ;;  %5056 = vmatmul.mubr.msk.f32.gmra.mrb[6].mxu0 %vm247_vm1, %v5660_v48  ;;  %v6656_v48 = vld [vmem:[#allocation6_spill] sm:$0xff] }
  0xd7   : > { %4835 = vmatprep.mubr.msk.f32.mxu1 %vm247_vm1, %v5909_v22  ;;  %5058 = vmatprep.mubr.msk.f32.mxu0 %vm247_vm1, %v5663_v49  ;;  %v6657_v49 = vld [vmem:[#allocation21_spill] sm:$0xff] }
  0xda   : > { %4836 = vmatmul.mubr.msk.f32.gmra.mrb[26].mxu1 %vm247_vm1, %v5921_v18  ;;  %5059 = vmatmul.mubr.msk.f32.gmra.mrb[8].mxu0 %vm247_vm1, %v5673_v50  ;;  %v6658_v50 = vld [vmem:[#allocation7_spill] sm:$0xff] }
  0xdb   : > { %4838 = vmatprep.mubr.msk.f32.mxu1 %vm247_vm1, %v5925_v14  ;;  %5061 = vmatprep.mubr.msk.f32.mxu0 %vm247_vm1, %v5675_v51  ;;  %v6659_v51 = vld [vmem:[#allocation22_spill] sm:$0xff] }
  0xde   : > { %4839 = vmatmul.mubr.msk.f32.gmra.mrb[28].mxu1 %vm247_vm1, %v5937_v9  ;;  %5062 = vmatmul.mubr.msk.f32.gmra.mrb[10].mxu0 %vm247_vm1, %v5685_v52  ;;  %v6660_v52 = vld [vmem:[#allocation8_spill] sm:$0xff] }
  0xdf   : > { %4841 = vmatprep.mubr.msk.f32.mxu1 %vm247_vm1, %v5941_v5  ;;  %5064 = vmatprep.mubr.msk.f32.mxu0 %vm247_vm1, %v5687_v53  ;;  %v6661_v53 = vld [vmem:[#allocation23_spill] sm:$0xff] }
  0xe2   : > { %4842 = vmatmul.mubr.msk.f32.gmra.mrb[30].mxu1 %vm247_vm1, %v6649_v32  ;;  %5065 = vmatmul.mubr.msk.f32.gmra.mrb[12].mxu0 %vm247_vm1, %v6650_v34  ;;  %v6667_v34 = vld [vmem:[#allocation26_spill] sm:$0xff] }
  0xe3   : > { %4846 = vmatprep.mubr.msk.f32.mxu1 %vm247_vm1, %v6651_v35  ;;  %5067 = vmatprep.mubr.msk.f32.mxu0 %vm247_vm1, %v6652_v36  ;;  %v6668_v35 = vld [vmem:[#allocation12_spill] sm:$0xff]  ;;  %v6669_v36 = vld [vmem:[#allocation27_spill] sm:$0xff] }
  0xe6   : > { %4847 = vmatmul.mubr.msk.f32.vlgmr.msra.gmra.mrb[0].mxu1 %vm247_vm1, %v6653_v37  ;;  %5068 = vmatmul.mubr.msk.f32.gmra.mrb[14].mxu0 %vm247_vm1, %v6654_v41  ;;  %v6670_v37 = vld [vmem:[#allocation13_spill] sm:$0xff]  ;;  %v6671_v41 = vld [vmem:[#allocation28_spill] sm:$0xff] }
  0xe7   : > { %4849 = vmatprep.mubr.msk.f32.mxu1 %vm247_vm1, %v6655_v43  ;;  %5070 = vmatprep.mubr.msk.f32.mxu0 %vm247_vm1, %v6656_v48  ;;  %v6672_v43 = vld [vmem:[#allocation14_spill] sm:$0xff] }
  0xe8   : > { %5145 = vmatpush3.msk.msra.mxu1 %vm484_vm0, %v5470_v2  ;;  %v6664_v2 = vld [vmem:[#allocation10_spill] sm:$0xff] }
  0xea   : > { %4850 = vmatmul.mubr.msk.f32.gmra.mrb[2].mxu1 %vm247_vm1, %v6657_v49  ;;  %5071 = vmatmul.mubr.msk.f32.gmra.mrb[16].mxu0 %vm247_vm1, %v6658_v50  ;;  %v6673_v49 = vld [vmem:[#allocation29_spill] sm:$0xff] }
  0xeb   : > { %4852 = vmatprep.mubr.msk.f32.mxu1 %vm247_vm1, %v6659_v51  ;;  %5073 = vmatprep.mubr.msk.f32.mxu0 %vm247_vm1, %v6660_v52  ;;  %v6674_v51 = vld [vmem:[#allocation15_spill] sm:$0xff] }
  0xee   : > { %4853 = vmatmul.mubr.msk.f32.gmra.mrb[4].mxu1 %vm247_vm1, %v6661_v53  ;;  %5074 = vmatmul.mubr.msk.f32.gmra.mrb[18].mxu0 %vm247_vm1, %v6662_v0  ;;  %v6675_v53 = vld [vmem:[#allocation16_spill] sm:$0xff] }
  0xef   : > { %4855 = vmatprep.mubr.msk.f32.mxu1 %vm247_vm1, %v6663_v30  ;;  %5076 = vmatprep.mubr.msk.f32.mxu0 %vm247_vm1, %v6664_v2  ;;  %v6256_v30 = vld [vmem:[#allocation2 + $0x181] sm:$0xff] }
  0xf2   : > { %4856 = vmatmul.mubr.msk.f32.gmra.mrb[6].mxu1 %vm247_vm1, %v6665_v3  ;;  %5077 = vmatmul.mubr.msk.f32.gmra.mrb[20].mxu0 %vm247_vm1, %v6666_v16  ;;  %v6676_v3 = vld [vmem:[#allocation30_spill] sm:$0xff] }
  0xf3   : > { %4858 = vmatprep.mubr.msk.f32.mxu1 %vm247_vm1, %v6667_v34  ;;  %5079 = vmatprep.mubr.msk.f32.mxu0 %vm247_vm1, %v6668_v35  ;;  %v6677_v34 = vld [vmem:[#allocation17_spill] sm:$0xff] }
  0xf6   : > { %4859 = vmatmul.mubr.msk.f32.gmra.mrb[8].mxu1 %vm247_vm1, %v6669_v36  ;;  %5080 = vmatmul.mubr.msk.f32.gmra.mrb[22].mxu0 %vm247_vm1, %v6670_v37  ;;  %v6266_v36 = vld [vmem:[#allocation2 + $0x189] sm:$0xff] }
  0xf7   : > { %4861 = vmatprep.mubr.msk.f32.mxu1 %vm247_vm1, %v6671_v41  ;;  %5082 = vmatprep.mubr.msk.f32.mxu0 %vm247_vm1, %v6672_v43  ;;  %v3019_v41 = vld [vmem:[#allocation2 + $0x1a1] sm:$0xff] }
  0xfa   : > { %4862 = vmatmul.mubr.msk.f32.gmra.mrb[10].mxu1 %vm247_vm1, %v6673_v49  ;;  %5083 = vmatmul.mubr.msk.f32.gmra.mrb[24].mxu0 %vm247_vm1, %v6674_v51 }
  0xfb   : > { %4864 = vmatprep.mubr.msk.f32.mxu1 %vm247_vm1, %v5939_v7  ;;  %5085 = vmatprep.mubr.msk.f32.mxu0 %vm247_vm1, %v6675_v53  ;;  %v3018_v7 = vld [vmem:[#allocation2 + $0x199] sm:$0xff] }
  0xfe   : > { %4865 = vmatmul.mubr.msk.f32.gmra.mrb[12].mxu1 %vm247_vm1, %v6676_v3  ;;  %5086 = vmatmul.mubr.msk.f32.gmra.mrb[26].mxu0 %vm247_vm1, %v6677_v34 }
  0xff   : > { %4867 = vmatprep.mubr.msk.f32.mxu1 %vm247_vm1, %v5955_v61  ;;  %5088 = vmatprep.mubr.msk.f32.mxu0 %vm247_vm1, %v6256_v30  ;;  %v3408_v61 = vld [vmem:[#allocation2 + $0x19a] sm:$0xff] }
 0x102   : > { %4868 = vmatmul.mubr.msk.f32.gmra.mrb[14].mxu1 %vm247_vm1, %v5967_v31  ;;  %5089 = vmatmul.mubr.msk.f32.gmra.mrb[28].mxu0 %vm247_vm1, %v6266_v36 }
 0x103   : > { %4870 = vmatprep.mubr.msk.f32.mxu1 %vm247_vm1, %v5971_v28  ;;  %5091 = vmatprep.mubr.msk.f32.mxu0 %vm247_vm1, %v3018_v7 }
 0x106   : > { %4871 = vmatmul.mubr.msk.f32.gmra.mrb[16].mxu1 %vm247_vm1, %v5981_v54  ;;  %5092 = vmatmul.mubr.msk.f32.gmra.mrb[30].mxu0 %vm247_vm1, %v3019_v41  ;;  %v1833_v54 = vld [vmem:[#allocation2 + $0xd9] sm:$0xff] }
 0x107   : > { %4873 = vmatprep.mubr.msk.f32.mxu1 %vm247_vm1, %v5983_v59  ;;  %5096 = vmatprep.mubr.msk.f32.mxu0 %vm247_vm1, %v5721_v62  ;;  %v6678_v59 = vld [vmem:[#allocation32_spill] sm:$0xff]  ;;  %v6679_v62 = vld [vmem:[#allocation33_spill] sm:$0xff] }
 0x10a   : > { %4874 = vmatmul.mubr.msk.f32.gmra.mrb[18].mxu1 %vm247_vm1, %v5998_v56  ;;  %5097 = vmatmul.mubr.msk.f32.vlgmr.msra.gmra.mrb[0].mxu0 %vm247_vm1, %v5738_v1  ;;  %v1834_v56 = vld [vmem:[#allocation2 + $0xe1] sm:$0xff] }
 0x10b   : > { %4876 = vmatprep.mubr.msk.f32.mxu1 %vm247_vm1, %v6002_v38  ;;  %5099 = vmatprep.mubr.msk.f32.mxu0 %vm247_vm1, %v5744_v4  ;;  %v3409_v1 = vld [vmem:[#allocation2 + $0x1a2] sm:$0xff] }
 0x10e   : > { %4877 = vmatmul.mubr.msk.f32.gmra.mrb[20].mxu1 %vm247_vm1, %v6014_v63  ;;  %5100 = vmatmul.mubr.msk.f32.gmra.mrb[2].mxu0 %vm247_vm1, %v5758_v6 }
 0x10f   : > { %4879 = vmatprep.mubr.msk.f32.mxu1 %vm247_vm1, %v6016_v42  ;;  %5102 = vmatprep.mubr.msk.f32.mxu0 %vm247_vm1, %v5762_v8 }
 0x112   : > { %4880 = vmatmul.mubr.msk.f32.gmra.mrb[22].mxu1 %vm247_vm1, %v6026_v45  ;;  %5103 = vmatmul.mubr.msk.f32.gmra.mrb[4].mxu0 %vm247_vm1, %v5774_v10 }
 0x113   : > { %4882 = vmatprep.mubr.msk.f32.mxu1 %vm247_vm1, %v6028_v11  ;;  %5105 = vmatprep.mubr.msk.f32.mxu0 %vm247_vm1, %v5778_v13 }
 0x116   : > { %4883 = vmatmul.mubr.msk.f32.gmra.mrb[24].mxu1 %vm247_vm1, %v6038_v58  ;;  %5106 = vmatmul.mubr.msk.f32.gmra.mrb[6].mxu0 %vm247_vm1, %v5790_v15 }
 0x117   : > { %4885 = vmatprep.mubr.msk.f32.mxu1 %vm247_vm1, %v6040_v47  ;;  %5108 = vmatprep.mubr.msk.f32.mxu0 %vm247_vm1, %v5794_v17 }
 0x11a   : > { %4886 = vmatmul.mubr.msk.f32.gmra.mrb[26].mxu1 %vm247_vm1, %v6050_v20  ;;  %5109 = vmatmul.mubr.msk.f32.gmra.mrb[8].mxu0 %vm247_vm1, %v5806_v19 }
 0x11b   : > { %4888 = vmatprep.mubr.msk.f32.mxu1 %vm247_vm1, %v6052_v26  ;;  %5111 = vmatprep.mubr.msk.f32.mxu0 %vm247_vm1, %v5810_v21 }
 0x11e   : > { %4889 = vmatmul.mubr.msk.f32.gmra.mrb[28].mxu1 %vm247_vm1, %v6062_v12  ;;  %5112 = vmatmul.mubr.msk.f32.gmra.mrb[10].mxu0 %vm247_vm1, %v5822_v23 }
 0x11f   : > { %4891 = vmatprep.mubr.msk.f32.mxu1 %vm247_vm1, %v6122_v55  ;;  %5114 = vmatprep.mubr.msk.f32.mxu0 %vm247_vm1, %v5824_v25 }
 0x122   : > { %4892 = vmatmul.mubr.msk.f32.gmra.mrb[30].mxu1 %vm247_vm1, %v6132_v60  ;;  %5115 = vmatmul.mubr.msk.f32.gmra.mrb[12].mxu0 %vm247_vm1, %v5833_v27 }
 0x123   : > { %4920 = vmatprep.mubr.msk.f32.mxu1 %vm247_vm1, %v1833_v54  ;;  %5117 = vmatprep.mubr.msk.f32.mxu0 %vm247_vm1, %v5837_v29 }
 0x126   : > { %4921 = vmatmul.mubr.msk.f32.vlgmr.msra.gmra.mrb[16].mxu1 %vm247_vm1, %v1834_v56  ;;  %5118 = vmatmul.mubr.msk.f32.gmra.mrb[14].mxu0 %vm247_vm1, %v5853_v33 }
 0x127   : > { %4923 = vmatprep.mubr.msk.f32.mxu1 %vm247_vm1, %v6656_v48  ;;  %5120 = vmatprep.mubr.msk.f32.mxu0 %vm247_vm1, %v5859_v39 }
 0x12a   : > { %4924 = vmatmul.mubr.msk.f32.gmra.mrb[18].mxu1 %vm247_vm1, %v6658_v50  ;;  %5121 = vmatmul.mubr.msk.f32.gmra.mrb[16].mxu0 %vm247_vm1, %v5873_v40 }
 0x12b   : > { %4926 = vmatprep.mubr.msk.f32.mxu1 %vm247_vm1, %v6660_v52  ;;  %5123 = vmatprep.mubr.msk.f32.mxu0 %vm247_vm1, %v5877_v44 }
 0x12e   : > { %4927 = vmatmul.mubr.msk.f32.gmra.mrb[20].mxu1 %vm247_vm1, %v6662_v0  ;;  %5124 = vmatmul.mubr.msk.f32.gmra.mrb[18].mxu0 %vm247_vm1, %v5889_v46 }
 0x12f   : > { %4929 = vmatprep.mubr.msk.f32.mxu1 %vm247_vm1, %v6664_v2  ;;  %5126 = vmatprep.mubr.msk.f32.mxu0 %vm247_vm1, %v5893_v57 }
 0x132   : > { %4930 = vmatmul.mubr.msk.f32.gmra.mrb[22].mxu1 %vm247_vm1, %v6666_v16  ;;  %5127 = vmatmul.mubr.msk.f32.gmra.mrb[20].mxu0 %vm247_vm1, %v5905_v24 }
 0x133   : > { %4932 = vmatprep.mubr.msk.f32.mxu1 %vm247_vm1, %v6668_v35  ;;  %5129 = vmatprep.mubr.msk.f32.mxu0 %vm247_vm1, %v5909_v22 }
 0x136   : > { %4933 = vmatmul.mubr.msk.f32.gmra.mrb[24].mxu1 %vm247_vm1, %v6670_v37  ;;  %5130 = vmatmul.mubr.msk.f32.gmra.mrb[22].mxu0 %vm247_vm1, %v5921_v18 }
 0x137   : > { %4935 = vmatprep.mubr.msk.f32.mxu1 %vm247_vm1, %v6672_v43  ;;  %5132 = vmatprep.mubr.msk.f32.mxu0 %vm247_vm1, %v5925_v14 }
 0x13a   : > { %4936 = vmatmul.mubr.msk.f32.gmra.mrb[26].mxu1 %vm247_vm1, %v6674_v51  ;;  %5133 = vmatmul.mubr.msk.f32.gmra.mrb[24].mxu0 %vm247_vm1, %v5937_v9 }
 0x13b   : > { %4938 = vmatprep.mubr.msk.f32.mxu1 %vm247_vm1, %v6675_v53  ;;  %5135 = vmatprep.mubr.msk.f32.mxu0 %vm247_vm1, %v5941_v5 }
 0x13e   : > { %4939 = vmatmul.mubr.msk.f32.gmra.mrb[28].mxu1 %vm247_vm1, %v6677_v34  ;;  %5136 = vmatmul.mubr.msk.f32.gmra.mrb[26].mxu0 %vm247_vm1, %v6649_v32 }
 0x13f   : > { %4941 = vmatprep.mubr.msk.f32.mxu1 %vm247_vm1, %v6256_v30  ;;  %5138 = vmatprep.mubr.msk.f32.mxu0 %vm247_vm1, %v6678_v59 }
 0x142   : > { %4942 = vmatmul.mubr.msk.f32.gmra.mrb[30].mxu1 %vm247_vm1, %v6266_v36  ;;  %5139 = vmatmul.mubr.msk.f32.gmra.mrb[28].mxu0 %vm247_vm1, %v6679_v62 }
 0x143   : > { %5141 = vmatprep.mubr.msk.f32.mxu0 %vm247_vm1, %v3408_v61 }
 0x146   : > { %5142 = vmatmul.mubr.msk.f32.gmra.mrb[30].mxu0 %vm247_vm1, %v3409_v1 }
 0x1b9   : > { %v4848_v4 = vpop.f32.mrb[0].mxu1 }
 0x1ba   : > { %v1626_v5 = vpop.f32.mrb[1].mxu1 }
 0x1bd   : > { %v4851_v6 = vpop.f32.mrb[2].mxu1 }
 0x1be   : > { %v1636_v8 = vpop.f32.mrb[3].mxu1 }
 0x1c1   : > { %v4854_v9 = vpop.f32.mrb[4].mxu1 }
 0x1c2   : > { %v1646_v10 = vpop.f32.mrb[5].mxu1 }
 0x1c5   : > { %v4857_v12 = vpop.f32.mrb[6].mxu1 }
 0x1c6   : > { %v1656_v13 = vpop.f32.mrb[7].mxu1 }
 0x1c9   : > { %v6398_v14 = vpop.f32.mrb[8].mxu1 }
 0x1ca   : > { %v6400_v15 = vpop.f32.mrb[9].mxu1 }
 0x1cd   : > { %v6402_v17 = vpop.f32.mrb[10].mxu1 }
 0x1ce   : > { %v6404_v18 = vpop.f32.mrb[11].mxu1 }
 0x1d1   : > { %v6406_v19 = vpop.f32.mrb[12].mxu1 }
 0x1d2   : > { %v6408_v20 = vpop.f32.mrb[13].mxu1 }
 0x1d5   : > { %v6410_v21 = vpop.f32.mrb[14].mxu1 }
 0x1d6   : > { %v6412_v22 = vpop.f32.mrb[15].mxu1 }
 0x1dd   : > { %v5098_v23 = vpop.f32.mrb[0].mxu0 }
 0x1de   : > { %v5146_v25 = vadd.f32 %v5098_v23, %v4848_v4  ;;  %v3577_v27 = vpop.f32.mrb[1].mxu0 }
 0x1df   : > { %v5147_v28 = vadd.f32 %v3577_v27, %v1626_v5 }
 0x1e0   : > { %v3770_v29 = vsel %vm3768_vm3, %v5146_v25, 0.0  ;;  %v3841_v31 = vmul.f32 %v5146_v25, %v5146_v25  ;;  %3943 = vst.msk [vmem:[%s6419_s18 + $0x8] sm:$0xff] %vm3768_vm3, %v5146_v25 }
 0x1e1   : > { %v3769_v33 = vsel %vm3768_vm3, %v5147_v28, 0.0  ;;  %v3840_v38 = vmul.f32 %v5147_v28, %v5147_v28  ;;  %3942 = vst.msk [vmem:[%s6419_s18] sm:$0xff] %vm3768_vm3, %v5147_v28  ;;  %v5101_v39 = vpop.f32.mrb[2].mxu0 }
 0x1e2   : > { %v3873_v11 = vsel %vm3768_vm3, %v3841_v31, 0.0  ;;  %v3771_v40 = vadd.f32 %v3770_v29, %v3769_v33  ;;  %v5148_v42 = vadd.f32 %v5101_v39, %v4851_v6  ;;  %v3587_v44 = vpop.f32.mrb[3].mxu0 }
 0x1e3   : > { %v3872_v45 = vsel %vm3768_vm3, %v3840_v38, 0.0  ;;  %v5149_v46 = vadd.f32 %v3587_v44, %v1636_v8 }
 0x1e4   : > { %v3874_v47 = vadd.f32 %v3873_v11, %v3872_v45  ;;  %3945 = vst.msk [vmem:[%s6419_s18 + $0x18] sm:$0xff] %vm3768_vm3, %v5148_v42  ;;  %v3843_v57 = vmul.f32 %v5148_v42, %v5148_v42  ;;  %v3774_v32 = vsel %vm3768_vm3, %v5148_v42, 0.0 }
 0x1e5   : > { %v3772_v58 = vsel %vm3768_vm3, %v5149_v46, 0.0  ;;  %v3842_v24 = vmul.f32 %v5149_v46, %v5149_v46  ;;  %3944 = vst.msk [vmem:[%s6419_s18 + $0x10] sm:$0xff] %vm3768_vm3, %v5149_v46  ;;  %v5104_v26 = vpop.f32.mrb[4].mxu0 }
 0x1e6   : > { %v3773_v63 = vadd.f32 %v3772_v58, %v3771_v40  ;;  %v5150_v55 = vadd.f32 %v5104_v26, %v4854_v9  ;;  %v3597_v60 = vpop.f32.mrb[5].mxu0  ;;  %v3877_v2 = vsel %vm3768_vm3, %v3843_v57, 0.0 }
 0x1e7   : > { %v3875_v48 = vsel %vm3768_vm3, %v3842_v24, 0.0  ;;  %v5151_v50 = vadd.f32 %v3597_v60, %v1646_v10 }
 0x1e8   : > { %v3876_v52 = vadd.f32 %v3875_v48, %v3874_v47  ;;  %3947 = vst.msk [vmem:[%s6419_s18 + $0x28] sm:$0xff] %vm3768_vm3, %v5150_v55  ;;  %v3775_v0 = vadd.f32 %v3774_v32, %v3773_v63  ;;  %v3845_v16 = vmul.f32 %v5150_v55, %v5150_v55  ;;  %v3778_v3 = vsel %vm3768_vm3, %v5150_v55, 0.0 }
 0x1e9   : > { %v3776_v35 = vsel %vm3768_vm3, %v5151_v50, 0.0  ;;  %v3844_v37 = vmul.f32 %v5151_v50, %v5151_v50  ;;  %3946 = vst.msk [vmem:[%s6419_s18 + $0x20] sm:$0xff] %vm3768_vm3, %v5151_v50  ;;  %v5107_v43 = vpop.f32.mrb[6].mxu0 }
 0x1ea   : > { %v3777_v49 = vadd.f32 %v3776_v35, %v3775_v0  ;;  %v3878_v51 = vadd.f32 %v3877_v2, %v3876_v52  ;;  %v5152_v53 = vadd.f32 %v5107_v43, %v4857_v12  ;;  %v3607_v30 = vpop.f32.mrb[7].mxu0  ;;  %v3881_v54 = vsel %vm3768_vm3, %v3845_v16, 0.0 }
 0x1eb   : > { %v3879_v34 = vsel %vm3768_vm3, %v3844_v37, 0.0  ;;  %v5153_v36 = vadd.f32 %v3607_v30, %v1656_v13 }
 0x1ec   : > { %v3880_v7 = vadd.f32 %v3879_v34, %v3878_v51  ;;  %3949 = vst.msk [vmem:[%s6419_s18 + $0x38] sm:$0xff] %vm3768_vm3, %v5152_v53  ;;  %v3779_v41 = vadd.f32 %v3778_v3, %v3777_v49  ;;  %v3847_v56 = vmul.f32 %v5152_v53, %v5152_v53  ;;  %v3782_v8 = vsel %vm3768_vm3, %v5152_v53, 0.0 }
 0x1ed   : > { %v3780_v59 = vsel %vm3768_vm3, %v5153_v36, 0.0  ;;  %v3846_v61 = vmul.f32 %v5153_v36, %v5153_v36  ;;  %3948 = vst.msk [vmem:[%s6419_s18 + $0x30] sm:$0xff] %vm3768_vm3, %v5153_v36  ;;  %v5110_v62 = vpop.f32.mrb[8].mxu0 }
 0x1ee   : > { %v3781_v1 = vadd.f32 %v3780_v59, %v3779_v41  ;;  %v3882_v4 = vadd.f32 %v3881_v54, %v3880_v7  ;;  %v5154_v5 = vadd.f32 %v5110_v62, %v6398_v14  ;;  %v3617_v6 = vpop.f32.mrb[9].mxu0  ;;  %v3885_v23 = vsel %vm3768_vm3, %v3847_v56, 0.0 }
 0x1ef   : > { %v3883_v9 = vsel %vm3768_vm3, %v3846_v61, 0.0  ;;  %v5155_v10 = vadd.f32 %v3617_v6, %v6400_v15 }
 0x1f0   : > { %v3884_v12 = vadd.f32 %v3883_v9, %v3882_v4  ;;  %3951 = vst.msk [vmem:[%s6419_s18 + $0x48] sm:$0xff] %vm3768_vm3, %v5154_v5  ;;  %v3783_v13 = vadd.f32 %v3782_v8, %v3781_v1  ;;  %v3849_v25 = vmul.f32 %v5154_v5, %v5154_v5  ;;  %v3786_v38 = vsel %vm3768_vm3, %v5154_v5, 0.0 }
 0x1f1   : > { %v3784_v27 = vsel %vm3768_vm3, %v5155_v10, 0.0  ;;  %v3848_v28 = vmul.f32 %v5155_v10, %v5155_v10  ;;  %3950 = vst.msk [vmem:[%s6419_s18 + $0x40] sm:$0xff] %vm3768_vm3, %v5155_v10  ;;  %v5113_v14 = vpop.f32.mrb[10].mxu0 }
 0x1f2   : > { %v3785_v29 = vadd.f32 %v3784_v27, %v3783_v13  ;;  %v3886_v31 = vadd.f32 %v3885_v23, %v3884_v12  ;;  %v5156_v33 = vadd.f32 %v5113_v14, %v6402_v17  ;;  %v3627_v15 = vpop.f32.mrb[11].mxu0  ;;  %v3889_v44 = vsel %vm3768_vm3, %v3849_v25, 0.0 }
 0x1f3   : > { %v3887_v39 = vsel %vm3768_vm3, %v3848_v28, 0.0  ;;  %v5157_v11 = vadd.f32 %v3627_v15, %v6404_v18 }
 0x1f4   : > { %v3888_v40 = vadd.f32 %v3887_v39, %v3886_v31  ;;  %3953 = vst.msk [vmem:[%s6419_s18 + $0x58] sm:$0xff] %vm3768_vm3, %v5156_v33  ;;  %v3787_v42 = vadd.f32 %v3786_v38, %v3785_v29  ;;  %v3851_v45 = vmul.f32 %v5156_v33, %v5156_v33  ;;  %v3790_v26 = vsel %vm3768_vm3, %v5156_v33, 0.0 }
 0x1f5   : > { %v3788_v46 = vsel %vm3768_vm3, %v5157_v11, 0.0  ;;  %v3850_v47 = vmul.f32 %v5157_v11, %v5157_v11  ;;  %3952 = vst.msk [vmem:[%s6419_s18 + $0x50] sm:$0xff] %vm3768_vm3, %v5157_v11  ;;  %v5116_v17 = vpop.f32.mrb[12].mxu0 }
 0x1f6   : > { %v3789_v57 = vadd.f32 %v3788_v46, %v3787_v42  ;;  %v3890_v58 = vadd.f32 %v3889_v44, %v3888_v40  ;;  %v5158_v24 = vadd.f32 %v5116_v17, %v6406_v19  ;;  %v3637_v18 = vpop.f32.mrb[13].mxu0  ;;  %v3893_v48 = vsel %vm3768_vm3, %v3851_v45, 0.0 }
 0x1f7   : > { %v3891_v63 = vsel %vm3768_vm3, %v3850_v47, 0.0  ;;  %v5159_v55 = vadd.f32 %v3637_v18, %v6408_v20 }
 0x1f8   : > { %v3892_v60 = vadd.f32 %v3891_v63, %v3890_v58  ;;  %3955 = vst.msk [vmem:[%s6419_s18 + $0x68] sm:$0xff] %vm3768_vm3, %v5158_v24  ;;  %v3791_v32 = vadd.f32 %v3790_v26, %v3789_v57  ;;  %v3853_v50 = vmul.f32 %v5158_v24, %v5158_v24  ;;  %v3794_v49 = vsel %vm3768_vm3, %v5158_v24, 0.0 }
 0x1f9   : > { %v3792_v52 = vsel %vm3768_vm3, %v5159_v55, 0.0  ;;  %v3852_v0 = vmul.f32 %v5159_v55, %v5159_v55  ;;  %3954 = vst.msk [vmem:[%s6419_s18 + $0x60] sm:$0xff] %vm3768_vm3, %v5159_v55  ;;  %v4922_v19 = vpop.f32.mrb[16].mxu1  ;;  %v5119_v2 = vpop.f32.mrb[14].mxu0 }
 0x1fa   : > { %v3793_v16 = vadd.f32 %v3792_v52, %v3791_v32  ;;  %v3894_v35 = vadd.f32 %v3893_v48, %v3892_v60  ;;  %v5160_v20 = vadd.f32 %v5119_v2, %v6410_v21  ;;  %v2096_v37 = vpop.f32.mrb[17].mxu1  ;;  %v3647_v43 = vpop.f32.mrb[15].mxu0  ;;  %v3897_v34 = vsel %vm3768_vm3, %v3853_v50, 0.0 }
 0x1fb   : > { %v3895_v51 = vsel %vm3768_vm3, %v3852_v0, 0.0  ;;  %v5161_v53 = vadd.f32 %v3647_v43, %v6412_v22 }
 0x1fc   : > { %v3896_v30 = vadd.f32 %v3895_v51, %v3894_v35  ;;  %3957 = vst.msk [vmem:[%s6419_s18 + $0x78] sm:$0xff] %vm3768_vm3, %v5160_v20  ;;  %v3795_v3 = vadd.f32 %v3794_v49, %v3793_v16  ;;  %v3855_v36 = vmul.f32 %v5160_v20, %v5160_v20  ;;  %v3798_v1 = vsel %vm3768_vm3, %v5160_v20, 0.0 }
 0x1fd   : > { %v3796_v7 = vsel %vm3768_vm3, %v5161_v53, 0.0  ;;  %v3854_v41 = vmul.f32 %v5161_v53, %v5161_v53  ;;  %3956 = vst.msk [vmem:[%s6419_s18 + $0x70] sm:$0xff] %vm3768_vm3, %v5161_v53  ;;  %v4925_v21 = vpop.f32.mrb[18].mxu1  ;;  %v5122_v54 = vpop.f32.mrb[16].mxu0 }
 0x1fe   : > { %v3797_v56 = vadd.f32 %v3796_v7, %v3795_v3  ;;  %v3898_v59 = vadd.f32 %v3897_v34, %v3896_v30  ;;  %v5162_v61 = vadd.f32 %v5122_v54, %v4922_v19  ;;  %v2106_v22 = vpop.f32.mrb[19].mxu1  ;;  %v3657_v62 = vpop.f32.mrb[17].mxu0  ;;  %v3901_v9 = vsel %vm3768_vm3, %v3855_v36, 0.0 }
 0x1ff   : > { %v3899_v4 = vsel %vm3768_vm3, %v3854_v41, 0.0  ;;  %v5163_v5 = vadd.f32 %v3657_v62, %v2096_v37 }
 0x200   : > { %v3900_v6 = vadd.f32 %v3899_v4, %v3898_v59  ;;  %3959 = vst.msk [vmem:[%s6419_s18 + $0x88] sm:$0xff] %vm3768_vm3, %v5162_v61  ;;  %v3799_v8 = vadd.f32 %v3798_v1, %v3797_v56  ;;  %v3857_v10 = vmul.f32 %v5162_v61, %v5162_v61  ;;  %v3802_v33 = vsel %vm3768_vm3, %v5162_v61, 0.0 }
 0x201   : > { %v3800_v12 = vsel %vm3768_vm3, %v5163_v5, 0.0  ;;  %v3856_v13 = vmul.f32 %v5163_v5, %v5163_v5  ;;  %3958 = vst.msk [vmem:[%s6419_s18 + $0x80] sm:$0xff] %vm3768_vm3, %v5163_v5  ;;  %v4928_v23 = vpop.f32.mrb[20].mxu1  ;;  %v5125_v25 = vpop.f32.mrb[18].mxu0 }
 0x202   : > { %v3801_v27 = vadd.f32 %v3800_v12, %v3799_v8  ;;  %v3902_v28 = vadd.f32 %v3901_v9, %v3900_v6  ;;  %v5164_v14 = vadd.f32 %v5125_v25, %v4925_v21  ;;  %v2116_v29 = vpop.f32.mrb[21].mxu1  ;;  %v3667_v31 = vpop.f32.mrb[19].mxu0  ;;  %v3905_v40 = vsel %vm3768_vm3, %v3857_v10, 0.0 }
 0x203   : > { %v3903_v15 = vsel %vm3768_vm3, %v3856_v13, 0.0  ;;  %v5165_v38 = vadd.f32 %v3667_v31, %v2106_v22 }
 0x204   : > { %v3904_v39 = vadd.f32 %v3903_v15, %v3902_v28  ;;  %3961 = vst.msk [vmem:[%s6419_s18 + $0x98] sm:$0xff] %vm3768_vm3, %v5164_v14  ;;  %v3803_v11 = vadd.f32 %v3802_v33, %v3801_v27  ;;  %v3859_v42 = vmul.f32 %v5164_v14, %v5164_v14  ;;  %v3806_v26 = vsel %vm3768_vm3, %v5164_v14, 0.0 }
 0x205   : > { %v3804_v44 = vsel %vm3768_vm3, %v5165_v38, 0.0  ;;  %v3858_v45 = vmul.f32 %v5165_v38, %v5165_v38  ;;  %3960 = vst.msk [vmem:[%s6419_s18 + $0x90] sm:$0xff] %vm3768_vm3, %v5165_v38  ;;  %v4931_v46 = vpop.f32.mrb[22].mxu1  ;;  %v5128_v47 = vpop.f32.mrb[20].mxu0 }
 0x206   : > { %v3805_v17 = vadd.f32 %v3804_v44, %v3803_v11  ;;  %v3906_v57 = vadd.f32 %v3905_v40, %v3904_v39  ;;  %v5166_v58 = vadd.f32 %v5128_v47, %v4928_v23  ;;  %v2126_v24 = vpop.f32.mrb[23].mxu1  ;;  %v3677_v18 = vpop.f32.mrb[21].mxu0  ;;  %v3909_v48 = vsel %vm3768_vm3, %v3859_v42, 0.0 }
 0x207   : > { %v3907_v63 = vsel %vm3768_vm3, %v3858_v45, 0.0  ;;  %v5167_v55 = vadd.f32 %v3677_v18, %v2116_v29 }
 0x208   : > { %v3908_v60 = vadd.f32 %v3907_v63, %v3906_v57  ;;  %3963 = vst.msk [vmem:[%s6419_s18 + $0xa8] sm:$0xff] %vm3768_vm3, %v5166_v58  ;;  %v3807_v32 = vadd.f32 %v3806_v26, %v3805_v17  ;;  %v3861_v50 = vmul.f32 %v5166_v58, %v5166_v58  ;;  %v3810_v49 = vsel %vm3768_vm3, %v5166_v58, 0.0 }
 0x209   : > { %v3808_v52 = vsel %vm3768_vm3, %v5167_v55, 0.0  ;;  %v3860_v0 = vmul.f32 %v5167_v55, %v5167_v55  ;;  %3962 = vst.msk [vmem:[%s6419_s18 + $0xa0] sm:$0xff] %vm3768_vm3, %v5167_v55  ;;  %v4934_v19 = vpop.f32.mrb[24].mxu1  ;;  %v5131_v2 = vpop.f32.mrb[22].mxu0 }
 0x20a   : > { %v3809_v16 = vadd.f32 %v3808_v52, %v3807_v32  ;;  %v3910_v35 = vadd.f32 %v3909_v48, %v3908_v60  ;;  %v5168_v20 = vadd.f32 %v5131_v2, %v4931_v46  ;;  %v2136_v37 = vpop.f32.mrb[25].mxu1  ;;  %v3687_v43 = vpop.f32.mrb[23].mxu0  ;;  %v3913_v34 = vsel %vm3768_vm3, %v3861_v50, 0.0 }
 0x20b   : > { %v3911_v51 = vsel %vm3768_vm3, %v3860_v0, 0.0  ;;  %v5169_v53 = vadd.f32 %v3687_v43, %v2126_v24 }
 0x20c   : > { %v3912_v30 = vadd.f32 %v3911_v51, %v3910_v35  ;;  %3965 = vst.msk [vmem:[%s6419_s18 + $0xb8] sm:$0xff] %vm3768_vm3, %v5168_v20  ;;  %v3811_v3 = vadd.f32 %v3810_v49, %v3809_v16  ;;  %v3863_v36 = vmul.f32 %v5168_v20, %v5168_v20  ;;  %v3814_v1 = vsel %vm3768_vm3, %v5168_v20, 0.0 }
 0x20d   : > { %v3812_v7 = vsel %vm3768_vm3, %v5169_v53, 0.0  ;;  %v3862_v41 = vmul.f32 %v5169_v53, %v5169_v53  ;;  %3964 = vst.msk [vmem:[%s6419_s18 + $0xb0] sm:$0xff] %vm3768_vm3, %v5169_v53  ;;  %v4937_v21 = vpop.f32.mrb[26].mxu1  ;;  %v5134_v54 = vpop.f32.mrb[24].mxu0 }
 0x20e   : > { %v3813_v56 = vadd.f32 %v3812_v7, %v3811_v3  ;;  %v3914_v59 = vadd.f32 %v3913_v34, %v3912_v30  ;;  %v5170_v61 = vadd.f32 %v5134_v54, %v4934_v19  ;;  %v2146_v22 = vpop.f32.mrb[27].mxu1  ;;  %v3697_v62 = vpop.f32.mrb[25].mxu0  ;;  %v3917_v9 = vsel %vm3768_vm3, %v3863_v36, 0.0 }
 0x20f   : > { %v3915_v4 = vsel %vm3768_vm3, %v3862_v41, 0.0  ;;  %v5171_v5 = vadd.f32 %v3697_v62, %v2136_v37 }
 0x210   : > { %v3916_v6 = vadd.f32 %v3915_v4, %v3914_v59  ;;  %3967 = vst.msk [vmem:[%s6419_s18 + $0xc8] sm:$0xff] %vm3768_vm3, %v5170_v61  ;;  %v3815_v8 = vadd.f32 %v3814_v1, %v3813_v56  ;;  %v3865_v10 = vmul.f32 %v5170_v61, %v5170_v61  ;;  %v3818_v33 = vsel %vm3768_vm3, %v5170_v61, 0.0 }
 0x211   : > { %v3816_v12 = vsel %vm3768_vm3, %v5171_v5, 0.0  ;;  %v3864_v13 = vmul.f32 %v5171_v5, %v5171_v5  ;;  %3966 = vst.msk [vmem:[%s6419_s18 + $0xc0] sm:$0xff] %vm3768_vm3, %v5171_v5  ;;  %v4940_v23 = vpop.f32.mrb[28].mxu1  ;;  %v5137_v25 = vpop.f32.mrb[26].mxu0 }
 0x212   : > { %v3817_v27 = vadd.f32 %v3816_v12, %v3815_v8  ;;  %v3918_v28 = vadd.f32 %v3917_v9, %v3916_v6  ;;  %v5172_v14 = vadd.f32 %v5137_v25, %v4937_v21  ;;  %v2156_v29 = vpop.f32.mrb[29].mxu1  ;;  %v3707_v31 = vpop.f32.mrb[27].mxu0  ;;  %v3921_v40 = vsel %vm3768_vm3, %v3865_v10, 0.0 }
 0x213   : > { %v3919_v15 = vsel %vm3768_vm3, %v3864_v13, 0.0  ;;  %v5173_v38 = vadd.f32 %v3707_v31, %v2146_v22 }
 0x214   : > { %v3920_v39 = vadd.f32 %v3919_v15, %v3918_v28  ;;  %3969 = vst.msk [vmem:[%s6419_s18 + $0xd8] sm:$0xff] %vm3768_vm3, %v5172_v14  ;;  %v3819_v11 = vadd.f32 %v3818_v33, %v3817_v27  ;;  %v3867_v42 = vmul.f32 %v5172_v14, %v5172_v14  ;;  %v3822_v26 = vsel %vm3768_vm3, %v5172_v14, 0.0 }
 0x215   : > { %v3820_v44 = vsel %vm3768_vm3, %v5173_v38, 0.0  ;;  %v3866_v45 = vmul.f32 %v5173_v38, %v5173_v38  ;;  %3968 = vst.msk [vmem:[%s6419_s18 + $0xd0] sm:$0xff] %vm3768_vm3, %v5173_v38  ;;  %v4943_v46 = vpop.f32.mrb[30].mxu1  ;;  %v5140_v47 = vpop.f32.mrb[28].mxu0 }
 0x216   : > { %v3821_v17 = vadd.f32 %v3820_v44, %v3819_v11  ;;  %v3922_v57 = vadd.f32 %v3921_v40, %v3920_v39  ;;  %v5174_v58 = vadd.f32 %v5140_v47, %v4940_v23  ;;  %v2166_v24 = vpop.f32.mrb[31].mxu1  ;;  %v3717_v18 = vpop.f32.mrb[29].mxu0  ;;  %v3925_v48 = vsel %vm3768_vm3, %v3867_v42, 0.0 }
 0x217   : > { %v3923_v63 = vsel %vm3768_vm3, %v3866_v45, 0.0  ;;  %v5175_v55 = vadd.f32 %v3717_v18, %v2156_v29 }
 0x218   : > { %v3924_v60 = vadd.f32 %v3923_v63, %v3922_v57  ;;  %3971 = vst.msk [vmem:[%s6419_s18 + $0xe8] sm:$0xff] %vm3768_vm3, %v5174_v58  ;;  %v3823_v32 = vadd.f32 %v3822_v26, %v3821_v17  ;;  %v3869_v50 = vmul.f32 %v5174_v58, %v5174_v58  ;;  %v3826_v37 = vsel %vm3768_vm3, %v5174_v58, 0.0 }
 0x219   : > { %v3824_v52 = vsel %vm3768_vm3, %v5175_v55, 0.0  ;;  %v3868_v0 = vmul.f32 %v5175_v55, %v5175_v55  ;;  %3970 = vst.msk [vmem:[%s6419_s18 + $0xe0] sm:$0xff] %vm3768_vm3, %v5175_v55  ;;  %v5143_v19 = vpop.f32.mrb[30].mxu0 }
 0x21a   : > { %v3825_v2 = vadd.f32 %v3824_v52, %v3823_v32  ;;  %v3926_v16 = vadd.f32 %v3925_v48, %v3924_v60  ;;  %v5176_v35 = vadd.f32 %v5143_v19, %v4943_v46  ;;  %v3727_v20 = vpop.f32.mrb[31].mxu0  ;;  %v3929_v3 = vsel %vm3768_vm3, %v3869_v50, 0.0 }
 0x21b   : > { %v3927_v43 = vsel %vm3768_vm3, %v3868_v0, 0.0  ;;  %v5177_v49 = vadd.f32 %v3727_v20, %v2166_v24 }
 0x21c   : > { %v3928_v51 = vadd.f32 %v3927_v43, %v3926_v16  ;;  %v3871_v53 = vmul.f32 %v5176_v35, %v5176_v35  ;;  %3973 = vst.msk [vmem:[%s6419_s18 + $0xf8] sm:$0xff] %vm3768_vm3, %v5176_v35  ;;  %v3827_v30 = vadd.f32 %v3826_v37, %v3825_v2  ;;  %v3830_v54 = vsel %vm3768_vm3, %v5176_v35, 0.0 }
 0x21d   : > { %v3828_v34 = vsel %vm3768_vm3, %v5177_v49, 0.0  ;;  %v3870_v36 = vmul.f32 %v5177_v49, %v5177_v49  ;;  %3972 = vst.msk [vmem:[%s6419_s18 + $0xf0] sm:$0xff] %vm3768_vm3, %v5177_v49 }
 0x21e   : > { %v3933_v7 = vsel %vm3768_vm3, %v3871_v53, 0.0  ;;  %v3829_v41 = vadd.f32 %v3828_v34, %v3827_v30  ;;  %v3930_v21 = vadd.f32 %v3929_v3, %v3928_v51 }
 0x21f   : > { %v3931_v56 = vsel %vm3768_vm3, %v3870_v36, 0.0 }
 0x220   : > { %v3831_v59 = vadd.f32 %v3830_v54, %v3829_v41  ;;  %v3932_v61 = vadd.f32 %v3931_v56, %v3930_v21 }
 0x222   : > { %v3832_v22 = vrot.slane %v3831_v59, 4  ;;  %v3934_v62 = vadd.f32 %v3933_v7, %v3932_v61 }
 0x224   : > { %v3833_v1 = vadd.f32 %v3832_v22, %v3831_v59  ;;  %v3935_v4 = vrot.slane %v3934_v62, 4 }
 0x226   : > { %v3834_v5 = vrot.slane %v3833_v1, 2  ;;  %v3936_v6 = vadd.f32 %v3935_v4, %v3934_v62 }
 0x228   : > { %v3835_v8 = vadd.f32 %v3834_v5, %v3833_v1  ;;  %v3937_v9 = vrot.slane %v3936_v6, 2 }
 0x22a   : > { %v3836_v10 = vrot.slane %v3835_v8, 1  ;;  %v3938_v12 = vadd.f32 %v3937_v9, %v3936_v6 }
 0x22c   : > { %v3837_v13 = vadd.f32 %v3836_v10, %v3835_v8  ;;  %v3939_v23 = vrot.slane %v3938_v12, 1 }
 0x22e   : > { %3839 = vst.msk [vmem:[%s211_s21] sm:$0x1] %vm3838_vm4, %v3837_v13  ;;  %v3940_v25 = vadd.f32 %v3939_v23, %v3938_v12 }
 0x230   : > { %3941 = vst.msk [vmem:[%s214_s24] sm:$0x1] %vm3838_vm4, %v3940_v25 }
 0x231 PF: > { %s15_s15 = sadd.s32 1, %s5417_s15  }
 0x232   : > { %p12_p4 = scmp.ge.s32.totalorder %s15_s15, 4  }
 0x234   :  { %14 = sbr.rel (!%p12_p4) target bundleno = 1 (0x1), region = 93 }

// kernel: double_conv.4
= control target key start
LH: loop header
LB: loop body
LE: loop exit
PB: predicated region body
PF: predicated region fallthrough
CT: control target
= control target key end

     0   :  { %s5660_s27 = smov 0   ;;  %s6844_s0 = inlined_call_operand.vmem [shape: f32[2,16,16,8], index: 0, kind: input, shape index: {}]   ;;  %s6845_s1 = inlined_call_operand.vmem [shape: f32[1,8], index: 1, kind: input, shape index: {}]   ;;  %s6846_s2 = inlined_call_operand.vmem [shape: f32[1,8], index: 2, kind: input, shape index: {}]   ;;  %s6847_s3 = inlined_call_operand.vmem [shape: f32[1,8], index: 3, kind: input, shape index: {}]   ;;  %s6848_s4 = inlined_call_operand.vmem [shape: f32[1,8], index: 4, kind: input, shape index: {}]   ;;  %s6849_s5 = inlined_call_operand.vmem [shape: f32[9,8,8], index: 5, kind: input, shape index: {}]   ;;  %s6850_s6 = inlined_call_operand.vmem [shape: f32[2,16,16,8], index: 6, kind: output, shape index: {0}]   ;;  %s6851_s7 = inlined_call_operand.vmem [shape: f32[2,1,8], index: 7, kind: output, shape index: {1}]   ;;  %s6852_s8 = inlined_call_operand.vmem [shape: f32[2,1,8], index: 8, kind: output, shape index: {2}]  }
   0x1 LB: > { %s4280_s28 = sadd.s32 4294967295, %s5612_s27   ;;  %p4284_p0 = scmp.ge.s32.totalorder %s5612_s27, 1  ;;  %s5612_s27 = sphi %s5660_s27, %s19_s27  }
   0x2   : > { %p267_p1 = scmp.lt.s32.totalorder %s5612_s27, 3 }
   0x4   : > { %p268_p2 = pnand %p4284_p0, %p267_p1 }
   0x6   : > { %271 = sbr.rel (%p268_p2) target bundleno = 578 (0x242), region = 44 }
   0xd   : > { %v4289_v0 = vld [vmem:[%s6849_s5 + $0x8] sm:$0xff]  ;;  %vm478_vm0 = vcmask 64512   ;;  %v5674_v1 = vld [vmem:[%s6849_s5 + $0x20] sm:$0xff]  ;;  %v5614_v3 = vmov 0.0   ;;  %vm487_vm1 = vcmask 57344   ;;  %p307_p3 = scmp.lt.s32.totalorder %s4280_s28, 1  ;;  %v371_v16 = vlaneseq }
   0xe   : > { %v584_v2 = vld [vmem:[%s6849_s5] sm:$0xff]  ;;  %4886 = vmatprep.subr.mxu1 %v4289_v0  ;;  %479 = vst.msk [vmem:[#allocation2] sm:$0xff] %vm478_vm0, %v5614_v3  ;;  %480 = vst.msk [vmem:[#allocation2 + $0x8] sm:$0xff] %vm478_vm0, %v5614_v3  ;;  %5086 = vmatprep.subr.mxu0 %v5674_v1  ;;  %v5698_v8 = vld [vmem:[%s6849_s5 + $0x28] sm:$0xff] }
   0xf   : > { %481 = vst.msk [vmem:[#allocation2 + $0x10] sm:$0xff] %vm478_vm0, %v5614_v3  ;;  %483 = vst.msk [vmem:[#allocation2 + $0x198] sm:$0xff] %vm478_vm0, %v5614_v3  ;;  %v323_v4 = vld [vmem:[%s6845_s1] sm:$0x1]  ;;  %4887 = vmatpush3.msra.mxu1 %v4289_v0  ;;  %5087 = vmatpush3.msra.mxu0 %v5674_v1  ;;  %v5741_v14 = vld [vmem:[%s6849_s5 + $0x10] sm:$0xff]  ;;  %s6958_s28 = smov (!%p307_p3, %s4280_s28), 1 }
  0x10   : > { %484 = vst.msk [vmem:[#allocation2 + $0x1a0] sm:$0xff] %vm478_vm0, %v5614_v3  ;;  %485 = vst.msk [vmem:[#allocation2 + $0x1a8] sm:$0xff] %vm478_vm0, %v5614_v3  ;;  %v324_v5 = vld [vmem:[%s6846_s2] sm:$0x1]  ;;  %v5693_v6 = vmul.f32 0.001953125, %v323_v4  ;;  %4936 = vmatprep.subr.mxu1 %v584_v2  ;;  %5136 = vmatprep.subr.mxu0 %v5698_v8  ;;  %s4587_s21 = sshll.u32 %s6958_s28, 8  ;;  %s322_s29 = scalar_lea.vmem %s6852_s8, %s6958_s28 }
  0x11   : > { %v329_v7 = vmul.f32 0.001953125, %v324_v5  ;;  %504 = vst.msk [vmem:[#allocation2 + $0x29] sm:$0x1] %vm487_vm1, %v5614_v3  ;;  %488 = vst.msk [vmem:[#allocation2 + $0x18] sm:$0x1] %vm487_vm1, %v5614_v3  ;;  %v372_v17 = vshrl.u32 %v371_v16, 7  ;;  %s5755_s24 = scalar_lea.vmem %s6844_s0, %s4587_s21  ;;  %s6693_s22 = scalar_lea.vmem %s6850_s6, %s4587_s21 }
  0x12   : > { %v330_v9 = vmul.f32 %v5693_v6, %v5693_v6  ;;  %489 = vst.msk [vmem:[#allocation2 + $0x30] sm:$0x1] %vm487_vm1, %v5614_v3  ;;  %490 = vst.msk [vmem:[#allocation2 + $0x48] sm:$0x1] %vm487_vm1, %v5614_v3  ;;  %v325_v18 = vld [vmem:[%s6847_s3] sm:$0x1] }
  0x13   : > { %491 = vst.msk [vmem:[#allocation2 + $0x60] sm:$0x1] %vm487_vm1, %v5614_v3  ;;  %492 = vst.msk [vmem:[#allocation2 + $0x78] sm:$0x1] %vm487_vm1, %v5614_v3  ;;  %v373_v19 = vsub.s32 0, %v372_v17  ;;  %v338_v23 = vld [vmem:[%s5755_s24] sm:$0xff] }
  0x14   : > { %493 = vst.msk [vmem:[#allocation2 + $0x90] sm:$0x1] %vm487_vm1, %v5614_v3  ;;  %494 = vst.msk [vmem:[#allocation2 + $0xa8] sm:$0x1] %vm487_vm1, %v5614_v3  ;;  %v331_v10 = vsub.f32 %v329_v7, %v330_v9  ;;  %v326_v21 = vld [vmem:[%s6848_s4] sm:$0x1] }
  0x15   : > { %495 = vst.msk [vmem:[#allocation2 + $0xc0] sm:$0x1] %vm487_vm1, %v5614_v3  ;;  %496 = vst.msk [vmem:[#allocation2 + $0xd8] sm:$0x1] %vm487_vm1, %v5614_v3  ;;  %v585_v11 = vld [vmem:[#allocation2 + $0x1] sm:$0xff]  ;;  %v340_v25 = vld [vmem:[%s5755_s24 + $0x10] sm:$0xff] }
  0x16   : > { %497 = vst.msk [vmem:[#allocation2 + $0xf0] sm:$0x1] %vm487_vm1, %v5614_v3  ;;  %498 = vst.msk [vmem:[#allocation2 + $0x108] sm:$0x1] %vm487_vm1, %v5614_v3  ;;  %v586_v12 = vld [vmem:[#allocation2 + $0x9] sm:$0xff]  ;;  %v332_v13 = vmax.f32 %v331_v10, 0.0  ;;  %4888 = vmatprep.mubr.msk.f32.mxu1 %vm478_vm0, %v585_v11 }
  0x17   : > { %499 = vst.msk [vmem:[#allocation2 + $0x120] sm:$0x1] %vm487_vm1, %v5614_v3  ;;  %500 = vst.msk [vmem:[#allocation2 + $0x138] sm:$0x1] %vm487_vm1, %v5614_v3  ;;  %4889 = vmatmul.mubr.msk.f32.vlgmr.msra.gmra.mrb[0].mxu1 %vm478_vm0, %v586_v12  ;;  %v339_v24 = vld [vmem:[%s5755_s24 + $0x8] sm:$0xff]  ;;  %v341_v26 = vld [vmem:[%s5755_s24 + $0x18] sm:$0xff] }
  0x18   : > { %501 = vst.msk [vmem:[#allocation2 + $0x150] sm:$0x1] %vm487_vm1, %v5614_v3  ;;  %502 = vst.msk [vmem:[#allocation2 + $0x168] sm:$0x1] %vm487_vm1, %v5614_v3  ;;  %v333_v15 = vadd.f32 1e-05, %v332_v13  ;;  %4937 = vmatpush3.msra.mxu1 %v584_v2 }
  0x19   : > { %503 = vst.msk [vmem:[#allocation2 + $0x180] sm:$0x1] %vm487_vm1, %v5614_v3  ;;  %505 = vst.msk [vmem:[#allocation2 + $0x41] sm:$0x1] %vm487_vm1, %v5614_v3  ;;  %4986 = vmatprep.subr.mxu1 %v5741_v14  ;;  %v342_v27 = vld [vmem:[%s5755_s24 + $0x20] sm:$0xff]  ;;  %v343_v30 = vld [vmem:[%s5755_s24 + $0x28] sm:$0xff] }
  0x1a   : > { %506 = vst.msk [vmem:[#allocation2 + $0x59] sm:$0x1] %vm487_vm1, %v5614_v3  ;;  %507 = vst.msk [vmem:[#allocation2 + $0x71] sm:$0x1] %vm487_vm1, %v5614_v3  ;;  %5603 = vrsqrt.f32 %v333_v15  ;;  %v344_v31 = vld [vmem:[%s5755_s24 + $0x30] sm:$0xff]  ;;  %v345_v32 = vld [vmem:[%s5755_s24 + $0x38] sm:$0xff] }
  0x1b   : > { %508 = vst.msk [vmem:[#allocation2 + $0x89] sm:$0x1] %vm487_vm1, %v5614_v3  ;;  %509 = vst.msk [vmem:[#allocation2 + $0xa1] sm:$0x1] %vm487_vm1, %v5614_v3  ;;  %v346_v33 = vld [vmem:[%s5755_s24 + $0x40] sm:$0xff]  ;;  %v347_v34 = vld [vmem:[%s5755_s24 + $0x48] sm:$0xff] }
  0x1c   : > { %510 = vst.msk [vmem:[#allocation2 + $0xb9] sm:$0x1] %vm487_vm1, %v5614_v3  ;;  %511 = vst.msk [vmem:[#allocation2 + $0xd1] sm:$0x1] %vm487_vm1, %v5614_v3  ;;  %v348_v35 = vld [vmem:[%s5755_s24 + $0x50] sm:$0xff]  ;;  %v349_v40 = vld [vmem:[%s5755_s24 + $0x58] sm:$0xff] }
  0x1d   : > { %512 = vst.msk [vmem:[#allocation2 + $0xe9] sm:$0x1] %vm487_vm1, %v5614_v3  ;;  %513 = vst.msk [vmem:[#allocation2 + $0x101] sm:$0x1] %vm487_vm1, %v5614_v3  ;;  %v350_v41 = vld [vmem:[%s5755_s24 + $0x60] sm:$0xff]  ;;  %v351_v42 = vld [vmem:[%s5755_s24 + $0x68] sm:$0xff] }
  0x1e   : > { %514 = vst.msk [vmem:[#allocation2 + $0x119] sm:$0x1] %vm487_vm1, %v5614_v3  ;;  %515 = vst.msk [vmem:[#allocation2 + $0x131] sm:$0x1] %vm487_vm1, %v5614_v3  ;;  %v352_v4 = vld [vmem:[%s5755_s24 + $0x70] sm:$0xff]  ;;  %v353_v5 = vld [vmem:[%s5755_s24 + $0x78] sm:$0xff] }
  0x1f   : > { %516 = vst.msk [vmem:[#allocation2 + $0x149] sm:$0x1] %vm487_vm1, %v5614_v3  ;;  %517 = vst.msk [vmem:[#allocation2 + $0x161] sm:$0x1] %vm487_vm1, %v5614_v3  ;;  %v354_v16 = vld [vmem:[%s5755_s24 + $0x80] sm:$0xff] }
  0x20   : > { %518 = vst.msk [vmem:[#allocation2 + $0x179] sm:$0x1] %vm487_vm1, %v5614_v3  ;;  %519 = vst.msk [vmem:[#allocation2 + $0x191] sm:$0x1] %vm487_vm1, %v5614_v3 }
  0x24   : > { %v5604_v20 = vpop.eup %5603 }
  0x25   : > { %v335_v22 = vmul.f32 %v5604_v20, %v325_v18 }
  0x27   : > { %v336_v28 = vmul.f32 %v335_v22, %v5693_v6  ;;  %v5769_v29 = vrot.slane %v335_v22, %v373_v19  ;;  %v356_v22 = vld [vmem:[%s5755_s24 + $0x90] sm:$0xff] }
  0x29   : > { %v337_v36 = vsub.f32 %v326_v21, %v336_v28  ;;  %v376_v37 = vmul.f32 %v5769_v29, %v338_v23  ;;  %v377_v38 = vmul.f32 %v5769_v29, %v339_v24  ;;  %v378_v39 = vmul.f32 %v5769_v29, %v340_v25  ;;  %v355_v21 = vld [vmem:[%s5755_s24 + $0x88] sm:$0xff]  ;;  %v357_v23 = vld [vmem:[%s5755_s24 + $0x98] sm:$0xff]  ;;  %v358_v28 = vld [vmem:[%s5755_s24 + $0xa0] sm:$0xff] }
  0x2a   : > { %v379_v43 = vmul.f32 %v5769_v29, %v341_v26  ;;  %v380_v44 = vmul.f32 %v5769_v29, %v342_v27  ;;  %v381_v45 = vmul.f32 %v5769_v29, %v343_v30  ;;  %v382_v46 = vmul.f32 %v5769_v29, %v344_v31  ;;  %v359_v30 = vld [vmem:[%s5755_s24 + $0xa8] sm:$0xff] }
  0x2b   : > { %v5787_v47 = vrot.slane %v337_v36, %v373_v19  ;;  %v383_v48 = vmul.f32 %v5769_v29, %v345_v32  ;;  %v384_v49 = vmul.f32 %v5769_v29, %v346_v33  ;;  %v385_v50 = vmul.f32 %v5769_v29, %v347_v34 }
  0x2c   : > { %v386_v51 = vmul.f32 %v5769_v29, %v348_v35  ;;  %v387_v52 = vmul.f32 %v5769_v29, %v349_v40  ;;  %v388_v53 = vmul.f32 %v5769_v29, %v350_v41  ;;  %v389_v54 = vmul.f32 %v5769_v29, %v351_v42  ;;  %v361_v40 = vld [vmem:[%s5755_s24 + $0xb8] sm:$0xff] }
  0x2d   : > { %v414_v55 = vadd.f32 %v5787_v47, %v376_v37  ;;  %v415_v56 = vadd.f32 %v5787_v47, %v377_v38  ;;  %v416_v57 = vadd.f32 %v5787_v47, %v378_v39  ;;  %v417_v58 = vadd.f32 %v5787_v47, %v379_v43  ;;  %v360_v39 = vld [vmem:[%s5755_s24 + $0xb0] sm:$0xff] }
  0x2e   : > { %v418_v59 = vadd.f32 %v5787_v47, %v380_v44  ;;  %v419_v60 = vadd.f32 %v5787_v47, %v381_v45  ;;  %v420_v61 = vadd.f32 %v5787_v47, %v382_v46  ;;  %v421_v62 = vadd.f32 %v5787_v47, %v383_v48  ;;  %v362_v45 = vld [vmem:[%s5755_s24 + $0xc0] sm:$0xff]  ;;  %v5849_v48 = vld [vmem:[%s6849_s5 + $0x30] sm:$0xff] }
  0x2f   : > { %v446_v63 = vmax.f32 %v414_v55, 0.0  ;;  %v447_v0 = vmax.f32 %v415_v56, 0.0  ;;  %v448_v2 = vmax.f32 %v416_v57, 0.0  ;;  %v449_v3 = vmax.f32 %v417_v58, 0.0 }
  0x30   : > { %v450_v6 = vmax.f32 %v418_v59, 0.0  ;;  %v451_v7 = vmax.f32 %v419_v60, 0.0  ;;  %v452_v9 = vmax.f32 %v420_v61, 0.0  ;;  %v453_v10 = vmax.f32 %v421_v62, 0.0 }
  0x31   : > { %520 = vst.msk [vmem:[#allocation2 + $0x19] sm:$0xff] %vm478_vm0, %v446_v63  ;;  %521 = vst.msk [vmem:[#allocation2 + $0x21] sm:$0xff] %vm478_vm0, %v447_v0  ;;  %v422_v11 = vadd.f32 %v5787_v47, %v384_v49  ;;  %v423_v12 = vadd.f32 %v5787_v47, %v385_v50  ;;  %v424_v13 = vadd.f32 %v5787_v47, %v386_v51  ;;  %v364_v0 = vld [vmem:[%s5755_s24 + $0xd0] sm:$0xff] }
  0x32   : > { %522 = vst.msk [vmem:[#allocation2 + $0x31] sm:$0xff] %vm478_vm0, %v448_v2  ;;  %523 = vst.msk [vmem:[#allocation2 + $0x39] sm:$0xff] %vm478_vm0, %v449_v3  ;;  %v425_v15 = vadd.f32 %v5787_v47, %v387_v52  ;;  %v426_v17 = vadd.f32 %v5787_v47, %v388_v53  ;;  %v427_v18 = vadd.f32 %v5787_v47, %v389_v54  ;;  %v363_v52 = vld [vmem:[%s5755_s24 + $0xc8] sm:$0xff]  ;;  %v365_v2 = vld [vmem:[%s5755_s24 + $0xd8] sm:$0xff] }
  0x33   : > { %524 = vst.msk [vmem:[#allocation2 + $0x49] sm:$0xff] %vm478_vm0, %v450_v6  ;;  %525 = vst.msk [vmem:[#allocation2 + $0x51] sm:$0xff] %vm478_vm0, %v451_v7  ;;  %v390_v19 = vmul.f32 %v5769_v29, %v352_v4  ;;  %v391_v20 = vmul.f32 %v5769_v29, %v353_v5  ;;  %v454_v24 = vmax.f32 %v422_v11, 0.0  ;;  %v455_v25 = vmax.f32 %v423_v12, 0.0  ;;  %v366_v3 = vld [vmem:[%s5755_s24 + $0xe0] sm:$0xff] }
  0x34   : > { %526 = vst.msk [vmem:[#allocation2 + $0x61] sm:$0xff] %vm478_vm0, %v452_v9  ;;  %527 = vst.msk [vmem:[#allocation2 + $0x69] sm:$0xff] %vm478_vm0, %v453_v10  ;;  %v456_v26 = vmax.f32 %v424_v13, 0.0  ;;  %v457_v27 = vmax.f32 %v425_v15, 0.0  ;;  %v458_v31 = vmax.f32 %v426_v17, 0.0  ;;  %v459_v32 = vmax.f32 %v427_v18, 0.0 }
  0x35   : > { %v428_v33 = vadd.f32 %v5787_v47, %v390_v19  ;;  %v429_v34 = vadd.f32 %v5787_v47, %v391_v20  ;;  %528 = vst.msk [vmem:[#allocation2 + $0x79] sm:$0xff] %vm478_vm0, %v454_v24  ;;  %529 = vst.msk [vmem:[#allocation2 + $0x81] sm:$0xff] %vm478_vm0, %v455_v25  ;;  %v392_v35 = vmul.f32 %v5769_v29, %v354_v16  ;;  %v367_v9 = vld [vmem:[%s5755_s24 + $0xe8] sm:$0xff]  ;;  %v368_v19 = vld [vmem:[%s5755_s24 + $0xf0] sm:$0xff] }
  0x36   : > { %530 = vst.msk [vmem:[#allocation2 + $0x91] sm:$0xff] %vm478_vm0, %v456_v26  ;;  %531 = vst.msk [vmem:[#allocation2 + $0x99] sm:$0xff] %vm478_vm0, %v457_v27  ;;  %v393_v36 = vmul.f32 %v5769_v29, %v355_v21  ;;  %v394_v37 = vmul.f32 %v5769_v29, %v356_v22  ;;  %v395_v38 = vmul.f32 %v5769_v29, %v357_v23  ;;  %v369_v20 = vld [vmem:[%s5755_s24 + $0xf8] sm:$0xff]  ;;  %s319_s24 = scalar_lea.vmem %s6851_s7, %s6958_s28 }
  0x37   : > { %532 = vst.msk [vmem:[#allocation2 + $0xa9] sm:$0xff] %vm478_vm0, %v458_v31  ;;  %533 = vst.msk [vmem:[#allocation2 + $0xb1] sm:$0xff] %vm478_vm0, %v459_v32  ;;  %v460_v41 = vmax.f32 %v428_v33, 0.0  ;;  %v461_v42 = vmax.f32 %v429_v34, 0.0  ;;  %v396_v43 = vmul.f32 %v5769_v29, %v358_v28  ;;  %v397_v44 = vmul.f32 %v5769_v29, %v359_v30 }
  0x38   : > { %v430_v46 = vadd.f32 %v5787_v47, %v392_v35  ;;  %v431_v49 = vadd.f32 %v5787_v47, %v393_v36  ;;  %v432_v50 = vadd.f32 %v5787_v47, %v394_v37  ;;  %v433_v51 = vadd.f32 %v5787_v47, %v395_v38  ;;  %v587_v53 = vld [vmem:[#allocation2 + $0x19] sm:$0xff]  ;;  %v588_v54 = vld [vmem:[#allocation2 + $0x21] sm:$0xff] }
  0x39   : > { %v5855_v55 = vld [vmem:[#allocation2 + $0x31] sm:$0xff]  ;;  %534 = vst.msk [vmem:[#allocation2 + $0xc1] sm:$0xff] %vm478_vm0, %v460_v41  ;;  %535 = vst.msk [vmem:[#allocation2 + $0xc9] sm:$0xff] %vm478_vm0, %v461_v42  ;;  %v434_v56 = vadd.f32 %v5787_v47, %v396_v43  ;;  %v435_v57 = vadd.f32 %v5787_v47, %v397_v44  ;;  %v398_v58 = vmul.f32 %v5769_v29, %v360_v39  ;;  %4891 = vmatprep.mubr.msk.f32.mxu1 %vm478_vm0, %v587_v53  ;;  %v5876_v10 = vld [vmem:[#allocation2 + $0x39] sm:$0xff] }
  0x3a   : > { %v399_v59 = vmul.f32 %v5769_v29, %v361_v40  ;;  %5088 = vmatprep.mubr.msk.f32.mxu0 %vm478_vm0, %v587_v53  ;;  %v462_v60 = vmax.f32 %v430_v46, 0.0  ;;  %v463_v61 = vmax.f32 %v431_v49, 0.0  ;;  %v464_v62 = vmax.f32 %v432_v50, 0.0  ;;  %4892 = vmatmul.mubr.msk.f32.gmra.mrb[2].mxu1 %vm478_vm0, %v588_v54  ;;  %v5911_v28 = vld [vmem:[#allocation2 + $0x51] sm:$0xff]  ;;  %v5989_v53 = vld [vmem:[#allocation2 + $0x1a] sm:$0xff] }
  0x3b   : > { %v400_v63 = vmul.f32 %v5769_v29, %v362_v45  ;;  %5089 = vmatmul.mubr.msk.f32.vlgmr.msra.gmra.mrb[0].mxu0 %vm478_vm0, %v588_v54  ;;  %v465_v4 = vmax.f32 %v433_v51, 0.0  ;;  %v466_v5 = vmax.f32 %v434_v56, 0.0  ;;  %v467_v6 = vmax.f32 %v435_v57, 0.0  ;;  %4894 = vmatprep.mubr.msk.f32.mxu1 %vm478_vm0, %v5855_v55  ;;  %v5918_v34 = vld [vmem:[#allocation2 + $0x61] sm:$0xff] }
  0x3c   : > { %v436_v7 = vadd.f32 %v5787_v47, %v398_v58  ;;  %5137 = vmatpush3.msra.mxu0 %v5698_v8  ;;  %536 = vst.msk [vmem:[#allocation2 + $0xd9] sm:$0xff] %vm478_vm0, %v462_v60  ;;  %537 = vst.msk [vmem:[#allocation2 + $0xe1] sm:$0xff] %vm478_vm0, %v463_v61  ;;  %v437_v11 = vadd.f32 %v5787_v47, %v399_v59  ;;  %v401_v13 = vmul.f32 %v5769_v29, %v363_v52  ;;  %v5886_v8 = vld [vmem:[#allocation2 + $0x49] sm:$0xff]  ;;  %v5937_v42 = vld [vmem:[#allocation2 + $0x79] sm:$0xff] }
  0x3d   : > { %538 = vst.msk [vmem:[#allocation2 + $0xf1] sm:$0xff] %vm478_vm0, %v464_v62  ;;  %v438_v12 = vadd.f32 %v5787_v47, %v400_v63  ;;  %5091 = vmatprep.mubr.msk.f32.mxu0 %vm478_vm0, %v5855_v55  ;;  %5186 = vmatprep.subr.mxu0 %v5849_v48  ;;  %539 = vst.msk [vmem:[#allocation2 + $0xf9] sm:$0xff] %vm478_vm0, %v465_v4  ;;  %v402_v16 = vmul.f32 %v5769_v29, %v364_v0  ;;  %v5949_v43 = vld [vmem:[#allocation2 + $0x81] sm:$0xff]  ;;  %v5951_v44 = vld [vmem:[#allocation2 + $0x91] sm:$0xff] }
  0x3e   : > { %540 = vst.msk [vmem:[#allocation2 + $0x109] sm:$0xff] %vm478_vm0, %v466_v5  ;;  %541 = vst.msk [vmem:[#allocation2 + $0x111] sm:$0xff] %vm478_vm0, %v467_v6  ;;  %v468_v15 = vmax.f32 %v436_v7, 0.0  ;;  %v403_v17 = vmul.f32 %v5769_v29, %v365_v2  ;;  %v404_v18 = vmul.f32 %v5769_v29, %v366_v3  ;;  %v469_v21 = vmax.f32 %v437_v11, 0.0  ;;  %4895 = vmatmul.mubr.msk.f32.gmra.mrb[4].mxu1 %vm478_vm0, %v5876_v10  ;;  %v5961_v45 = vld [vmem:[#allocation2 + $0x99] sm:$0xff]  ;;  %v5963_v46 = vld [vmem:[#allocation2 + $0xa9] sm:$0xff] }
  0x3f   : > { %v470_v22 = vmax.f32 %v438_v12, 0.0  ;;  %v439_v23 = vadd.f32 %v5787_v47, %v401_v13  ;;  %v405_v24 = vmul.f32 %v5769_v29, %v367_v9  ;;  %5092 = vmatmul.mubr.msk.f32.gmra.mrb[2].mxu0 %vm478_vm0, %v5876_v10  ;;  %v440_v25 = vadd.f32 %v5787_v47, %v402_v16  ;;  %4897 = vmatprep.mubr.msk.f32.mxu1 %vm478_vm0, %v5886_v8  ;;  %v5973_v49 = vld [vmem:[#allocation2 + $0xb1] sm:$0xff]  ;;  %v6001_v56 = vld [vmem:[#allocation2 + $0x22] sm:$0xff]  ;;  %v6021_v61 = vld [vmem:[#allocation2 + $0x3a] sm:$0xff] }
  0x40   : > { %542 = vst.msk [vmem:[#allocation2 + $0x121] sm:$0xff] %vm478_vm0, %v468_v15  ;;  %v441_v26 = vadd.f32 %v5787_v47, %v403_v17  ;;  %v442_v27 = vadd.f32 %v5787_v47, %v404_v18  ;;  %5094 = vmatprep.mubr.msk.f32.mxu0 %vm478_vm0, %v5886_v8  ;;  %543 = vst.msk [vmem:[#allocation2 + $0x129] sm:$0xff] %vm478_vm0, %v469_v21  ;;  %v406_v32 = vmul.f32 %v5769_v29, %v368_v19  ;;  %v5975_v50 = vld [vmem:[#allocation2 + $0xc1] sm:$0xff]  ;;  %v5985_v51 = vld [vmem:[#allocation2 + $0xc9] sm:$0xff] }
  0x41   : > { %544 = vst.msk [vmem:[#allocation2 + $0x139] sm:$0xff] %vm478_vm0, %v470_v22  ;;  %v471_v30 = vmax.f32 %v439_v23, 0.0  ;;  %v443_v31 = vadd.f32 %v5787_v47, %v405_v24  ;;  %v407_v33 = vmul.f32 %v5769_v29, %v369_v20  ;;  %v472_v35 = vmax.f32 %v440_v25, 0.0  ;;  %v5934_v29 = vld [vmem:[#allocation2 + $0x69] sm:$0xff]  ;;  %6895 = vst [vmem:[#allocation3_spill] sm:$0xff] %v5985_v51  ;;  %v6005_v58 = vld [vmem:[#allocation2 + $0x32] sm:$0xff] }
  0x42   : > { %v473_v36 = vmax.f32 %v441_v26, 0.0  ;;  %v474_v37 = vmax.f32 %v442_v27, 0.0  ;;  %v444_v39 = vadd.f32 %v5787_v47, %v406_v32  ;;  %4898 = vmatmul.mubr.msk.f32.gmra.mrb[6].mxu1 %vm478_vm0, %v5911_v28  ;;  %v6010_v59 = vld [vmem:[%s6849_s5 + $0x38] sm:$0xff]  ;;  %v6027_v63 = vld [vmem:[#allocation2 + $0x4a] sm:$0xff]  ;;  %v6044_v3 = vld [vmem:[#allocation2 + $0x62] sm:$0xff] }
  0x43   : > { %545 = vst.msk [vmem:[#allocation2 + $0x141] sm:$0xff] %vm478_vm0, %v471_v30  ;;  %v475_v38 = vmax.f32 %v443_v31, 0.0  ;;  %v445_v40 = vadd.f32 %v5787_v47, %v407_v33  ;;  %5095 = vmatmul.mubr.msk.f32.gmra.mrb[4].mxu0 %vm478_vm0, %v5911_v28  ;;  %546 = vst.msk [vmem:[#allocation2 + $0x151] sm:$0xff] %vm478_vm0, %v472_v35  ;;  %4900 = vmatprep.mubr.msk.f32.mxu1 %vm478_vm0, %v5918_v34  ;;  %v5987_v52 = vld [vmem:[#allocation2 + $0xd9] sm:$0xff]  ;;  %v5999_v54 = vld [vmem:[#allocation2 + $0xe1] sm:$0xff] }
  0x44   : > { %547 = vst.msk [vmem:[#allocation2 + $0x159] sm:$0xff] %vm478_vm0, %v473_v36  ;;  %548 = vst.msk [vmem:[#allocation2 + $0x169] sm:$0xff] %vm478_vm0, %v474_v37  ;;  %5097 = vmatprep.mubr.msk.f32.mxu0 %vm478_vm0, %v5918_v34  ;;  %v476_v47 = vmax.f32 %v444_v39, 0.0  ;;  %v6003_v57 = vld [vmem:[#allocation2 + $0xf1] sm:$0xff]  ;;  %v6019_v60 = vld [vmem:[#allocation2 + $0xf9] sm:$0xff] }
  0x45   : > { %549 = vst.msk [vmem:[#allocation2 + $0x171] sm:$0xff] %vm478_vm0, %v475_v38  ;;  %v477_v41 = vmax.f32 %v445_v40, 0.0  ;;  %6896 = vst [vmem:[#allocation4_spill] sm:$0xff] %v5987_v52  ;;  %v6025_v62 = vld [vmem:[#allocation2 + $0x109] sm:$0xff]  ;;  %v6040_v0 = vld [vmem:[#allocation2 + $0x52] sm:$0xff] }
  0x46   : > { %550 = vst.msk [vmem:[#allocation2 + $0x181] sm:$0xff] %vm478_vm0, %v476_v47  ;;  %4901 = vmatmul.mubr.msk.f32.gmra.mrb[8].mxu1 %vm478_vm0, %v5934_v29  ;;  %6897 = vst [vmem:[#allocation5_spill] sm:$0xff] %v5999_v54  ;;  %v6056_v5 = vld [vmem:[#allocation2 + $0x6a] sm:$0xff]  ;;  %v6060_v7 = vld [vmem:[#allocation2 + $0x7a] sm:$0xff] }
  0x47   : > { %551 = vst.msk [vmem:[#allocation2 + $0x189] sm:$0xff] %vm478_vm0, %v477_v41  ;;  %5098 = vmatmul.mubr.msk.f32.gmra.mrb[6].mxu0 %vm478_vm0, %v5934_v29  ;;  %4903 = vmatprep.mubr.msk.f32.mxu1 %vm478_vm0, %v5937_v42  ;;  %6898 = vst [vmem:[#allocation6_spill] sm:$0xff] %v6003_v57  ;;  %v6042_v2 = vld [vmem:[#allocation2 + $0x121] sm:$0xff]  ;;  %v6054_v4 = vld [vmem:[#allocation2 + $0x129] sm:$0xff] }
  0x48   : > { %5100 = vmatprep.mubr.msk.f32.mxu0 %vm478_vm0, %v5937_v42  ;;  %6899 = vst [vmem:[#allocation7_spill] sm:$0xff] %v6019_v60  ;;  %6900 = vst [vmem:[#allocation8_spill] sm:$0xff] %v6025_v62  ;;  %v6058_v6 = vld [vmem:[#allocation2 + $0x139] sm:$0xff]  ;;  %v6072_v11 = vld [vmem:[#allocation2 + $0x82] sm:$0xff] }
  0x49   : > { %6902 = vst [vmem:[#allocation10_spill] sm:$0xff] %v6042_v2  ;;  %6903 = vst [vmem:[#allocation11_spill] sm:$0xff] %v6054_v4  ;;  %v6076_v13 = vld [vmem:[#allocation2 + $0x92] sm:$0xff]  ;;  %v6088_v16 = vld [vmem:[#allocation2 + $0x9a] sm:$0xff] }
  0x4a   : > { %4904 = vmatmul.mubr.msk.f32.gmra.mrb[10].mxu1 %vm478_vm0, %v5949_v43  ;;  %6904 = vst [vmem:[#allocation12_spill] sm:$0xff] %v6058_v6  ;;  %v6070_v9 = vld [vmem:[#allocation2 + $0x141] sm:$0xff]  ;;  %v6074_v12 = vld [vmem:[#allocation2 + $0x151] sm:$0xff] }
  0x4b   : > { %5101 = vmatmul.mubr.msk.f32.gmra.mrb[8].mxu0 %vm478_vm0, %v5949_v43  ;;  %4906 = vmatprep.mubr.msk.f32.mxu1 %vm478_vm0, %v5951_v44  ;;  %6905 = vst [vmem:[#allocation13_spill] sm:$0xff] %v6070_v9  ;;  %6906 = vst [vmem:[#allocation14_spill] sm:$0xff] %v6074_v12  ;;  %v6086_v15 = vld [vmem:[#allocation2 + $0x159] sm:$0xff]  ;;  %v6090_v17 = vld [vmem:[#allocation2 + $0x169] sm:$0xff] }
  0x4c   : > { %5103 = vmatprep.mubr.msk.f32.mxu0 %vm478_vm0, %v5951_v44  ;;  %6907 = vst [vmem:[#allocation15_spill] sm:$0xff] %v6086_v15  ;;  %6908 = vst [vmem:[#allocation16_spill] sm:$0xff] %v6090_v17  ;;  %v6092_v18 = vld [vmem:[#allocation2 + $0xaa] sm:$0xff]  ;;  %v6104_v20 = vld [vmem:[#allocation2 + $0xb2] sm:$0xff] }
  0x4d   : > { %v6102_v19 = vld [vmem:[#allocation2 + $0x171] sm:$0xff]  ;;  %v552_v21 = vld [vmem:[#allocation2] sm:$0xff]  ;;  %v553_v23 = vld [vmem:[#allocation2 + $0x8] sm:$0xff] }
  0x4e   : > { %4907 = vmatmul.mubr.msk.f32.gmra.mrb[12].mxu1 %vm478_vm0, %v5961_v45  ;;  %6909 = vst [vmem:[#allocation17_spill] sm:$0xff] %v6102_v19  ;;  %v6106_v22 = vld [vmem:[#allocation2 + $0xc2] sm:$0xff]  ;;  %v6115_v24 = vld [vmem:[#allocation2 + $0xca] sm:$0xff]  ;;  %v6117_v25 = vld [vmem:[#allocation2 + $0x18] sm:$0xff] }
  0x4f   : > { %5104 = vmatmul.mubr.msk.f32.gmra.mrb[10].mxu0 %vm478_vm0, %v5961_v45  ;;  %4909 = vmatprep.mubr.msk.f32.mxu1 %vm478_vm0, %v5963_v46  ;;  %6910 = vst [vmem:[#allocation18_spill] sm:$0xff] %v6117_v25  ;;  %v6119_v26 = vld [vmem:[#allocation2 + $0xda] sm:$0xff]  ;;  %v6135_v31 = vld [vmem:[#allocation2 + $0xe2] sm:$0xff]  ;;  %v6138_v32 = vld [vmem:[#allocation2 + $0x30] sm:$0xff] }
  0x50   : > { %5106 = vmatprep.mubr.msk.f32.mxu0 %vm478_vm0, %v5963_v46  ;;  %v6127_v27 = vld [vmem:[%s6849_s5 + $0x18] sm:$0xff]  ;;  %v6133_v30 = vld [vmem:[#allocation2 + $0x20] sm:$0xff]  ;;  %6912 = vst [vmem:[#allocation20_spill] sm:$0xff] %v6138_v32  ;;  %v6155_v36 = vld [vmem:[#allocation2 + $0x48] sm:$0xff] }
  0x51   : > { %6911 = vst [vmem:[#allocation19_spill] sm:$0xff] %v6133_v30  ;;  %v6140_v33 = vld [vmem:[#allocation2 + $0xf2] sm:$0xff]  ;;  %6914 = vst [vmem:[#allocation22_spill] sm:$0xff] %v6155_v36  ;;  %v6157_v37 = vld [vmem:[#allocation2 + $0x10a] sm:$0xff] }
  0x52   : > { %4910 = vmatmul.mubr.msk.f32.gmra.mrb[14].mxu1 %vm478_vm0, %v5973_v49  ;;  %v6151_v35 = vld [vmem:[#allocation2 + $0x38] sm:$0xff]  ;;  %v6167_v38 = vld [vmem:[#allocation2 + $0x50] sm:$0xff]  ;;  %v6171_v40 = vld [vmem:[#allocation2 + $0x60] sm:$0xff] }
  0x53   : > { %5107 = vmatmul.mubr.msk.f32.gmra.mrb[12].mxu0 %vm478_vm0, %v5973_v49  ;;  %4912 = vmatprep.mubr.msk.f32.mxu1 %vm478_vm0, %v5975_v50  ;;  %6913 = vst [vmem:[#allocation21_spill] sm:$0xff] %v6151_v35  ;;  %6915 = vst [vmem:[#allocation23_spill] sm:$0xff] %v6167_v38  ;;  %v6169_v39 = vld [vmem:[#allocation2 + $0x112] sm:$0xff]  ;;  %v6173_v47 = vld [vmem:[#allocation2 + $0x122] sm:$0xff] }
  0x54   : > { %5109 = vmatprep.mubr.msk.f32.mxu0 %vm478_vm0, %v5975_v50  ;;  %6916 = vst [vmem:[#allocation24_spill] sm:$0xff] %v6171_v40  ;;  %v6183_v41 = vld [vmem:[#allocation2 + $0x68] sm:$0xff] }
  0x55   : > { %6917 = vst [vmem:[#allocation25_spill] sm:$0xff] %v6183_v41 }
  0x56   : > { %4913 = vmatmul.mubr.msk.f32.gmra.mrb[16].mxu1 %vm478_vm0, %v5985_v51 }
  0x57   : > { %5110 = vmatmul.mubr.msk.f32.gmra.mrb[14].mxu0 %vm478_vm0, %v5985_v51  ;;  %4915 = vmatprep.mubr.msk.f32.mxu1 %vm478_vm0, %v5987_v52  ;;  %v6249_v52 = vld [vmem:[#allocation2 + $0x18a] sm:$0xff]  ;;  %v6261_v51 = vld [vmem:[#allocation2 + $0xe0] sm:$0xff] }
  0x58   : > { %5138 = vmatprep.mubr.msk.f32.mxu0 %vm478_vm0, %v5989_v53  ;;  %6925 = vst [vmem:[#allocation33_spill] sm:$0xff] %v6249_v52 }
  0x5a   : > { %4916 = vmatmul.mubr.msk.f32.gmra.mrb[18].mxu1 %vm478_vm0, %v5999_v54  ;;  %v6237_v54 = vld [vmem:[#allocation2 + $0x182] sm:$0xff] }
  0x5b   : > { %5139 = vmatmul.mubr.msk.f32.vlgmr.msra.gmra.mrb[0].mxu0 %vm478_vm0, %v6001_v56  ;;  %4918 = vmatprep.mubr.msk.f32.mxu1 %vm478_vm0, %v6003_v57  ;;  %v6235_v57 = vld [vmem:[#allocation2 + $0xc0] sm:$0xff]  ;;  %6924 = vst [vmem:[#allocation32_spill] sm:$0xff] %v6237_v54 }
  0x5c   : > { %5187 = vmatpush3.msra.mxu0 %v5849_v48  ;;  %5141 = vmatprep.mubr.msk.f32.mxu0 %vm478_vm0, %v6005_v58  ;;  %v6038_v48 = vld [vmem:[#allocation2 + $0x111] sm:$0xff] }
  0x5d   : > { %5236 = vmatprep.subr.mxu0 %v6010_v59  ;;  %6901 = vst [vmem:[#allocation9_spill] sm:$0xff] %v6038_v48 }
  0x5e   : > { %4919 = vmatmul.mubr.msk.f32.gmra.mrb[20].mxu1 %vm478_vm0, %v6019_v60  ;;  %v6233_v60 = vld [vmem:[#allocation2 + $0x172] sm:$0xff] }
  0x5f   : > { %5142 = vmatmul.mubr.msk.f32.gmra.mrb[2].mxu0 %vm478_vm0, %v6021_v61  ;;  %4921 = vmatprep.mubr.msk.f32.mxu1 %vm478_vm0, %v6025_v62  ;;  %v6231_v62 = vld [vmem:[#allocation2 + $0xb0] sm:$0xff]  ;;  %6923 = vst [vmem:[#allocation31_spill] sm:$0xff] %v6233_v60 }
  0x60   : > { %5144 = vmatprep.mubr.msk.f32.mxu0 %vm478_vm0, %v6027_v63  ;;  %6922 = vst [vmem:[#allocation30_spill] sm:$0xff] %v6231_v62 }
  0x62   : > { %4922 = vmatmul.mubr.msk.f32.gmra.mrb[22].mxu1 %vm478_vm0, %v6038_v48  ;;  %v6221_v48 = vld [vmem:[#allocation2 + $0x16a] sm:$0xff] }
  0x63   : > { %5145 = vmatmul.mubr.msk.f32.gmra.mrb[4].mxu0 %vm478_vm0, %v6040_v0  ;;  %4924 = vmatprep.mubr.msk.f32.mxu1 %vm478_vm0, %v6042_v2  ;;  %v6219_v2 = vld [vmem:[#allocation2 + $0xa8] sm:$0xff] }
  0x64   : > { %5147 = vmatprep.mubr.msk.f32.mxu0 %vm478_vm0, %v6044_v3 }
  0x66   : > { %4925 = vmatmul.mubr.msk.f32.gmra.mrb[24].mxu1 %vm478_vm0, %v6054_v4  ;;  %v6217_v4 = vld [vmem:[#allocation2 + $0x15a] sm:$0xff] }
  0x67   : > { %5148 = vmatmul.mubr.msk.f32.gmra.mrb[6].mxu0 %vm478_vm0, %v6056_v5  ;;  %4927 = vmatprep.mubr.msk.f32.mxu1 %vm478_vm0, %v6058_v6  ;;  %v6215_v6 = vld [vmem:[#allocation2 + $0x98] sm:$0xff] }
  0x68   : > { %5150 = vmatprep.mubr.msk.f32.mxu0 %vm478_vm0, %v6060_v7  ;;  %6921 = vst [vmem:[#allocation29_spill] sm:$0xff] %v6215_v6 }
  0x6a   : > { %4928 = vmatmul.mubr.msk.f32.gmra.mrb[26].mxu1 %vm478_vm0, %v6070_v9  ;;  %v6205_v9 = vld [vmem:[#allocation2 + $0x152] sm:$0xff] }
  0x6b   : > { %5151 = vmatmul.mubr.msk.f32.gmra.mrb[8].mxu0 %vm478_vm0, %v6072_v11  ;;  %4930 = vmatprep.mubr.msk.f32.mxu1 %vm478_vm0, %v6074_v12  ;;  %v6203_v12 = vld [vmem:[#allocation2 + $0x90] sm:$0xff] }
  0x6c   : > { %5153 = vmatprep.mubr.msk.f32.mxu0 %vm478_vm0, %v6076_v13  ;;  %6920 = vst [vmem:[#allocation28_spill] sm:$0xff] %v6203_v12 }
  0x6e   : > { %4931 = vmatmul.mubr.msk.f32.gmra.mrb[28].mxu1 %vm478_vm0, %v6086_v15  ;;  %v6201_v15 = vld [vmem:[#allocation2 + $0x142] sm:$0xff] }
  0x6f   : > { %5154 = vmatmul.mubr.msk.f32.gmra.mrb[10].mxu0 %vm478_vm0, %v6088_v16  ;;  %4933 = vmatprep.mubr.msk.f32.mxu1 %vm478_vm0, %v6090_v17  ;;  %v6199_v17 = vld [vmem:[#allocation2 + $0x80] sm:$0xff] }
  0x70   : > { %5156 = vmatprep.mubr.msk.f32.mxu0 %vm478_vm0, %v6092_v18  ;;  %6919 = vst [vmem:[#allocation27_spill] sm:$0xff] %v6199_v17 }
  0x72   : > { %4934 = vmatmul.mubr.msk.f32.gmra.mrb[30].mxu1 %vm478_vm0, %v6102_v19  ;;  %v6189_v19 = vld [vmem:[#allocation2 + $0x13a] sm:$0xff] }
  0x73   : > { %5157 = vmatmul.mubr.msk.f32.gmra.mrb[12].mxu0 %vm478_vm0, %v6104_v20  ;;  %4938 = vmatprep.mubr.msk.f32.mxu1 %vm478_vm0, %v552_v21  ;;  %v6185_v21 = vld [vmem:[#allocation2 + $0x12a] sm:$0xff] }
  0x74   : > { %5159 = vmatprep.mubr.msk.f32.mxu0 %vm478_vm0, %v6106_v22 }
  0x76   : > { %4939 = vmatmul.mubr.msk.f32.vlgmr.msra.gmra.mrb[0].mxu1 %vm478_vm0, %v553_v23  ;;  %v6187_v23 = vld [vmem:[#allocation2 + $0x78] sm:$0xff] }
  0x77   : > { %5160 = vmatmul.mubr.msk.f32.gmra.mrb[14].mxu0 %vm478_vm0, %v6115_v24  ;;  %4941 = vmatprep.mubr.msk.f32.mxu1 %vm478_vm0, %v6117_v25  ;;  %6918 = vst [vmem:[#allocation26_spill] sm:$0xff] %v6187_v23  ;;  %v6251_v25 = vld [vmem:[#allocation2 + $0xd8] sm:$0xff] }
  0x78   : > { %5162 = vmatprep.mubr.msk.f32.mxu0 %vm478_vm0, %v6119_v26  ;;  %4987 = vmatpush3.msra.mxu1 %v5741_v14  ;;  %v6153_v14 = vld [vmem:[#allocation2 + $0xfa] sm:$0xff] }
  0x79   : > { %5036 = vmatprep.subr.mxu1 %v6127_v27 }
  0x7a   : > { %4942 = vmatmul.mubr.msk.f32.gmra.mrb[2].mxu1 %vm478_vm0, %v6133_v30  ;;  %v6247_v30 = vld [vmem:[#allocation2 + $0xc8] sm:$0xff] }
  0x7b   : > { %5163 = vmatmul.mubr.msk.f32.gmra.mrb[16].mxu0 %vm478_vm0, %v6135_v31  ;;  %4944 = vmatprep.mubr.msk.f32.mxu1 %vm478_vm0, %v6138_v32 }
  0x7c   : > { %5165 = vmatprep.mubr.msk.f32.mxu0 %vm478_vm0, %v6140_v33 }
  0x7e   : > { %4945 = vmatmul.mubr.msk.f32.gmra.mrb[4].mxu1 %vm478_vm0, %v6151_v35 }
  0x7f   : > { %5166 = vmatmul.mubr.msk.f32.gmra.mrb[18].mxu0 %vm478_vm0, %v6153_v14  ;;  %4947 = vmatprep.mubr.msk.f32.mxu1 %vm478_vm0, %v6155_v36 }
  0x80   : > { %5168 = vmatprep.mubr.msk.f32.mxu0 %vm478_vm0, %v6157_v37 }
  0x82   : > { %4948 = vmatmul.mubr.msk.f32.gmra.mrb[6].mxu1 %vm478_vm0, %v6167_v38 }
  0x83   : > { %5169 = vmatmul.mubr.msk.f32.gmra.mrb[20].mxu0 %vm478_vm0, %v6169_v39  ;;  %4950 = vmatprep.mubr.msk.f32.mxu1 %vm478_vm0, %v6171_v40 }
  0x84   : > { %5171 = vmatprep.mubr.msk.f32.mxu0 %vm478_vm0, %v6173_v47 }
  0x86   : > { %4951 = vmatmul.mubr.msk.f32.gmra.mrb[8].mxu1 %vm478_vm0, %v6183_v41 }
  0x87   : > { %5172 = vmatmul.mubr.msk.f32.gmra.mrb[22].mxu0 %vm478_vm0, %v6185_v21  ;;  %4953 = vmatprep.mubr.msk.f32.mxu1 %vm478_vm0, %v6187_v23 }
  0x88   : > { %5174 = vmatprep.mubr.msk.f32.mxu0 %vm478_vm0, %v6189_v19 }
  0x8a   : > { %4954 = vmatmul.mubr.msk.f32.gmra.mrb[10].mxu1 %vm478_vm0, %v6199_v17 }
  0x8b   : > { %5175 = vmatmul.mubr.msk.f32.gmra.mrb[24].mxu0 %vm478_vm0, %v6201_v15  ;;  %4956 = vmatprep.mubr.msk.f32.mxu1 %vm478_vm0, %v6203_v12 }
  0x8c   : > { %5177 = vmatprep.mubr.msk.f32.mxu0 %vm478_vm0, %v6205_v9 }
  0x8e   : > { %4957 = vmatmul.mubr.msk.f32.gmra.mrb[12].mxu1 %vm478_vm0, %v6215_v6 }
  0x8f   : > { %5178 = vmatmul.mubr.msk.f32.gmra.mrb[26].mxu0 %vm478_vm0, %v6217_v4  ;;  %4959 = vmatprep.mubr.msk.f32.mxu1 %vm478_vm0, %v6219_v2 }
  0x90   : > { %5180 = vmatprep.mubr.msk.f32.mxu0 %vm478_vm0, %v6221_v48 }
  0x92   : > { %4960 = vmatmul.mubr.msk.f32.gmra.mrb[14].mxu1 %vm478_vm0, %v6231_v62 }
  0x93   : > { %5181 = vmatmul.mubr.msk.f32.gmra.mrb[28].mxu0 %vm478_vm0, %v6233_v60  ;;  %4962 = vmatprep.mubr.msk.f32.mxu1 %vm478_vm0, %v6235_v57  ;;  %v6268_v60 = vld [vmem:[%s6849_s5 + $0x40] sm:$0xff] }
  0x94   : > { %5183 = vmatprep.mubr.msk.f32.mxu0 %vm478_vm0, %v6237_v54  ;;  %v6263_v54 = vld [vmem:[#allocation2 + $0xf0] sm:$0xff] }
  0x96   : > { %4963 = vmatmul.mubr.msk.f32.gmra.mrb[16].mxu1 %vm478_vm0, %v6247_v30 }
  0x97   : > { %5184 = vmatmul.mubr.msk.f32.gmra.mrb[30].mxu0 %vm478_vm0, %v6249_v52  ;;  %4965 = vmatprep.mubr.msk.f32.mxu1 %vm478_vm0, %v6251_v25  ;;  %v6277_v52 = vld [vmem:[#allocation2 + $0xf8] sm:$0xff] }
  0x98   : > { %5188 = vmatprep.mubr.msk.f32.mxu0 %vm478_vm0, %v6138_v32  ;;  %v6281_v32 = vld [vmem:[#allocation2 + $0x108] sm:$0xff] }
  0x9a   : > { %4966 = vmatmul.mubr.msk.f32.gmra.mrb[18].mxu1 %vm478_vm0, %v6261_v51 }
  0x9b   : > { %5189 = vmatmul.mubr.msk.f32.vlgmr.msra.gmra.mrb[0].mxu0 %vm478_vm0, %v6151_v35  ;;  %4968 = vmatprep.mubr.msk.f32.mxu1 %vm478_vm0, %v6263_v54  ;;  %v6294_v35 = vld [vmem:[#allocation2 + $0x120] sm:$0xff] }
  0x9c   : > { %5237 = vmatpush3.msra.mxu0 %v6010_v59  ;;  %5191 = vmatprep.mubr.msk.f32.mxu0 %vm478_vm0, %v6155_v36  ;;  %v6292_v59 = vld [vmem:[#allocation2 + $0x110] sm:$0xff]  ;;  %v6306_v36 = vld [vmem:[#allocation2 + $0x138] sm:$0xff] }
  0x9d   : > { %5286 = vmatprep.subr.mxu0 %v6268_v60 }
  0x9e   : > { %4969 = vmatmul.mubr.msk.f32.gmra.mrb[20].mxu1 %vm478_vm0, %v6277_v52 }
  0x9f   : > { %5192 = vmatmul.mubr.msk.f32.gmra.mrb[2].mxu0 %vm478_vm0, %v6167_v38  ;;  %4971 = vmatprep.mubr.msk.f32.mxu1 %vm478_vm0, %v6281_v32  ;;  %v6304_v38 = vld [vmem:[#allocation2 + $0x128] sm:$0xff] }
  0xa0   : > { %5194 = vmatprep.mubr.msk.f32.mxu0 %vm478_vm0, %v6171_v40  ;;  %v6318_v40 = vld [vmem:[#allocation2 + $0x150] sm:$0xff] }
  0xa2   : > { %4972 = vmatmul.mubr.msk.f32.gmra.mrb[22].mxu1 %vm478_vm0, %v6292_v59 }
  0xa3   : > { %5195 = vmatmul.mubr.msk.f32.gmra.mrb[4].mxu0 %vm478_vm0, %v6183_v41  ;;  %4974 = vmatprep.mubr.msk.f32.mxu1 %vm478_vm0, %v6294_v35  ;;  %v6316_v41 = vld [vmem:[#allocation2 + $0x140] sm:$0xff] }
  0xa4   : > { %5197 = vmatprep.mubr.msk.f32.mxu0 %vm478_vm0, %v6187_v23  ;;  %v6330_v23 = vld [vmem:[#allocation2 + $0x168] sm:$0xff] }
  0xa6   : > { %4975 = vmatmul.mubr.msk.f32.gmra.mrb[24].mxu1 %vm478_vm0, %v6304_v38 }
  0xa7   : > { %5198 = vmatmul.mubr.msk.f32.gmra.mrb[6].mxu0 %vm478_vm0, %v6199_v17  ;;  %4977 = vmatprep.mubr.msk.f32.mxu1 %vm478_vm0, %v6306_v36  ;;  %v6328_v17 = vld [vmem:[#allocation2 + $0x158] sm:$0xff] }
  0xa8   : > { %5200 = vmatprep.mubr.msk.f32.mxu0 %vm478_vm0, %v6203_v12  ;;  %v1261_v12 = vld [vmem:[#allocation2 + $0x2] sm:$0xff] }
  0xaa   : > { %4978 = vmatmul.mubr.msk.f32.gmra.mrb[26].mxu1 %vm478_vm0, %v6316_v41 }
  0xab   : > { %5201 = vmatmul.mubr.msk.f32.gmra.mrb[8].mxu0 %vm478_vm0, %v6215_v6  ;;  %4980 = vmatprep.mubr.msk.f32.mxu1 %vm478_vm0, %v6318_v40  ;;  %v6340_v6 = vld [vmem:[#allocation2 + $0x170] sm:$0xff] }
  0xac   : > { %5203 = vmatprep.mubr.msk.f32.mxu0 %vm478_vm0, %v6219_v2 }
  0xae   : > { %4981 = vmatmul.mubr.msk.f32.gmra.mrb[28].mxu1 %vm478_vm0, %v6328_v17 }
  0xaf   : > { %5204 = vmatmul.mubr.msk.f32.gmra.mrb[10].mxu0 %vm478_vm0, %v6231_v62  ;;  %4983 = vmatprep.mubr.msk.f32.mxu1 %vm478_vm0, %v6330_v23  ;;  %v1262_v62 = vld [vmem:[#allocation2 + $0xa] sm:$0xff] }
  0xb0   : > { %5206 = vmatprep.mubr.msk.f32.mxu0 %vm478_vm0, %v6235_v57 }
  0xb2   : > { %4984 = vmatmul.mubr.msk.f32.gmra.mrb[30].mxu1 %vm478_vm0, %v6340_v6 }
  0xb3   : > { %5207 = vmatmul.mubr.msk.f32.gmra.mrb[12].mxu0 %vm478_vm0, %v6247_v30  ;;  %4988 = vmatprep.mubr.msk.f32.mxu1 %vm478_vm0, %v1261_v12  ;;  %v6939_v12 = vld [vmem:[#allocation9_spill] sm:$0xff] }
  0xb4   : > { %5209 = vmatprep.mubr.msk.f32.mxu0 %vm478_vm0, %v6251_v25 }
  0xb6   : > { %4989 = vmatmul.mubr.msk.f32.vlgmr.msra.gmra.mrb[0].mxu1 %vm478_vm0, %v1262_v62  ;;  %v2841_v62 = vld [vmem:[#allocation2 + $0x1a0] sm:$0xff] }
  0xb7   : > { %5210 = vmatmul.mubr.msk.f32.gmra.mrb[14].mxu0 %vm478_vm0, %v6261_v51  ;;  %4991 = vmatprep.mubr.msk.f32.mxu1 %vm478_vm0, %v5989_v53  ;;  %v6408_v53 = vld [vmem:[#allocation2 + $0x188] sm:$0xff] }
  0xb8   : > { %5212 = vmatprep.mubr.msk.f32.mxu0 %vm478_vm0, %v6263_v54  ;;  %5037 = vmatpush3.msra.mxu1 %v6127_v27  ;;  %v6940_v27 = vld [vmem:[#allocation24_spill] sm:$0xff] }
  0xb9   : > { %5336 = vmatprep.subr.mxu1 %v5674_v1  ;;  %v6398_v1 = vld [vmem:[#allocation2 + $0x180] sm:$0xff] }
  0xba   : > { %4992 = vmatmul.mubr.msk.f32.gmra.mrb[2].mxu1 %vm478_vm0, %v6001_v56  ;;  %v2840_v56 = vld [vmem:[#allocation2 + $0x198] sm:$0xff] }
  0xbb   : > { %5213 = vmatmul.mubr.msk.f32.gmra.mrb[16].mxu0 %vm478_vm0, %v6277_v52  ;;  %4994 = vmatprep.mubr.msk.f32.mxu1 %vm478_vm0, %v6005_v58 }
  0xbc   : > { %5215 = vmatprep.mubr.msk.f32.mxu0 %vm478_vm0, %v6281_v32 }
  0xbe   : > { %4995 = vmatmul.mubr.msk.f32.gmra.mrb[4].mxu1 %vm478_vm0, %v6021_v61 }
  0xbf   : > { %5216 = vmatmul.mubr.msk.f32.gmra.mrb[18].mxu0 %vm478_vm0, %v6292_v59  ;;  %4997 = vmatprep.mubr.msk.f32.mxu1 %vm478_vm0, %v6027_v63 }
  0xc0   : > { %5218 = vmatprep.mubr.msk.f32.mxu0 %vm478_vm0, %v6294_v35 }
  0xc2   : > { %4998 = vmatmul.mubr.msk.f32.gmra.mrb[6].mxu1 %vm478_vm0, %v6040_v0 }
  0xc3   : > { %5219 = vmatmul.mubr.msk.f32.gmra.mrb[20].mxu0 %vm478_vm0, %v6304_v38  ;;  %5000 = vmatprep.mubr.msk.f32.mxu1 %vm478_vm0, %v6044_v3 }
  0xc4   : > { %5221 = vmatprep.mubr.msk.f32.mxu0 %vm478_vm0, %v6306_v36 }
  0xc6   : > { %5001 = vmatmul.mubr.msk.f32.gmra.mrb[8].mxu1 %vm478_vm0, %v6056_v5 }
  0xc7   : > { %5222 = vmatmul.mubr.msk.f32.gmra.mrb[22].mxu0 %vm478_vm0, %v6316_v41  ;;  %5003 = vmatprep.mubr.msk.f32.mxu1 %vm478_vm0, %v6060_v7 }
  0xc8   : > { %5224 = vmatprep.mubr.msk.f32.mxu0 %vm478_vm0, %v6318_v40 }
  0xca   : > { %5004 = vmatmul.mubr.msk.f32.gmra.mrb[10].mxu1 %vm478_vm0, %v6072_v11 }
  0xcb   : > { %5225 = vmatmul.mubr.msk.f32.gmra.mrb[24].mxu0 %vm478_vm0, %v6328_v17  ;;  %5006 = vmatprep.mubr.msk.f32.mxu1 %vm478_vm0, %v6076_v13 }
  0xcc   : > { %5227 = vmatprep.mubr.msk.f32.mxu0 %vm478_vm0, %v6330_v23 }
  0xce   : > { %5007 = vmatmul.mubr.msk.f32.gmra.mrb[12].mxu1 %vm478_vm0, %v6088_v16 }
  0xcf   : > { %5228 = vmatmul.mubr.msk.f32.gmra.mrb[26].mxu0 %vm478_vm0, %v6340_v6  ;;  %5009 = vmatprep.mubr.msk.f32.mxu1 %vm478_vm0, %v6092_v18 }
  0xd0   : > { %5230 = vmatprep.mubr.msk.f32.mxu0 %vm478_vm0, %v6398_v1 }
  0xd2   : > { %5010 = vmatmul.mubr.msk.f32.gmra.mrb[14].mxu1 %vm478_vm0, %v6104_v20 }
  0xd3   : > { %5231 = vmatmul.mubr.msk.f32.gmra.mrb[28].mxu0 %vm478_vm0, %v6408_v53  ;;  %5012 = vmatprep.mubr.msk.f32.mxu1 %vm478_vm0, %v6106_v22 }
  0xd4   : > { %5233 = vmatprep.mubr.msk.f32.mxu0 %vm478_vm0, %v2840_v56  ;;  %v6941_v56 = vld [vmem:[#allocation10_spill] sm:$0xff] }
  0xd6   : > { %5013 = vmatmul.mubr.msk.f32.gmra.mrb[16].mxu1 %vm478_vm0, %v6115_v24 }
  0xd7   : > { %5234 = vmatmul.mubr.msk.f32.gmra.mrb[30].mxu0 %vm478_vm0, %v2841_v62  ;;  %5015 = vmatprep.mubr.msk.f32.mxu1 %vm478_vm0, %v6119_v26  ;;  %v6942_v62 = vld [vmem:[#allocation25_spill] sm:$0xff] }
  0xd8   : > { %5238 = vmatprep.mubr.msk.f32.mxu0 %vm478_vm0, %v5855_v55  ;;  %v6926_v55 = vld [vmem:[#allocation31_spill] sm:$0xff] }
  0xda   : > { %5016 = vmatmul.mubr.msk.f32.gmra.mrb[18].mxu1 %vm478_vm0, %v6135_v31 }
  0xdb   : > { %5239 = vmatmul.mubr.msk.f32.vlgmr.msra.gmra.mrb[0].mxu0 %vm478_vm0, %v5876_v10  ;;  %5018 = vmatprep.mubr.msk.f32.mxu1 %vm478_vm0, %v6140_v33  ;;  %v6927_v10 = vld [vmem:[#allocation3_spill] sm:$0xff] }
  0xdc   : > { %5287 = vmatpush3.msra.mxu0 %v6268_v60  ;;  %5241 = vmatprep.mubr.msk.f32.mxu0 %vm478_vm0, %v5886_v8  ;;  %v6928_v8 = vld [vmem:[#allocation18_spill] sm:$0xff]  ;;  %v6938_v60 = vld [vmem:[#allocation23_spill] sm:$0xff] }
  0xde   : > { %5019 = vmatmul.mubr.msk.f32.gmra.mrb[20].mxu1 %vm478_vm0, %v6153_v14 }
  0xdf   : > { %5242 = vmatmul.mubr.msk.f32.gmra.mrb[2].mxu0 %vm478_vm0, %v5911_v28  ;;  %5021 = vmatprep.mubr.msk.f32.mxu1 %vm478_vm0, %v6157_v37  ;;  %v6929_v28 = vld [vmem:[#allocation4_spill] sm:$0xff] }
  0xe0   : > { %5244 = vmatprep.mubr.msk.f32.mxu0 %vm478_vm0, %v5918_v34  ;;  %v6930_v34 = vld [vmem:[#allocation19_spill] sm:$0xff] }
  0xe2   : > { %5022 = vmatmul.mubr.msk.f32.gmra.mrb[22].mxu1 %vm478_vm0, %v6169_v39 }
  0xe3   : > { %5245 = vmatmul.mubr.msk.f32.gmra.mrb[4].mxu0 %vm478_vm0, %v5934_v29  ;;  %5024 = vmatprep.mubr.msk.f32.mxu1 %vm478_vm0, %v6173_v47  ;;  %v6931_v29 = vld [vmem:[#allocation5_spill] sm:$0xff] }
  0xe4   : > { %5247 = vmatprep.mubr.msk.f32.mxu0 %vm478_vm0, %v5937_v42  ;;  %v6932_v42 = vld [vmem:[#allocation20_spill] sm:$0xff] }
  0xe6   : > { %5025 = vmatmul.mubr.msk.f32.gmra.mrb[24].mxu1 %vm478_vm0, %v6185_v21 }
  0xe7   : > { %5248 = vmatmul.mubr.msk.f32.gmra.mrb[6].mxu0 %vm478_vm0, %v5949_v43  ;;  %5027 = vmatprep.mubr.msk.f32.mxu1 %vm478_vm0, %v6189_v19  ;;  %v6933_v43 = vld [vmem:[#allocation6_spill] sm:$0xff] }
  0xe8   : > { %5250 = vmatprep.mubr.msk.f32.mxu0 %vm478_vm0, %v5951_v44  ;;  %v5605_v44 = vld [vmem:[%s6849_s5 + $0x20] sm:$0xff] }
  0xea   : > { %5028 = vmatmul.mubr.msk.f32.gmra.mrb[26].mxu1 %vm478_vm0, %v6201_v15 }
  0xeb   : > { %5251 = vmatmul.mubr.msk.f32.gmra.mrb[8].mxu0 %vm478_vm0, %v5961_v45  ;;  %5030 = vmatprep.mubr.msk.f32.mxu1 %vm478_vm0, %v6205_v9  ;;  %v6934_v45 = vld [vmem:[#allocation21_spill] sm:$0xff] }
  0xec   : > { %5253 = vmatprep.mubr.msk.f32.mxu0 %vm478_vm0, %v5963_v46  ;;  %v6935_v46 = vld [vmem:[#allocation7_spill] sm:$0xff] }
  0xee   : > { %5031 = vmatmul.mubr.msk.f32.gmra.mrb[28].mxu1 %vm478_vm0, %v6217_v4 }
  0xef   : > { %5254 = vmatmul.mubr.msk.f32.gmra.mrb[10].mxu0 %vm478_vm0, %v5973_v49  ;;  %5033 = vmatprep.mubr.msk.f32.mxu1 %vm478_vm0, %v6221_v48  ;;  %v6936_v49 = vld [vmem:[#allocation22_spill] sm:$0xff] }
  0xf0   : > { %5256 = vmatprep.mubr.msk.f32.mxu0 %vm478_vm0, %v5975_v50  ;;  %v6937_v50 = vld [vmem:[#allocation8_spill] sm:$0xff] }
  0xf2   : > { %5034 = vmatmul.mubr.msk.f32.gmra.mrb[30].mxu1 %vm478_vm0, %v6926_v55 }
  0xf3   : > { %5257 = vmatmul.mubr.msk.f32.gmra.mrb[12].mxu0 %vm478_vm0, %v6927_v10  ;;  %5038 = vmatprep.mubr.msk.f32.mxu1 %vm478_vm0, %v6928_v8  ;;  %v6943_v10 = vld [vmem:[#allocation11_spill] sm:$0xff]  ;;  %v6944_v8 = vld [vmem:[#allocation26_spill] sm:$0xff] }
  0xf4   : > { %5259 = vmatprep.mubr.msk.f32.mxu0 %vm478_vm0, %v6929_v28  ;;  %v6945_v28 = vld [vmem:[#allocation12_spill] sm:$0xff] }
  0xf6   : > { %5039 = vmatmul.mubr.msk.f32.vlgmr.msra.gmra.mrb[0].mxu1 %vm478_vm0, %v6930_v34  ;;  %v6946_v34 = vld [vmem:[#allocation27_spill] sm:$0xff] }
  0xf7   : > { %5260 = vmatmul.mubr.msk.f32.gmra.mrb[14].mxu0 %vm478_vm0, %v6931_v29  ;;  %5041 = vmatprep.mubr.msk.f32.mxu1 %vm478_vm0, %v6932_v42  ;;  %v6947_v29 = vld [vmem:[#allocation13_spill] sm:$0xff]  ;;  %v6948_v42 = vld [vmem:[#allocation28_spill] sm:$0xff] }
  0xf8   : > { %5262 = vmatprep.mubr.msk.f32.mxu0 %vm478_vm0, %v6933_v43  ;;  %5337 = vmatpush3.msra.mxu1 %v5605_v44  ;;  %v6949_v43 = vld [vmem:[#allocation14_spill] sm:$0xff]  ;;  %v6950_v44 = vld [vmem:[#allocation29_spill] sm:$0xff] }
  0xfa   : > { %5042 = vmatmul.mubr.msk.f32.gmra.mrb[2].mxu1 %vm478_vm0, %v6934_v45  ;;  %v6951_v45 = vld [vmem:[#allocation15_spill] sm:$0xff] }
  0xfb   : > { %5263 = vmatmul.mubr.msk.f32.gmra.mrb[16].mxu0 %vm478_vm0, %v6935_v46  ;;  %5044 = vmatprep.mubr.msk.f32.mxu1 %vm478_vm0, %v6936_v49  ;;  %v6952_v46 = vld [vmem:[#allocation16_spill] sm:$0xff]  ;;  %v6532_v49 = vld [vmem:[#allocation2 + $0x181] sm:$0xff] }
  0xfc   : > { %5265 = vmatprep.mubr.msk.f32.mxu0 %vm478_vm0, %v6937_v50 }
  0xfe   : > { %5045 = vmatmul.mubr.msk.f32.gmra.mrb[4].mxu1 %vm478_vm0, %v6938_v60  ;;  %v6953_v60 = vld [vmem:[#allocation30_spill] sm:$0xff] }
  0xff   : > { %5266 = vmatmul.mubr.msk.f32.gmra.mrb[18].mxu0 %vm478_vm0, %v6939_v12  ;;  %5047 = vmatprep.mubr.msk.f32.mxu1 %vm478_vm0, %v6940_v27  ;;  %v6954_v27 = vld [vmem:[#allocation17_spill] sm:$0xff] }
 0x100   : > { %5268 = vmatprep.mubr.msk.f32.mxu0 %vm478_vm0, %v6941_v56 }
 0x102   : > { %5048 = vmatmul.mubr.msk.f32.gmra.mrb[6].mxu1 %vm478_vm0, %v6942_v62  ;;  %v6542_v62 = vld [vmem:[#allocation2 + $0x189] sm:$0xff] }
 0x103   : > { %5269 = vmatmul.mubr.msk.f32.gmra.mrb[20].mxu0 %vm478_vm0, %v6943_v10  ;;  %5050 = vmatprep.mubr.msk.f32.mxu1 %vm478_vm0, %v6944_v8  ;;  %v3228_v8 = vld [vmem:[#allocation2 + $0x1a1] sm:$0xff] }
 0x104   : > { %5271 = vmatprep.mubr.msk.f32.mxu0 %vm478_vm0, %v6945_v28 }
 0x106   : > { %5051 = vmatmul.mubr.msk.f32.gmra.mrb[8].mxu1 %vm478_vm0, %v6946_v34 }
 0x107   : > { %5272 = vmatmul.mubr.msk.f32.gmra.mrb[22].mxu0 %vm478_vm0, %v6947_v29  ;;  %5053 = vmatprep.mubr.msk.f32.mxu1 %vm478_vm0, %v6948_v42 }
 0x108   : > { %5274 = vmatprep.mubr.msk.f32.mxu0 %vm478_vm0, %v6949_v43 }
 0x10a   : > { %5054 = vmatmul.mubr.msk.f32.gmra.mrb[10].mxu1 %vm478_vm0, %v6950_v44 }
 0x10b   : > { %5275 = vmatmul.mubr.msk.f32.gmra.mrb[24].mxu0 %vm478_vm0, %v6951_v45  ;;  %5056 = vmatprep.mubr.msk.f32.mxu1 %vm478_vm0, %v6219_v2  ;;  %v3227_v2 = vld [vmem:[#allocation2 + $0x199] sm:$0xff] }
 0x10c   : > { %5277 = vmatprep.mubr.msk.f32.mxu0 %vm478_vm0, %v6952_v46 }
 0x10e   : > { %5057 = vmatmul.mubr.msk.f32.gmra.mrb[12].mxu1 %vm478_vm0, %v6953_v60 }
 0x10f   : > { %5278 = vmatmul.mubr.msk.f32.gmra.mrb[26].mxu0 %vm478_vm0, %v6954_v27  ;;  %5059 = vmatprep.mubr.msk.f32.mxu1 %vm478_vm0, %v6235_v57  ;;  %v2054_v57 = vld [vmem:[#allocation2 + $0xf9] sm:$0xff] }
 0x110   : > { %5280 = vmatprep.mubr.msk.f32.mxu0 %vm478_vm0, %v6532_v49 }
 0x112   : > { %5060 = vmatmul.mubr.msk.f32.gmra.mrb[14].mxu1 %vm478_vm0, %v6247_v30 }
 0x113   : > { %5281 = vmatmul.mubr.msk.f32.gmra.mrb[28].mxu0 %vm478_vm0, %v6542_v62  ;;  %5062 = vmatprep.mubr.msk.f32.mxu1 %vm478_vm0, %v6251_v25 }
 0x114   : > { %5283 = vmatprep.mubr.msk.f32.mxu0 %vm478_vm0, %v3227_v2 }
 0x116   : > { %5063 = vmatmul.mubr.msk.f32.gmra.mrb[16].mxu1 %vm478_vm0, %v6261_v51  ;;  %v2051_v51 = vld [vmem:[#allocation2 + $0xd9] sm:$0xff] }
 0x117   : > { %5284 = vmatmul.mubr.msk.f32.gmra.mrb[30].mxu0 %vm478_vm0, %v3228_v8  ;;  %5065 = vmatprep.mubr.msk.f32.mxu1 %vm478_vm0, %v6263_v54  ;;  %v2053_v54 = vld [vmem:[#allocation2 + $0xf1] sm:$0xff] }
 0x118   : > { %5288 = vmatprep.mubr.msk.f32.mxu0 %vm478_vm0, %v6005_v58  ;;  %v6955_v58 = vld [vmem:[#allocation32_spill] sm:$0xff] }
 0x11a   : > { %5066 = vmatmul.mubr.msk.f32.gmra.mrb[18].mxu1 %vm478_vm0, %v6277_v52  ;;  %v2052_v52 = vld [vmem:[#allocation2 + $0xe1] sm:$0xff] }
 0x11b   : > { %5289 = vmatmul.mubr.msk.f32.vlgmr.msra.gmra.mrb[0].mxu0 %vm478_vm0, %v6021_v61  ;;  %5068 = vmatprep.mubr.msk.f32.mxu1 %vm478_vm0, %v6281_v32  ;;  %v3614_v61 = vld [vmem:[#allocation2 + $0x19a] sm:$0xff] }
 0x11c   : > { %5291 = vmatprep.mubr.msk.f32.mxu0 %vm478_vm0, %v6027_v63  ;;  %v6956_v63 = vld [vmem:[#allocation33_spill] sm:$0xff] }
 0x11e   : > { %5069 = vmatmul.mubr.msk.f32.gmra.mrb[20].mxu1 %vm478_vm0, %v6292_v59 }
 0x11f   : > { %5292 = vmatmul.mubr.msk.f32.gmra.mrb[2].mxu0 %vm478_vm0, %v6040_v0  ;;  %5071 = vmatprep.mubr.msk.f32.mxu1 %vm478_vm0, %v6294_v35 }
 0x120   : > { %5294 = vmatprep.mubr.msk.f32.mxu0 %vm478_vm0, %v6044_v3 }
 0x122   : > { %5072 = vmatmul.mubr.msk.f32.gmra.mrb[22].mxu1 %vm478_vm0, %v6304_v38 }
 0x123   : > { %5295 = vmatmul.mubr.msk.f32.gmra.mrb[4].mxu0 %vm478_vm0, %v6056_v5  ;;  %5074 = vmatprep.mubr.msk.f32.mxu1 %vm478_vm0, %v6306_v36 }
 0x124   : > { %5297 = vmatprep.mubr.msk.f32.mxu0 %vm478_vm0, %v6060_v7 }
 0x126   : > { %5075 = vmatmul.mubr.msk.f32.gmra.mrb[24].mxu1 %vm478_vm0, %v6316_v41 }
 0x127   : > { %5298 = vmatmul.mubr.msk.f32.gmra.mrb[6].mxu0 %vm478_vm0, %v6072_v11  ;;  %5077 = vmatprep.mubr.msk.f32.mxu1 %vm478_vm0, %v6318_v40 }
 0x128   : > { %5300 = vmatprep.mubr.msk.f32.mxu0 %vm478_vm0, %v6076_v13 }
 0x12a   : > { %5078 = vmatmul.mubr.msk.f32.gmra.mrb[26].mxu1 %vm478_vm0, %v6328_v17 }
 0x12b   : > { %5301 = vmatmul.mubr.msk.f32.gmra.mrb[8].mxu0 %vm478_vm0, %v6088_v16  ;;  %5080 = vmatprep.mubr.msk.f32.mxu1 %vm478_vm0, %v6330_v23 }
 0x12c   : > { %5303 = vmatprep.mubr.msk.f32.mxu0 %vm478_vm0, %v6092_v18 }
 0x12e   : > { %5081 = vmatmul.mubr.msk.f32.gmra.mrb[28].mxu1 %vm478_vm0, %v6340_v6 }
 0x12f   : > { %5304 = vmatmul.mubr.msk.f32.gmra.mrb[10].mxu0 %vm478_vm0, %v6104_v20  ;;  %5083 = vmatprep.mubr.msk.f32.mxu1 %vm478_vm0, %v6398_v1 }
 0x130   : > { %5306 = vmatprep.mubr.msk.f32.mxu0 %vm478_vm0, %v6106_v22 }
 0x132   : > { %5084 = vmatmul.mubr.msk.f32.gmra.mrb[30].mxu1 %vm478_vm0, %v6408_v53 }
 0x133   : > { %5307 = vmatmul.mubr.msk.f32.gmra.mrb[12].mxu0 %vm478_vm0, %v6115_v24  ;;  %5112 = vmatprep.mubr.msk.f32.mxu1 %vm478_vm0, %v2051_v51 }
 0x134   : > { %5309 = vmatprep.mubr.msk.f32.mxu0 %vm478_vm0, %v6119_v26 }
 0x136   : > { %5113 = vmatmul.mubr.msk.f32.vlgmr.msra.gmra.mrb[16].mxu1 %vm478_vm0, %v2052_v52 }
 0x137   : > { %5310 = vmatmul.mubr.msk.f32.gmra.mrb[14].mxu0 %vm478_vm0, %v6135_v31  ;;  %5115 = vmatprep.mubr.msk.f32.mxu1 %vm478_vm0, %v2053_v54 }
 0x138   : > { %5312 = vmatprep.mubr.msk.f32.mxu0 %vm478_vm0, %v6140_v33 }
 0x13a   : > { %5116 = vmatmul.mubr.msk.f32.gmra.mrb[18].mxu1 %vm478_vm0, %v2054_v57 }
 0x13b   : > { %5313 = vmatmul.mubr.msk.f32.gmra.mrb[16].mxu0 %vm478_vm0, %v6153_v14  ;;  %5118 = vmatprep.mubr.msk.f32.mxu1 %vm478_vm0, %v6937_v50 }
 0x13c   : > { %5315 = vmatprep.mubr.msk.f32.mxu0 %vm478_vm0, %v6157_v37 }
 0x13e   : > { %5119 = vmatmul.mubr.msk.f32.gmra.mrb[20].mxu1 %vm478_vm0, %v6939_v12 }
 0x13f   : > { %5316 = vmatmul.mubr.msk.f32.gmra.mrb[18].mxu0 %vm478_vm0, %v6169_v39  ;;  %5121 = vmatprep.mubr.msk.f32.mxu1 %vm478_vm0, %v6941_v56 }
 0x140   : > { %5318 = vmatprep.mubr.msk.f32.mxu0 %vm478_vm0, %v6173_v47 }
 0x142   : > { %5122 = vmatmul.mubr.msk.f32.gmra.mrb[22].mxu1 %vm478_vm0, %v6943_v10 }
 0x143   : > { %5319 = vmatmul.mubr.msk.f32.gmra.mrb[20].mxu0 %vm478_vm0, %v6185_v21  ;;  %5124 = vmatprep.mubr.msk.f32.mxu1 %vm478_vm0, %v6945_v28 }
 0x144   : > { %5321 = vmatprep.mubr.msk.f32.mxu0 %vm478_vm0, %v6189_v19 }
 0x146   : > { %5125 = vmatmul.mubr.msk.f32.gmra.mrb[24].mxu1 %vm478_vm0, %v6947_v29 }
 0x147   : > { %5322 = vmatmul.mubr.msk.f32.gmra.mrb[22].mxu0 %vm478_vm0, %v6201_v15  ;;  %5127 = vmatprep.mubr.msk.f32.mxu1 %vm478_vm0, %v6949_v43 }
 0x148   : > { %5324 = vmatprep.mubr.msk.f32.mxu0 %vm478_vm0, %v6205_v9 }
 0x14a   : > { %5128 = vmatmul.mubr.msk.f32.gmra.mrb[26].mxu1 %vm478_vm0, %v6951_v45 }
 0x14b   : > { %5325 = vmatmul.mubr.msk.f32.gmra.mrb[24].mxu0 %vm478_vm0, %v6217_v4  ;;  %5130 = vmatprep.mubr.msk.f32.mxu1 %vm478_vm0, %v6952_v46 }
 0x14c   : > { %5327 = vmatprep.mubr.msk.f32.mxu0 %vm478_vm0, %v6221_v48  ;;  %v3615_v48 = vld [vmem:[#allocation2 + $0x1a2] sm:$0xff] }
 0x14e   : > { %5131 = vmatmul.mubr.msk.f32.gmra.mrb[28].mxu1 %vm478_vm0, %v6954_v27 }
 0x14f   : > { %5328 = vmatmul.mubr.msk.f32.gmra.mrb[26].mxu0 %vm478_vm0, %v6926_v55  ;;  %5133 = vmatprep.mubr.msk.f32.mxu1 %vm478_vm0, %v6532_v49 }
 0x150   : > { %5330 = vmatprep.mubr.msk.f32.mxu0 %vm478_vm0, %v6955_v58 }
 0x152   : > { %5134 = vmatmul.mubr.msk.f32.gmra.mrb[30].mxu1 %vm478_vm0, %v6542_v62 }
 0x153   : > { %5331 = vmatmul.mubr.msk.f32.gmra.mrb[28].mxu0 %vm478_vm0, %v6956_v63 }
 0x154   : > { %5333 = vmatprep.mubr.msk.f32.mxu0 %vm478_vm0, %v3614_v61 }
 0x157   : > { %5334 = vmatmul.mubr.msk.f32.gmra.mrb[30].mxu0 %vm478_vm0, %v3615_v48 }
 0x1c9   : > { %v5040_v0 = vpop.f32.mrb[0].mxu1 }
 0x1ca   : > { %v1844_v3 = vpop.f32.mrb[1].mxu1 }
 0x1cd   : > { %v5043_v4 = vpop.f32.mrb[2].mxu1 }
 0x1ce   : > { %v1854_v5 = vpop.f32.mrb[3].mxu1 }
 0x1d1   : > { %v5046_v6 = vpop.f32.mrb[4].mxu1 }
 0x1d2   : > { %v1864_v7 = vpop.f32.mrb[5].mxu1 }
 0x1d5   : > { %v5049_v9 = vpop.f32.mrb[6].mxu1 }
 0x1d6   : > { %v1874_v11 = vpop.f32.mrb[7].mxu1 }
 0x1d9   : > { %v6672_v13 = vpop.f32.mrb[8].mxu1 }
 0x1da   : > { %v6674_v15 = vpop.f32.mrb[9].mxu1 }
 0x1dd   : > { %v6676_v16 = vpop.f32.mrb[10].mxu1 }
 0x1de   : > { %v6678_v17 = vpop.f32.mrb[11].mxu1 }
 0x1e1   : > { %v6680_v18 = vpop.f32.mrb[12].mxu1 }
 0x1e2   : > { %v6682_v19 = vpop.f32.mrb[13].mxu1 }
 0x1e5   : > { %v6684_v20 = vpop.f32.mrb[14].mxu1 }
 0x1e6   : > { %v6686_v22 = vpop.f32.mrb[15].mxu1 }
 0x1ee   : > { %v5290_v24 = vpop.f32.mrb[0].mxu0 }
 0x1ef   : > { %v5338_v25 = vadd.f32 %v5290_v24, %v5040_v0  ;;  %v3780_v26 = vpop.f32.mrb[1].mxu0 }
 0x1f0   : > { %v5339_v30 = vadd.f32 %v3780_v26, %v1844_v3 }
 0x1f1   : > { %v3972_v31 = vsel %vm478_vm0, %v5338_v25, 0.0  ;;  %v4042_v32 = vmul.f32 %v5338_v25, %v5338_v25  ;;  %4144 = vst.msk [vmem:[%s6693_s22 + $0x8] sm:$0xff] %vm478_vm0, %v5338_v25 }
 0x1f2   : > { %v3971_v33 = vsel %vm478_vm0, %v5339_v30, 0.0  ;;  %v4041_v35 = vmul.f32 %v5339_v30, %v5339_v30  ;;  %4143 = vst.msk [vmem:[%s6693_s22] sm:$0xff] %vm478_vm0, %v5339_v30  ;;  %v5293_v14 = vpop.f32.mrb[2].mxu0 }
 0x1f3   : > { %v4074_v36 = vsel %vm478_vm0, %v4042_v32, 0.0  ;;  %v3973_v37 = vadd.f32 %v3972_v31, %v3971_v33  ;;  %v5340_v38 = vadd.f32 %v5293_v14, %v5043_v4  ;;  %v3790_v39 = vpop.f32.mrb[3].mxu0 }
 0x1f4   : > { %v4073_v40 = vsel %vm478_vm0, %v4041_v35, 0.0  ;;  %v5341_v47 = vadd.f32 %v3790_v39, %v1854_v5 }
 0x1f5   : > { %v4075_v41 = vadd.f32 %v4074_v36, %v4073_v40  ;;  %4146 = vst.msk [vmem:[%s6693_s22 + $0x18] sm:$0xff] %vm478_vm0, %v5340_v38  ;;  %v4044_v21 = vmul.f32 %v5340_v38, %v5340_v38  ;;  %v3976_v12 = vsel %vm478_vm0, %v5340_v38, 0.0 }
 0x1f6   : > { %v3974_v23 = vsel %vm478_vm0, %v5341_v47, 0.0  ;;  %v4043_v59 = vmul.f32 %v5341_v47, %v5341_v47  ;;  %4145 = vst.msk [vmem:[%s6693_s22 + $0x10] sm:$0xff] %vm478_vm0, %v5341_v47  ;;  %v5296_v1 = vpop.f32.mrb[4].mxu0 }
 0x1f7   : > { %v3975_v53 = vadd.f32 %v3974_v23, %v3973_v37  ;;  %v5342_v55 = vadd.f32 %v5296_v1, %v5046_v6  ;;  %v3800_v50 = vpop.f32.mrb[5].mxu0  ;;  %v4078_v29 = vsel %vm478_vm0, %v4044_v21, 0.0 }
 0x1f8   : > { %v4076_v56 = vsel %vm478_vm0, %v4043_v59, 0.0  ;;  %v5343_v10 = vadd.f32 %v3800_v50, %v1864_v7 }
 0x1f9   : > { %v4077_v28 = vadd.f32 %v4076_v56, %v4075_v41  ;;  %4148 = vst.msk [vmem:[%s6693_s22 + $0x28] sm:$0xff] %vm478_vm0, %v5342_v55  ;;  %v3977_v34 = vadd.f32 %v3976_v12, %v3975_v53  ;;  %v4046_v42 = vmul.f32 %v5342_v55, %v5342_v55  ;;  %v3980_v62 = vsel %vm478_vm0, %v5342_v55, 0.0 }
 0x1fa   : > { %v3978_v43 = vsel %vm478_vm0, %v5343_v10, 0.0  ;;  %v4045_v44 = vmul.f32 %v5343_v10, %v5343_v10  ;;  %4147 = vst.msk [vmem:[%s6693_s22 + $0x20] sm:$0xff] %vm478_vm0, %v5343_v10  ;;  %v5299_v45 = vpop.f32.mrb[6].mxu0 }
 0x1fb   : > { %v3979_v46 = vadd.f32 %v3978_v43, %v3977_v34  ;;  %v4079_v49 = vadd.f32 %v4078_v29, %v4077_v28  ;;  %v5344_v60 = vadd.f32 %v5299_v45, %v5049_v9  ;;  %v3810_v27 = vpop.f32.mrb[7].mxu0  ;;  %v4082_v54 = vsel %vm478_vm0, %v4046_v42, 0.0 }
 0x1fc   : > { %v4080_v2 = vsel %vm478_vm0, %v4045_v44, 0.0  ;;  %v5345_v8 = vadd.f32 %v3810_v27, %v1874_v11 }
 0x1fd   : > { %v4081_v51 = vadd.f32 %v4080_v2, %v4079_v49  ;;  %4150 = vst.msk [vmem:[%s6693_s22 + $0x38] sm:$0xff] %vm478_vm0, %v5344_v60  ;;  %v3981_v52 = vadd.f32 %v3980_v62, %v3979_v46  ;;  %v4048_v57 = vmul.f32 %v5344_v60, %v5344_v60  ;;  %v3984_v5 = vsel %vm478_vm0, %v5344_v60, 0.0 }
 0x1fe   : > { %v3982_v58 = vsel %vm478_vm0, %v5345_v8, 0.0  ;;  %v4047_v61 = vmul.f32 %v5345_v8, %v5345_v8  ;;  %4149 = vst.msk [vmem:[%s6693_s22 + $0x30] sm:$0xff] %vm478_vm0, %v5345_v8  ;;  %v5302_v63 = vpop.f32.mrb[8].mxu0 }
 0x1ff   : > { %v3983_v48 = vadd.f32 %v3982_v58, %v3981_v52  ;;  %v4083_v0 = vadd.f32 %v4082_v54, %v4081_v51  ;;  %v5346_v3 = vadd.f32 %v5302_v63, %v6672_v13  ;;  %v3820_v4 = vpop.f32.mrb[9].mxu0  ;;  %v4086_v24 = vsel %vm478_vm0, %v4048_v57, 0.0 }
 0x200   : > { %v4084_v6 = vsel %vm478_vm0, %v4047_v61, 0.0  ;;  %v5347_v7 = vadd.f32 %v3820_v4, %v6674_v15 }
 0x201   : > { %v4085_v9 = vadd.f32 %v4084_v6, %v4083_v0  ;;  %4152 = vst.msk [vmem:[%s6693_s22 + $0x48] sm:$0xff] %vm478_vm0, %v5346_v3  ;;  %v3985_v11 = vadd.f32 %v3984_v5, %v3983_v48  ;;  %v4050_v25 = vmul.f32 %v5346_v3, %v5346_v3  ;;  %v3988_v35 = vsel %vm478_vm0, %v5346_v3, 0.0 }
 0x202   : > { %v3986_v26 = vsel %vm478_vm0, %v5347_v7, 0.0  ;;  %v4049_v30 = vmul.f32 %v5347_v7, %v5347_v7  ;;  %4151 = vst.msk [vmem:[%s6693_s22 + $0x40] sm:$0xff] %vm478_vm0, %v5347_v7  ;;  %v5305_v13 = vpop.f32.mrb[10].mxu0 }
 0x203   : > { %v3987_v31 = vadd.f32 %v3986_v26, %v3985_v11  ;;  %v4087_v32 = vadd.f32 %v4086_v24, %v4085_v9  ;;  %v5348_v33 = vadd.f32 %v5305_v13, %v6676_v16  ;;  %v3830_v15 = vpop.f32.mrb[11].mxu0  ;;  %v4090_v39 = vsel %vm478_vm0, %v4050_v25, 0.0 }
 0x204   : > { %v4088_v14 = vsel %vm478_vm0, %v4049_v30, 0.0  ;;  %v5349_v36 = vadd.f32 %v3830_v15, %v6678_v17 }
 0x205   : > { %v4089_v37 = vadd.f32 %v4088_v14, %v4087_v32  ;;  %4154 = vst.msk [vmem:[%s6693_s22 + $0x58] sm:$0xff] %vm478_vm0, %v5348_v33  ;;  %v3989_v38 = vadd.f32 %v3988_v35, %v3987_v31  ;;  %v4052_v40 = vmul.f32 %v5348_v33, %v5348_v33  ;;  %v3992_v1 = vsel %vm478_vm0, %v5348_v33, 0.0 }
 0x206   : > { %v3990_v47 = vsel %vm478_vm0, %v5349_v36, 0.0  ;;  %v4051_v41 = vmul.f32 %v5349_v36, %v5349_v36  ;;  %4153 = vst.msk [vmem:[%s6693_s22 + $0x50] sm:$0xff] %vm478_vm0, %v5349_v36  ;;  %v5308_v16 = vpop.f32.mrb[12].mxu0 }
 0x207   : > { %v3991_v21 = vadd.f32 %v3990_v47, %v3989_v38  ;;  %v4091_v23 = vadd.f32 %v4090_v39, %v4089_v37  ;;  %v5350_v59 = vadd.f32 %v5308_v16, %v6680_v18  ;;  %v3840_v17 = vpop.f32.mrb[13].mxu0  ;;  %v4094_v56 = vsel %vm478_vm0, %v4052_v40, 0.0 }
 0x208   : > { %v4092_v53 = vsel %vm478_vm0, %v4051_v41, 0.0  ;;  %v5351_v55 = vadd.f32 %v3840_v17, %v6682_v19 }
 0x209   : > { %v4093_v50 = vadd.f32 %v4092_v53, %v4091_v23  ;;  %4156 = vst.msk [vmem:[%s6693_s22 + $0x68] sm:$0xff] %vm478_vm0, %v5350_v59  ;;  %v3993_v12 = vadd.f32 %v3992_v1, %v3991_v21  ;;  %v4054_v10 = vmul.f32 %v5350_v59, %v5350_v59  ;;  %v5114_v18 = vpop.f32.mrb[16].mxu1  ;;  %v3996_v46 = vsel %vm478_vm0, %v5350_v59, 0.0 }
 0x20a   : > { %v3994_v28 = vsel %vm478_vm0, %v5351_v55, 0.0  ;;  %v4053_v34 = vmul.f32 %v5351_v55, %v5351_v55  ;;  %4155 = vst.msk [vmem:[%s6693_s22 + $0x60] sm:$0xff] %vm478_vm0, %v5351_v55  ;;  %v5311_v29 = vpop.f32.mrb[14].mxu0  ;;  %v2311_v44 = vpop.f32.mrb[17].mxu1 }
 0x20b   : > { %v3995_v42 = vadd.f32 %v3994_v28, %v3993_v12  ;;  %v4095_v43 = vadd.f32 %v4094_v56, %v4093_v50  ;;  %v5352_v19 = vadd.f32 %v5311_v29, %v6684_v20  ;;  %v3850_v45 = vpop.f32.mrb[15].mxu0  ;;  %v4098_v2 = vsel %vm478_vm0, %v4054_v10, 0.0 }
 0x20c   : > { %v4096_v49 = vsel %vm478_vm0, %v4053_v34, 0.0  ;;  %v5353_v60 = vadd.f32 %v3850_v45, %v6686_v22 }
 0x20d   : > { %v4097_v27 = vadd.f32 %v4096_v49, %v4095_v43  ;;  %4158 = vst.msk [vmem:[%s6693_s22 + $0x78] sm:$0xff] %vm478_vm0, %v5352_v19  ;;  %v3997_v62 = vadd.f32 %v3996_v46, %v3995_v42  ;;  %v4056_v8 = vmul.f32 %v5352_v19, %v5352_v19  ;;  %v5117_v20 = vpop.f32.mrb[18].mxu1  ;;  %v4000_v48 = vsel %vm478_vm0, %v5352_v19, 0.0 }
 0x20e   : > { %v3998_v51 = vsel %vm478_vm0, %v5353_v60, 0.0  ;;  %v4055_v52 = vmul.f32 %v5353_v60, %v5353_v60  ;;  %4157 = vst.msk [vmem:[%s6693_s22 + $0x70] sm:$0xff] %vm478_vm0, %v5353_v60  ;;  %v5314_v54 = vpop.f32.mrb[16].mxu0  ;;  %v2321_v22 = vpop.f32.mrb[19].mxu1 }
 0x20f   : > { %v3999_v57 = vadd.f32 %v3998_v51, %v3997_v62  ;;  %v4099_v58 = vadd.f32 %v4098_v2, %v4097_v27  ;;  %v5354_v61 = vadd.f32 %v5314_v54, %v5114_v18  ;;  %v3860_v63 = vpop.f32.mrb[17].mxu0  ;;  %v4102_v6 = vsel %vm478_vm0, %v4056_v8, 0.0 }
 0x210   : > { %v4100_v0 = vsel %vm478_vm0, %v4055_v52, 0.0  ;;  %v5355_v3 = vadd.f32 %v3860_v63, %v2311_v44 }
 0x211   : > { %v4101_v4 = vadd.f32 %v4100_v0, %v4099_v58  ;;  %4160 = vst.msk [vmem:[%s6693_s22 + $0x88] sm:$0xff] %vm478_vm0, %v5354_v61  ;;  %v4001_v5 = vadd.f32 %v4000_v48, %v3999_v57  ;;  %v4058_v7 = vmul.f32 %v5354_v61, %v5354_v61  ;;  %v5120_v24 = vpop.f32.mrb[20].mxu1  ;;  %v4004_v33 = vsel %vm478_vm0, %v5354_v61, 0.0 }
 0x212   : > { %v4002_v9 = vsel %vm478_vm0, %v5355_v3, 0.0  ;;  %v4057_v11 = vmul.f32 %v5355_v3, %v5355_v3  ;;  %4159 = vst.msk [vmem:[%s6693_s22 + $0x80] sm:$0xff] %vm478_vm0, %v5355_v3  ;;  %v5317_v25 = vpop.f32.mrb[18].mxu0  ;;  %v2331_v31 = vpop.f32.mrb[21].mxu1 }
 0x213   : > { %v4003_v26 = vadd.f32 %v4002_v9, %v4001_v5  ;;  %v4103_v30 = vadd.f32 %v4102_v6, %v4101_v4  ;;  %v5356_v13 = vadd.f32 %v5317_v25, %v5117_v20  ;;  %v3870_v32 = vpop.f32.mrb[19].mxu0  ;;  %v4106_v37 = vsel %vm478_vm0, %v4058_v7, 0.0 }
 0x214   : > { %v4104_v15 = vsel %vm478_vm0, %v4057_v11, 0.0  ;;  %v5357_v35 = vadd.f32 %v3870_v32, %v2321_v22 }
 0x215   : > { %v4105_v14 = vadd.f32 %v4104_v15, %v4103_v30  ;;  %4162 = vst.msk [vmem:[%s6693_s22 + $0x98] sm:$0xff] %vm478_vm0, %v5356_v13  ;;  %v4005_v36 = vadd.f32 %v4004_v33, %v4003_v26  ;;  %v4060_v38 = vmul.f32 %v5356_v13, %v5356_v13  ;;  %v5123_v47 = vpop.f32.mrb[22].mxu1  ;;  %v4008_v1 = vsel %vm478_vm0, %v5356_v13, 0.0 }
 0x216   : > { %v4006_v39 = vsel %vm478_vm0, %v5357_v35, 0.0  ;;  %v4059_v40 = vmul.f32 %v5357_v35, %v5357_v35  ;;  %4161 = vst.msk [vmem:[%s6693_s22 + $0x90] sm:$0xff] %vm478_vm0, %v5357_v35  ;;  %v5320_v41 = vpop.f32.mrb[20].mxu0  ;;  %v2341_v59 = vpop.f32.mrb[23].mxu1 }
 0x217   : > { %v4007_v16 = vadd.f32 %v4006_v39, %v4005_v36  ;;  %v4107_v21 = vadd.f32 %v4106_v37, %v4105_v14  ;;  %v5358_v23 = vadd.f32 %v5320_v41, %v5120_v24  ;;  %v3880_v17 = vpop.f32.mrb[21].mxu0  ;;  %v4110_v56 = vsel %vm478_vm0, %v4060_v38, 0.0 }
 0x218   : > { %v4108_v53 = vsel %vm478_vm0, %v4059_v40, 0.0  ;;  %v5359_v55 = vadd.f32 %v3880_v17, %v2331_v31 }
 0x219   : > { %v4109_v50 = vadd.f32 %v4108_v53, %v4107_v21  ;;  %4164 = vst.msk [vmem:[%s6693_s22 + $0xa8] sm:$0xff] %vm478_vm0, %v5358_v23  ;;  %v4009_v12 = vadd.f32 %v4008_v1, %v4007_v16  ;;  %v4062_v10 = vmul.f32 %v5358_v23, %v5358_v23  ;;  %v5126_v18 = vpop.f32.mrb[24].mxu1  ;;  %v4012_v46 = vsel %vm478_vm0, %v5358_v23, 0.0 }
 0x21a   : > { %v4010_v28 = vsel %vm478_vm0, %v5359_v55, 0.0  ;;  %v4061_v34 = vmul.f32 %v5359_v55, %v5359_v55  ;;  %4163 = vst.msk [vmem:[%s6693_s22 + $0xa0] sm:$0xff] %vm478_vm0, %v5359_v55  ;;  %v5323_v29 = vpop.f32.mrb[22].mxu0  ;;  %v2351_v44 = vpop.f32.mrb[25].mxu1 }
 0x21b   : > { %v4011_v42 = vadd.f32 %v4010_v28, %v4009_v12  ;;  %v4111_v43 = vadd.f32 %v4110_v56, %v4109_v50  ;;  %v5360_v19 = vadd.f32 %v5323_v29, %v5123_v47  ;;  %v3890_v45 = vpop.f32.mrb[23].mxu0  ;;  %v4114_v2 = vsel %vm478_vm0, %v4062_v10, 0.0 }
 0x21c   : > { %v4112_v49 = vsel %vm478_vm0, %v4061_v34, 0.0  ;;  %v5361_v60 = vadd.f32 %v3890_v45, %v2341_v59 }
 0x21d   : > { %v4113_v27 = vadd.f32 %v4112_v49, %v4111_v43  ;;  %4166 = vst.msk [vmem:[%s6693_s22 + $0xb8] sm:$0xff] %vm478_vm0, %v5360_v19  ;;  %v4013_v62 = vadd.f32 %v4012_v46, %v4011_v42  ;;  %v4064_v8 = vmul.f32 %v5360_v19, %v5360_v19  ;;  %v5129_v20 = vpop.f32.mrb[26].mxu1  ;;  %v4016_v48 = vsel %vm478_vm0, %v5360_v19, 0.0 }
 0x21e   : > { %v4014_v51 = vsel %vm478_vm0, %v5361_v60, 0.0  ;;  %v4063_v52 = vmul.f32 %v5361_v60, %v5361_v60  ;;  %4165 = vst.msk [vmem:[%s6693_s22 + $0xb0] sm:$0xff] %vm478_vm0, %v5361_v60  ;;  %v5326_v54 = vpop.f32.mrb[24].mxu0  ;;  %v2361_v22 = vpop.f32.mrb[27].mxu1 }
 0x21f   : > { %v4015_v57 = vadd.f32 %v4014_v51, %v4013_v62  ;;  %v4115_v58 = vadd.f32 %v4114_v2, %v4113_v27  ;;  %v5362_v61 = vadd.f32 %v5326_v54, %v5126_v18  ;;  %v3900_v63 = vpop.f32.mrb[25].mxu0  ;;  %v4118_v6 = vsel %vm478_vm0, %v4064_v8, 0.0 }
 0x220   : > { %v4116_v0 = vsel %vm478_vm0, %v4063_v52, 0.0  ;;  %v5363_v3 = vadd.f32 %v3900_v63, %v2351_v44 }
 0x221   : > { %v4117_v4 = vadd.f32 %v4116_v0, %v4115_v58  ;;  %4168 = vst.msk [vmem:[%s6693_s22 + $0xc8] sm:$0xff] %vm478_vm0, %v5362_v61  ;;  %v4017_v5 = vadd.f32 %v4016_v48, %v4015_v57  ;;  %v4066_v7 = vmul.f32 %v5362_v61, %v5362_v61  ;;  %v5132_v24 = vpop.f32.mrb[28].mxu1  ;;  %v4020_v33 = vsel %vm478_vm0, %v5362_v61, 0.0 }
 0x222   : > { %v4018_v9 = vsel %vm478_vm0, %v5363_v3, 0.0  ;;  %v4065_v11 = vmul.f32 %v5363_v3, %v5363_v3  ;;  %4167 = vst.msk [vmem:[%s6693_s22 + $0xc0] sm:$0xff] %vm478_vm0, %v5363_v3  ;;  %v5329_v25 = vpop.f32.mrb[26].mxu0  ;;  %v2371_v31 = vpop.f32.mrb[29].mxu1 }
 0x223   : > { %v4019_v26 = vadd.f32 %v4018_v9, %v4017_v5  ;;  %v4119_v30 = vadd.f32 %v4118_v6, %v4117_v4  ;;  %v5364_v13 = vadd.f32 %v5329_v25, %v5129_v20  ;;  %v3910_v32 = vpop.f32.mrb[27].mxu0  ;;  %v4122_v37 = vsel %vm478_vm0, %v4066_v7, 0.0 }
 0x224   : > { %v4120_v15 = vsel %vm478_vm0, %v4065_v11, 0.0  ;;  %v5365_v35 = vadd.f32 %v3910_v32, %v2361_v22 }
 0x225   : > { %v4121_v14 = vadd.f32 %v4120_v15, %v4119_v30  ;;  %4170 = vst.msk [vmem:[%s6693_s22 + $0xd8] sm:$0xff] %vm478_vm0, %v5364_v13  ;;  %v4021_v36 = vadd.f32 %v4020_v33, %v4019_v26  ;;  %v4068_v38 = vmul.f32 %v5364_v13, %v5364_v13  ;;  %v5135_v47 = vpop.f32.mrb[30].mxu1  ;;  %v4024_v1 = vsel %vm478_vm0, %v5364_v13, 0.0 }
 0x226   : > { %v4022_v39 = vsel %vm478_vm0, %v5365_v35, 0.0  ;;  %v4067_v40 = vmul.f32 %v5365_v35, %v5365_v35  ;;  %4169 = vst.msk [vmem:[%s6693_s22 + $0xd0] sm:$0xff] %vm478_vm0, %v5365_v35  ;;  %v5332_v41 = vpop.f32.mrb[28].mxu0  ;;  %v2381_v59 = vpop.f32.mrb[31].mxu1 }
 0x227   : > { %v4023_v16 = vadd.f32 %v4022_v39, %v4021_v36  ;;  %v4123_v21 = vadd.f32 %v4122_v37, %v4121_v14  ;;  %v5366_v23 = vadd.f32 %v5332_v41, %v5132_v24  ;;  %v3920_v17 = vpop.f32.mrb[29].mxu0  ;;  %v4126_v56 = vsel %vm478_vm0, %v4068_v38, 0.0 }
 0x228   : > { %v4124_v53 = vsel %vm478_vm0, %v4067_v40, 0.0  ;;  %v5367_v55 = vadd.f32 %v3920_v17, %v2371_v31 }
 0x229   : > { %v4125_v50 = vadd.f32 %v4124_v53, %v4123_v21  ;;  %4172 = vst.msk [vmem:[%s6693_s22 + $0xe8] sm:$0xff] %vm478_vm0, %v5366_v23  ;;  %v4025_v12 = vadd.f32 %v4024_v1, %v4023_v16  ;;  %v4070_v10 = vmul.f32 %v5366_v23, %v5366_v23  ;;  %v4028_v44 = vsel %vm478_vm0, %v5366_v23, 0.0 }
 0x22a   : > { %v4026_v28 = vsel %vm478_vm0, %v5367_v55, 0.0  ;;  %v4069_v34 = vmul.f32 %v5367_v55, %v5367_v55  ;;  %4171 = vst.msk [vmem:[%s6693_s22 + $0xe0] sm:$0xff] %vm478_vm0, %v5367_v55  ;;  %v5335_v18 = vpop.f32.mrb[30].mxu0 }
 0x22b   : > { %v4027_v29 = vadd.f32 %v4026_v28, %v4025_v12  ;;  %v4127_v42 = vadd.f32 %v4126_v56, %v4125_v50  ;;  %v5368_v43 = vadd.f32 %v5335_v18, %v5135_v47  ;;  %v3930_v19 = vpop.f32.mrb[31].mxu0  ;;  %v4130_v27 = vsel %vm478_vm0, %v4070_v10, 0.0 }
 0x22c   : > { %v4128_v45 = vsel %vm478_vm0, %v4069_v34, 0.0  ;;  %v5369_v46 = vadd.f32 %v3930_v19, %v2381_v59 }
 0x22d   : > { %v4129_v49 = vadd.f32 %v4128_v45, %v4127_v42  ;;  %4174 = vst.msk [vmem:[%s6693_s22 + $0xf8] sm:$0xff] %vm478_vm0, %v5368_v43  ;;  %v4029_v60 = vadd.f32 %v4028_v44, %v4027_v29  ;;  %v4072_v62 = vmul.f32 %v5368_v43, %v5368_v43  ;;  %v4032_v20 = vsel %vm478_vm0, %v5368_v43, 0.0 }
 0x22e   : > { %v4030_v2 = vsel %vm478_vm0, %v5369_v46, 0.0  ;;  %v4071_v8 = vmul.f32 %v5369_v46, %v5369_v46  ;;  %4173 = vst.msk [vmem:[%s6693_s22 + $0xf0] sm:$0xff] %vm478_vm0, %v5369_v46 }
 0x22f   : > { %v4031_v51 = vadd.f32 %v4030_v2, %v4029_v60  ;;  %v4131_v52 = vadd.f32 %v4130_v27, %v4129_v49  ;;  %v4134_v61 = vsel %vm478_vm0, %v4072_v62, 0.0 }
 0x230   : > { %v4132_v54 = vsel %vm478_vm0, %v4071_v8, 0.0 }
 0x231   : > { %v4033_v57 = vadd.f32 %v4032_v20, %v4031_v51  ;;  %v4133_v58 = vadd.f32 %v4132_v54, %v4131_v52 }
 0x233   : > { %v4034_v22 = vrot.slane %v4033_v57, 4  ;;  %v4135_v63 = vadd.f32 %v4134_v61, %v4133_v58 }
 0x235   : > { %v4035_v48 = vadd.f32 %v4034_v22, %v4033_v57  ;;  %v4136_v0 = vrot.slane %v4135_v63, 4 }
 0x237   : > { %v4036_v3 = vrot.slane %v4035_v48, 2  ;;  %v4137_v4 = vadd.f32 %v4136_v0, %v4135_v63 }
 0x239   : > { %v4037_v5 = vadd.f32 %v4036_v3, %v4035_v48  ;;  %v4138_v6 = vrot.slane %v4137_v4, 2 }
 0x23b   : > { %v4038_v7 = vrot.slane %v4037_v5, 1  ;;  %v4139_v9 = vadd.f32 %v4138_v6, %v4137_v4 }
 0x23d   : > { %v4039_v11 = vadd.f32 %v4038_v7, %v4037_v5  ;;  %v4140_v24 = vrot.slane %v4139_v9, 1 }
 0x23f   : > { %4040 = vst.msk [vmem:[%s319_s24] sm:$0x1] %vm487_vm1, %v4039_v11  ;;  %v4141_v25 = vadd.f32 %v4140_v24, %v4139_v9 }
 0x241   : > { %4142 = vst.msk [vmem:[%s322_s29] sm:$0x1] %vm487_vm1, %v4141_v25 }
 0x242 PF: > { %s19_s27 = sadd.s32 1, %s5612_s27  }
 0x243   : > { %p16_p4 = scmp.ge.s32.totalorder %s19_s27, 4  }
 0x245   :  { %18 = sbr.rel (!%p16_p4) target bundleno = 1 (0x1), region = 109 }

</bundles_post_ra>
